<compile_context>
chip_gen: v6e
topology: v6e:2x2x1
jax: 0.10.0
libtpu: 0.0.40
codegen_flags: <defaults>
</compile_context>

<pallas_src>
import jax
import jax.numpy as jnp
from jax.experimental import pallas as pl
from jax.experimental.pallas import tpu as pltpu

# Fixed geometry implied by the PyTorch module (fc1 = Linear(16*8*8, 128)).
_H, _W, _CIN = 32, 32, 3
_C1, _C2 = 8, 16
_NHID, _NOUT = 128, 10


# ---------------------------------------------------------------------------
# Fused kernel: whole forward pass, everything resident in VMEM.
# ---------------------------------------------------------------------------
def _cnn2_fused_kernel(x_ref, r1_ref, b1_ref, s1e_ref, s1o_ref,
                       r2_ref, b2_ref, s2e_ref, s2o_ref,
                       w1_ref, fb1_ref, w2_ref, fb2_ref,
                       o_ref, xp1_ref, xp2_ref):
    f32 = jnp.float32
    B, H1, WC1 = x_ref.shape                     # (B, 32, 32*3)
    H2 = H1 // 2                                 # 16

    # ---- conv1 (3x3, pad=1) + bias + ReLU ---------------------------------
    # H padding via zeroed VMEM scratch; W padding lives inside the banded
    # weight matrices r1_ref.  Batch is folded into the GEMM M dimension.
    xp1_ref[...] = jnp.zeros_like(xp1_ref)
    xp1_ref[:, 1:H1 + 1, :] = x_ref[...]
    acc1 = jnp.zeros((B * H1, r1_ref.shape[-1]), f32)        # (B*32, 32*8)
    for ky in range(3):
        lhs = xp1_ref[:, ky:ky + H1, :].reshape(B * H1, WC1)
        acc1 += jnp.dot(lhs, r1_ref[ky], preferred_element_type=f32)
    acc1 = jnp.maximum(acc1 + b1_ref[...], 0.0)

    # ---- maxpool 2x2 -------------------------------------------------------
    # W direction: exact 0/1 column selectors on the MXU (lane axis stays
    # (x, channel)-dense).  H direction: adjacent-row max (rows are (b, y)).
    pw = jnp.maximum(jnp.dot(acc1, s1e_ref[...], preferred_element_type=f32),
                     jnp.dot(acc1, s1o_ref[...], preferred_element_type=f32))
    p1 = pw.reshape(B * H2, 2, pw.shape[-1]).max(axis=1)     # (B*16, 16*8)

    # ---- conv2 (3x3, pad=1) + bias + ReLU ---------------------------------
    xp2_ref[...] = jnp.zeros_like(xp2_ref)
    xp2_ref[:, 1:H2 + 1, :] = p1.reshape(B, H2, p1.shape[-1])
    WC2 = xp2_ref.shape[-1]                                  # 16*8 = 128
    acc2 = jnp.zeros((B * H2, r2_ref.shape[-1]), f32)        # (B*16, 16*16)
    for ky in range(3):
        lhs = xp2_ref[:, ky:ky + H2, :].reshape(B * H2, WC2)
        acc2 += jnp.dot(lhs, r2_ref[ky], preferred_element_type=f32)
    acc2 = jnp.maximum(acc2 + b2_ref[...], 0.0)

    # ---- maxpool 2x2 -------------------------------------------------------
    pw2 = jnp.maximum(jnp.dot(acc2, s2e_ref[...], preferred_element_type=f32),
                      jnp.dot(acc2, s2o_ref[...], preferred_element_type=f32))
    p2 = pw2.reshape(B * (H2 // 2), 2, pw2.shape[-1]).max(axis=1)  # (B*8, 128)

    # ---- fc1 + ReLU + fc2 (torch's (C,H,W) flatten folded into w1 blocks) --
    n_rows = H2 // 2                                          # 8 rows / image
    for b in range(B):
        hb = jnp.zeros((1, w1_ref.shape[-1]), f32)            # (1, 128)
        for yy in range(n_rows):
            row = p2[b * n_rows + yy:b * n_rows + yy + 1, :]  # (1, 128)
            hb += jnp.dot(row, w1_ref[yy], preferred_element_type=f32)
        hb = jnp.maximum(hb + fb1_ref[...], 0.0)
        ob = jnp.dot(hb, w2_ref[...], preferred_element_type=f32) + fb2_ref[...]
        o_ref[b:b + 1, :] = ob.astype(o_ref.dtype)            # lane-dense store


# ---------------------------------------------------------------------------
# Param preparation (done once, outside the forward): lower the PyTorch
# weights into the kernel's GEMM operands.
# ---------------------------------------------------------------------------
def _lowered_conv_rhs(w_oihw, width):
    """Lower a 3x3 stride-1 pad-1 conv weight (OIHW) into 3 banded GEMM mats.

    r[ky, x_in*Cin + ci, x_out*Cout + co] = w[co, ci, ky, x_in - x_out + 1]
    (zero outside the band), so  out[(b,y),(x,co)] = sum_ky LHS_ky @ r[ky]
    with LHS_ky[(b,y),(x_in,ci)] = input[b, y+ky-1, x_in, ci].
    """
    co_n, ci_n, kh, kw = w_oihw.shape
    assert (kh, kw) == (3, 3)
    rows, cols = width * ci_n, width * co_n
    x_in = jnp.arange(rows) // ci_n
    ci = jnp.arange(rows) % ci_n
    x_out = jnp.arange(cols) // co_n
    co = jnp.arange(cols) % co_n
    kx = x_in[:, None] - x_out[None, :] + 1
    valid = (kx >= 0) & (kx <= 2)
    kx_c = jnp.clip(kx, 0, 2)
    mats = []
    for ky in range(3):
        vals = w_oihw[co[None, :], ci[:, None], ky, kx_c]      # (rows, cols)
        mats.append(jnp.where(valid, vals, 0.0))
    return jnp.stack(mats, axis=0).astype(jnp.float32)         # (3, rows, cols)


def _pool_col_selectors(width, ch):
    """0/1 matrices picking even / odd x columns of an (x, ch)-merged lane
    axis; used to run the W half of the 2x2 max-pool on the MXU."""
    src = jnp.arange(width * ch)
    dst = jnp.arange((width // 2) * ch)
    x_s, c_s = src // ch, src % ch
    x_d, c_d = dst // ch, dst % ch
    same_c = c_s[:, None] == c_d[None, :]
    even = ((x_s[:, None] == 2 * x_d[None, :]) & same_c).astype(jnp.float32)
    odd = ((x_s[:, None] == 2 * x_d[None, :] + 1) & same_c).astype(jnp.float32)
    return even, odd


def prepare_params(params):
    """PyTorch-layout params -> fused-kernel operands (run once per model)."""
    cw1, cb1, cw2, cb2, fw1, fb1, fw2, fb2 = params
    r1 = _lowered_conv_rhs(cw1, _W)                     # (3,  96, 256)
    r2 = _lowered_conv_rhs(cw2, _W // 2)                # (3, 128, 256)
    b1t = jnp.tile(cb1, _W).reshape(1, _W * _C1)        # bias over (x, co) lanes
    b2t = jnp.tile(cb2, _W // 2).reshape(1, (_W // 2) * _C2)
    s1e, s1o = _pool_col_selectors(_W, _C1)             # (256, 128) each
    s2e, s2o = _pool_col_selectors(_W // 2, _C2)        # (256, 128) each
    # fc1: fold torch's x.view(-1, 16*8*8) (C,H,W order) into the weights:
    # w1blk[y, x*C2 + c, n] = fw1[n, c*64 + y*8 + x]
    w1blk = (fw1.T.reshape(_C2, 8, 8, _NHID)            # (c, y, x, n)
             .transpose(1, 2, 0, 3)                     # (y, x, c, n)
             .reshape(8, 8 * _C2, _NHID))               # (8, 128, 128)
    fb1r = fb1.reshape(1, _NHID)
    # fc2: pad N from 10 to 128 for a lane-dense store (glue slices [:, :10]).
    w2p = jnp.zeros((_NHID, _NHID), jnp.float32).at[:, :_NOUT].set(fw2.T)
    fb2p = jnp.zeros((1, _NHID), jnp.float32).at[0, :_NOUT].set(fb2)
    return dict(r1=r1, b1t=b1t, s1e=s1e, s1o=s1o,
                r2=r2, b2t=b2t, s2e=s2e, s2o=s2o,
                w1blk=w1blk, fb1=fb1r, w2p=w2p, fb2p=fb2p)


# ---------------------------------------------------------------------------
# Forward pass: one fused pallas_call; only XLA glue is the input layout
# transpose and the final [:, :10] slice.
# ---------------------------------------------------------------------------
@jax.jit
def cnn2_forward(x_nchw, kp):
    B, C, H, W = x_nchw.shape
    assert (C, H, W) == (_CIN, _H, _W)
    xin = jnp.transpose(x_nchw, (0, 2, 3, 1)).reshape(B, H, W * C)  # lanes=(x,c)
    vmem = pl.BlockSpec(memory_space=pltpu.MemorySpace.VMEM)
    out = pl.pallas_call(
        _cnn2_fused_kernel,
        out_shape=jax.ShapeDtypeStruct((B, _NHID), jnp.float32),
        in_specs=[vmem] * 13,
        out_specs=vmem,
        scratch_shapes=[
            pltpu.VMEM((B, H + 2, W * C), jnp.float32),              # conv1 H-pad
            pltpu.VMEM((B, H // 2 + 2, (W // 2) * _C1), jnp.float32),  # conv2 H-pad
        ],
    )(xin, kp["r1"], kp["b1t"], kp["s1e"], kp["s1o"],
      kp["r2"], kp["b2t"], kp["s2e"], kp["s2o"],
      kp["w1blk"], kp["fb1"], kp["w2p"], kp["fb2p"])
    return out[:, :_NOUT]


# ---------------------------------------------------------------------------
# PyTorch-layout parameter init and a plain-XLA reference (the spec).
# ---------------------------------------------------------------------------
def init_params(key):
    ks = jax.random.split(key, 8)
    cw1 = jax.random.normal(ks[0], (_C1, _CIN, 3, 3), jnp.float32) * 0.1
    cb1 = jax.random.normal(ks[1], (_C1,), jnp.float32) * 0.1
    cw2 = jax.random.normal(ks[2], (_C2, _C1, 3, 3), jnp.float32) * 0.1
    cb2 = jax.random.normal(ks[3], (_C2,), jnp.float32) * 0.1
    fw1 = jax.random.normal(ks[4], (_NHID, _C2 * 8 * 8), jnp.float32) * 0.05
    fb1 = jax.random.normal(ks[5], (_NHID,), jnp.float32) * 0.05
    fw2 = jax.random.normal(ks[6], (_NOUT, _NHID), jnp.float32) * 0.05
    fb2 = jax.random.normal(ks[7], (_NOUT,), jnp.float32) * 0.05
    return (cw1, cb1, cw2, cb2, fw1, fb1, fw2, fb2)


def cnn2_reference(x, params):
    """Pure-JAX reference of the PyTorch CNN2.forward (for self-check)."""
    cw1, cb1, cw2, cb2, fw1, fb1, fw2, fb2 = params
    dn = ("NCHW", "OIHW", "NCHW")
    y = jax.lax.conv_general_dilated(x, cw1, (1, 1), ((1, 1), (1, 1)),
                                     dimension_numbers=dn)
    y = jnp.maximum(y + cb1[None, :, None, None], 0.0)
    y = jax.lax.reduce_window(y, -jnp.inf, jax.lax.max,
                              (1, 1, 2, 2), (1, 1, 2, 2), "VALID")
    y = jax.lax.conv_general_dilated(y, cw2, (1, 1), ((1, 1), (1, 1)),
                                     dimension_numbers=dn)
    y = jnp.maximum(y + cb2[None, :, None, None], 0.0)
    y = jax.lax.reduce_window(y, -jnp.inf, jax.lax.max,
                              (1, 1, 2, 2), (1, 1, 2, 2), "VALID")
    y = y.reshape(y.shape[0], -1)                   # torch's x.view(-1, 16*8*8)
    y = jnp.maximum(y @ fw1.T + fb1, 0.0)
    return y @ fw2.T + fb2


if __name__ == "__main__":
    key = jax.random.PRNGKey(0)
    k_x, k_p = jax.random.split(key)
    # fc1 expects 16*8*8 features => 32x32 spatial input (CIFAR-like), NCHW.
    x = jax.random.normal(k_x, (2, _CIN, _H, _W), jnp.float32)
    params = init_params(k_p)
    kparams = prepare_params(params)

    out = cnn2_forward(x, kparams)
    jax.block_until_ready(out)
    assert out.shape == (2, _NOUT) and out.dtype == jnp.float32

    # Self-check vs the plain-XLA reference; tolerance covers MXU
    # default-precision (bf16-pass) rounding differences, not structure.
    ref = cnn2_reference(x, params)
    max_err = jnp.max(jnp.abs(out - ref))
    assert jnp.allclose(out, ref, rtol=5e-2, atol=2e-2), f"max|diff|={max_err}"
    print("KERNEL_OK")
</pallas_src>

<mosaic_0001>
module attributes {stable_mosaic.version = 11 : i64} {
  func.func @_cnn2_fused_kernel(%arg0: memref<2x32x96xf32, #tpu.memory_space<vmem>>, %arg1: memref<3x96x256xf32, #tpu.memory_space<vmem>>, %arg2: memref<1x256xf32, #tpu.memory_space<vmem>>, %arg3: memref<256x128xf32, #tpu.memory_space<vmem>>, %arg4: memref<256x128xf32, #tpu.memory_space<vmem>>, %arg5: memref<3x128x256xf32, #tpu.memory_space<vmem>>, %arg6: memref<1x256xf32, #tpu.memory_space<vmem>>, %arg7: memref<256x128xf32, #tpu.memory_space<vmem>>, %arg8: memref<256x128xf32, #tpu.memory_space<vmem>>, %arg9: memref<8x128x128xf32, #tpu.memory_space<vmem>>, %arg10: memref<1x128xf32, #tpu.memory_space<vmem>>, %arg11: memref<128x128xf32, #tpu.memory_space<vmem>>, %arg12: memref<1x128xf32, #tpu.memory_space<vmem>>, %arg13: memref<2x128xf32, #tpu.memory_space<vmem>>, %arg14: memref<2x34x96xf32, #tpu.memory_space<vmem>>, %arg15: memref<2x18x128xf32, #tpu.memory_space<vmem>>) attributes {dimension_semantics = [], scalar_prefetch = 0 : i64, scratch_operands = 2 : i64, tpu.core_type = #tpu.core_type<tc>} {
    %cst = arith.constant 0.000000e+00 : f32
    %0 = vector.broadcast %cst : f32 to vector<2x34x96xf32>
    %c0 = arith.constant 0 : index
    %c0_0 = arith.constant 0 : index
    %c0_1 = arith.constant 0 : index
    %1 = vector.load %arg14[%c0, %c0_0, %c0_1] : memref<2x34x96xf32, #tpu.memory_space<vmem>>, vector<2x34x96xf32>
    tpu.vector_store %arg14[%c0, %c0_0, %c0_1], %0 {strides = array<i32>} : memref<2x34x96xf32, #tpu.memory_space<vmem>>, vector<2x34x96xf32>,
    %c0_2 = arith.constant 0 : index
    %c0_3 = arith.constant 0 : index
    %c0_4 = arith.constant 0 : index
    %2 = vector.load %arg0[%c0_2, %c0_3, %c0_4] : memref<2x32x96xf32, #tpu.memory_space<vmem>>, vector<2x32x96xf32>
    %c0_5 = arith.constant 0 : index
    %c1 = arith.constant 1 : index
    %c0_6 = arith.constant 0 : index
    %3 = vector.load %arg14[%c0_5, %c1, %c0_6] : memref<2x34x96xf32, #tpu.memory_space<vmem>>, vector<2x32x96xf32>
    tpu.vector_store %arg14[%c0_5, %c1, %c0_6], %2 {strides = array<i32>} : memref<2x34x96xf32, #tpu.memory_space<vmem>>, vector<2x32x96xf32>,
    %cst_7 = arith.constant 0.000000e+00 : f32
    %4 = vector.broadcast %cst_7 : f32 to vector<64x256xf32>
    %c0_8 = arith.constant 0 : index
    %c0_9 = arith.constant 0 : index
    %c0_10 = arith.constant 0 : index
    %5 = vector.load %arg14[%c0_8, %c0_9, %c0_10] : memref<2x34x96xf32, #tpu.memory_space<vmem>>, vector<2x32x96xf32>
    %6 = vector.shape_cast %5 : vector<2x32x96xf32> to vector<64x96xf32>
    %c0_11 = arith.constant 0 : index
    %c0_12 = arith.constant 0 : index
    %c0_13 = arith.constant 0 : index
    %7 = vector.load %arg1[%c0_11, %c0_12, %c0_13] : memref<3x96x256xf32, #tpu.memory_space<vmem>>, vector<1x96x256xf32>
    %8 = vector.shape_cast %7 : vector<1x96x256xf32> to vector<96x256xf32>
    %cst_14 = arith.constant dense<0.000000e+00> : vector<64x256xf32>
    %9 = tpu.matmul %6, %8, %cst_14 {dimension_numbers = #tpu.dot_dimension_numbers<[1], [0], [0], [1], [0, 0, 1, 1], [], []>} : vector<64x96xf32>, vector<96x256xf32>, vector<64x256xf32> -> vector<64x256xf32>
    %10 = arith.addf %4, %9 : vector<64x256xf32>
    %c0_15 = arith.constant 0 : index
    %c1_16 = arith.constant 1 : index
    %c0_17 = arith.constant 0 : index
    %11 = vector.load %arg14[%c0_15, %c1_16, %c0_17] : memref<2x34x96xf32, #tpu.memory_space<vmem>>, vector<2x32x96xf32>
    %12 = vector.shape_cast %11 : vector<2x32x96xf32> to vector<64x96xf32>
    %c1_18 = arith.constant 1 : index
    %c0_19 = arith.constant 0 : index
    %c0_20 = arith.constant 0 : index
    %13 = vector.load %arg1[%c1_18, %c0_19, %c0_20] : memref<3x96x256xf32, #tpu.memory_space<vmem>>, vector<1x96x256xf32>
    %14 = vector.shape_cast %13 : vector<1x96x256xf32> to vector<96x256xf32>
    %cst_21 = arith.constant dense<0.000000e+00> : vector<64x256xf32>
    %15 = tpu.matmul %12, %14, %cst_21 {dimension_numbers = #tpu.dot_dimension_numbers<[1], [0], [0], [1], [0, 0, 1, 1], [], []>} : vector<64x96xf32>, vector<96x256xf32>, vector<64x256xf32> -> vector<64x256xf32>
    %16 = arith.addf %10, %15 : vector<64x256xf32>
    %c0_22 = arith.constant 0 : index
    %c2 = arith.constant 2 : index
    %c0_23 = arith.constant 0 : index
    %17 = vector.load %arg14[%c0_22, %c2, %c0_23] : memref<2x34x96xf32, #tpu.memory_space<vmem>>, vector<2x32x96xf32>
    %18 = vector.shape_cast %17 : vector<2x32x96xf32> to vector<64x96xf32>
    %c2_24 = arith.constant 2 : index
    %c0_25 = arith.constant 0 : index
    %c0_26 = arith.constant 0 : index
    %19 = vector.load %arg1[%c2_24, %c0_25, %c0_26] : memref<3x96x256xf32, #tpu.memory_space<vmem>>, vector<1x96x256xf32>
    %20 = vector.shape_cast %19 : vector<1x96x256xf32> to vector<96x256xf32>
    %cst_27 = arith.constant dense<0.000000e+00> : vector<64x256xf32>
    %21 = tpu.matmul %18, %20, %cst_27 {dimension_numbers = #tpu.dot_dimension_numbers<[1], [0], [0], [1], [0, 0, 1, 1], [], []>} : vector<64x96xf32>, vector<96x256xf32>, vector<64x256xf32> -> vector<64x256xf32>
    %22 = arith.addf %16, %21 : vector<64x256xf32>
    %c0_28 = arith.constant 0 : index
    %c0_29 = arith.constant 0 : index
    %23 = vector.load %arg2[%c0_28, %c0_29] : memref<1x256xf32, #tpu.memory_space<vmem>>, vector<1x256xf32>
    %24 = vector.broadcast %23 : vector<1x256xf32> to vector<64x256xf32>
    %25 = arith.addf %22, %24 : vector<64x256xf32>
    %cst_30 = arith.constant 0.000000e+00 : f32
    %26 = vector.broadcast %cst_30 : f32 to vector<64x256xf32>
    %27 = arith.maximumf %25, %26 : vector<64x256xf32>
    %c0_31 = arith.constant 0 : index
    %c0_32 = arith.constant 0 : index
    %28 = vector.load %arg3[%c0_31, %c0_32] : memref<256x128xf32, #tpu.memory_space<vmem>>, vector<256x128xf32>
    %cst_33 = arith.constant dense<0.000000e+00> : vector<64x128xf32>
    %29 = tpu.matmul %27, %28, %cst_33 {dimension_numbers = #tpu.dot_dimension_numbers<[1], [0], [0], [1], [0, 0, 1, 1], [], []>} : vector<64x256xf32>, vector<256x128xf32>, vector<64x128xf32> -> vector<64x128xf32>
    %c0_34 = arith.constant 0 : index
    %c0_35 = arith.constant 0 : index
    %30 = vector.load %arg4[%c0_34, %c0_35] : memref<256x128xf32, #tpu.memory_space<vmem>>, vector<256x128xf32>
    %cst_36 = arith.constant dense<0.000000e+00> : vector<64x128xf32>
    %31 = tpu.matmul %27, %30, %cst_36 {dimension_numbers = #tpu.dot_dimension_numbers<[1], [0], [0], [1], [0, 0, 1, 1], [], []>} : vector<64x256xf32>, vector<256x128xf32>, vector<64x128xf32> -> vector<64x128xf32>
    %32 = arith.maximumf %29, %31 : vector<64x128xf32>
    %33 = vector.shape_cast %32 : vector<64x128xf32> to vector<32x2x128xf32>
    %cst_37 = arith.constant dense<0xFF800000> : vector<32x128xf32>
    %34 = vector.multi_reduction <maximumf>, %33, %cst_37 [1] : vector<32x2x128xf32> to vector<32x128xf32>
    %cst_38 = arith.constant 0.000000e+00 : f32
    %35 = vector.broadcast %cst_38 : f32 to vector<2x18x128xf32>
    %c0_39 = arith.constant 0 : index
    %c0_40 = arith.constant 0 : index
    %c0_41 = arith.constant 0 : index
    %36 = vector.load %arg15[%c0_39, %c0_40, %c0_41] : memref<2x18x128xf32, #tpu.memory_space<vmem>>, vector<2x18x128xf32>
    tpu.vector_store %arg15[%c0_39, %c0_40, %c0_41], %35 {strides = array<i32>} : memref<2x18x128xf32, #tpu.memory_space<vmem>>, vector<2x18x128xf32>,
    %37 = vector.shape_cast %34 : vector<32x128xf32> to vector<2x16x128xf32>
    %c0_42 = arith.constant 0 : index
    %c1_43 = arith.constant 1 : index
    %c0_44 = arith.constant 0 : index
    %38 = vector.load %arg15[%c0_42, %c1_43, %c0_44] : memref<2x18x128xf32, #tpu.memory_space<vmem>>, vector<2x16x128xf32>
    tpu.vector_store %arg15[%c0_42, %c1_43, %c0_44], %37 {strides = array<i32>} : memref<2x18x128xf32, #tpu.memory_space<vmem>>, vector<2x16x128xf32>,
    %cst_45 = arith.constant 0.000000e+00 : f32
    %39 = vector.broadcast %cst_45 : f32 to vector<32x256xf32>
    %c0_46 = arith.constant 0 : index
    %c0_47 = arith.constant 0 : index
    %c0_48 = arith.constant 0 : index
    %40 = vector.load %arg15[%c0_46, %c0_47, %c0_48] : memref<2x18x128xf32, #tpu.memory_space<vmem>>, vector<2x16x128xf32>
    %41 = vector.shape_cast %40 : vector<2x16x128xf32> to vector<32x128xf32>
    %c0_49 = arith.constant 0 : index
    %c0_50 = arith.constant 0 : index
    %c0_51 = arith.constant 0 : index
    %42 = vector.load %arg5[%c0_49, %c0_50, %c0_51] : memref<3x128x256xf32, #tpu.memory_space<vmem>>, vector<1x128x256xf32>
    %43 = vector.shape_cast %42 : vector<1x128x256xf32> to vector<128x256xf32>
    %cst_52 = arith.constant dense<0.000000e+00> : vector<32x256xf32>
    %44 = tpu.matmul %41, %43, %cst_52 {dimension_numbers = #tpu.dot_dimension_numbers<[1], [0], [0], [1], [0, 0, 1, 1], [], []>} : vector<32x128xf32>, vector<128x256xf32>, vector<32x256xf32> -> vector<32x256xf32>
    %45 = arith.addf %39, %44 : vector<32x256xf32>
    %c0_53 = arith.constant 0 : index
    %c1_54 = arith.constant 1 : index
    %c0_55 = arith.constant 0 : index
    %46 = vector.load %arg15[%c0_53, %c1_54, %c0_55] : memref<2x18x128xf32, #tpu.memory_space<vmem>>, vector<2x16x128xf32>
    %47 = vector.shape_cast %46 : vector<2x16x128xf32> to vector<32x128xf32>
    %c1_56 = arith.constant 1 : index
    %c0_57 = arith.constant 0 : index
    %c0_58 = arith.constant 0 : index
    %48 = vector.load %arg5[%c1_56, %c0_57, %c0_58] : memref<3x128x256xf32, #tpu.memory_space<vmem>>, vector<1x128x256xf32>
    %49 = vector.shape_cast %48 : vector<1x128x256xf32> to vector<128x256xf32>
    %cst_59 = arith.constant dense<0.000000e+00> : vector<32x256xf32>
    %50 = tpu.matmul %47, %49, %cst_59 {dimension_numbers = #tpu.dot_dimension_numbers<[1], [0], [0], [1], [0, 0, 1, 1], [], []>} : vector<32x128xf32>, vector<128x256xf32>, vector<32x256xf32> -> vector<32x256xf32>
    %51 = arith.addf %45, %50 : vector<32x256xf32>
    %c0_60 = arith.constant 0 : index
    %c2_61 = arith.constant 2 : index
    %c0_62 = arith.constant 0 : index
    %52 = vector.load %arg15[%c0_60, %c2_61, %c0_62] : memref<2x18x128xf32, #tpu.memory_space<vmem>>, vector<2x16x128xf32>
    %53 = vector.shape_cast %52 : vector<2x16x128xf32> to vector<32x128xf32>
    %c2_63 = arith.constant 2 : index
    %c0_64 = arith.constant 0 : index
    %c0_65 = arith.constant 0 : index
    %54 = vector.load %arg5[%c2_63, %c0_64, %c0_65] : memref<3x128x256xf32, #tpu.memory_space<vmem>>, vector<1x128x256xf32>
    %55 = vector.shape_cast %54 : vector<1x128x256xf32> to vector<128x256xf32>
    %cst_66 = arith.constant dense<0.000000e+00> : vector<32x256xf32>
    %56 = tpu.matmul %53, %55, %cst_66 {dimension_numbers = #tpu.dot_dimension_numbers<[1], [0], [0], [1], [0, 0, 1, 1], [], []>} : vector<32x128xf32>, vector<128x256xf32>, vector<32x256xf32> -> vector<32x256xf32>
    %57 = arith.addf %51, %56 : vector<32x256xf32>
    %c0_67 = arith.constant 0 : index
    %c0_68 = arith.constant 0 : index
    %58 = vector.load %arg6[%c0_67, %c0_68] : memref<1x256xf32, #tpu.memory_space<vmem>>, vector<1x256xf32>
    %59 = vector.broadcast %58 : vector<1x256xf32> to vector<32x256xf32>
    %60 = arith.addf %57, %59 : vector<32x256xf32>
    %cst_69 = arith.constant 0.000000e+00 : f32
    %61 = vector.broadcast %cst_69 : f32 to vector<32x256xf32>
    %62 = arith.maximumf %60, %61 : vector<32x256xf32>
    %c0_70 = arith.constant 0 : index
    %c0_71 = arith.constant 0 : index
    %63 = vector.load %arg7[%c0_70, %c0_71] : memref<256x128xf32, #tpu.memory_space<vmem>>, vector<256x128xf32>
    %cst_72 = arith.constant dense<0.000000e+00> : vector<32x128xf32>
    %64 = tpu.matmul %62, %63, %cst_72 {dimension_numbers = #tpu.dot_dimension_numbers<[1], [0], [0], [1], [0, 0, 1, 1], [], []>} : vector<32x256xf32>, vector<256x128xf32>, vector<32x128xf32> -> vector<32x128xf32>
    %c0_73 = arith.constant 0 : index
    %c0_74 = arith.constant 0 : index
    %65 = vector.load %arg8[%c0_73, %c0_74] : memref<256x128xf32, #tpu.memory_space<vmem>>, vector<256x128xf32>
    %cst_75 = arith.constant dense<0.000000e+00> : vector<32x128xf32>
    %66 = tpu.matmul %62, %65, %cst_75 {dimension_numbers = #tpu.dot_dimension_numbers<[1], [0], [0], [1], [0, 0, 1, 1], [], []>} : vector<32x256xf32>, vector<256x128xf32>, vector<32x128xf32> -> vector<32x128xf32>
    %67 = arith.maximumf %64, %66 : vector<32x128xf32>
    %68 = vector.shape_cast %67 : vector<32x128xf32> to vector<16x2x128xf32>
    %cst_76 = arith.constant dense<0xFF800000> : vector<16x128xf32>
    %69 = vector.multi_reduction <maximumf>, %68, %cst_76 [1] : vector<16x2x128xf32> to vector<16x128xf32>
    %cst_77 = arith.constant 0.000000e+00 : f32
    %70 = vector.broadcast %cst_77 : f32 to vector<1x128xf32>
    %71 = vector.extract_strided_slice %69 {offsets = [0, 0], sizes = [1, 128], strides = [1, 1]} : vector<16x128xf32> to vector<1x128xf32>
    %c0_78 = arith.constant 0 : index
    %c0_79 = arith.constant 0 : index
    %c0_80 = arith.constant 0 : index
    %72 = vector.load %arg9[%c0_78, %c0_79, %c0_80] : memref<8x128x128xf32, #tpu.memory_space<vmem>>, vector<1x128x128xf32>
    %73 = vector.shape_cast %72 : vector<1x128x128xf32> to vector<128x128xf32>
    %cst_81 = arith.constant dense<0.000000e+00> : vector<1x128xf32>
    %74 = tpu.matmul %71, %73, %cst_81 {dimension_numbers = #tpu.dot_dimension_numbers<[1], [0], [0], [1], [0, 0, 1, 1], [], []>} : vector<1x128xf32>, vector<128x128xf32>, vector<1x128xf32> -> vector<1x128xf32>
    %75 = arith.addf %70, %74 : vector<1x128xf32>
    %76 = vector.extract_strided_slice %69 {offsets = [1, 0], sizes = [1, 128], strides = [1, 1]} : vector<16x128xf32> to vector<1x128xf32>
    %c1_82 = arith.constant 1 : index
    %c0_83 = arith.constant 0 : index
    %c0_84 = arith.constant 0 : index
    %77 = vector.load %arg9[%c1_82, %c0_83, %c0_84] : memref<8x128x128xf32, #tpu.memory_space<vmem>>, vector<1x128x128xf32>
    %78 = vector.shape_cast %77 : vector<1x128x128xf32> to vector<128x128xf32>
    %cst_85 = arith.constant dense<0.000000e+00> : vector<1x128xf32>
    %79 = tpu.matmul %76, %78, %cst_85 {dimension_numbers = #tpu.dot_dimension_numbers<[1], [0], [0], [1], [0, 0, 1, 1], [], []>} : vector<1x128xf32>, vector<128x128xf32>, vector<1x128xf32> -> vector<1x128xf32>
    %80 = arith.addf %75, %79 : vector<1x128xf32>
    %81 = vector.extract_strided_slice %69 {offsets = [2, 0], sizes = [1, 128], strides = [1, 1]} : vector<16x128xf32> to vector<1x128xf32>
    %c2_86 = arith.constant 2 : index
    %c0_87 = arith.constant 0 : index
    %c0_88 = arith.constant 0 : index
    %82 = vector.load %arg9[%c2_86, %c0_87, %c0_88] : memref<8x128x128xf32, #tpu.memory_space<vmem>>, vector<1x128x128xf32>
    %83 = vector.shape_cast %82 : vector<1x128x128xf32> to vector<128x128xf32>
    %cst_89 = arith.constant dense<0.000000e+00> : vector<1x128xf32>
    %84 = tpu.matmul %81, %83, %cst_89 {dimension_numbers = #tpu.dot_dimension_numbers<[1], [0], [0], [1], [0, 0, 1, 1], [], []>} : vector<1x128xf32>, vector<128x128xf32>, vector<1x128xf32> -> vector<1x128xf32>
    %85 = arith.addf %80, %84 : vector<1x128xf32>
    %86 = vector.extract_strided_slice %69 {offsets = [3, 0], sizes = [1, 128], strides = [1, 1]} : vector<16x128xf32> to vector<1x128xf32>
    %c3 = arith.constant 3 : index
    %c0_90 = arith.constant 0 : index
    %c0_91 = arith.constant 0 : index
    %87 = vector.load %arg9[%c3, %c0_90, %c0_91] : memref<8x128x128xf32, #tpu.memory_space<vmem>>, vector<1x128x128xf32>
    %88 = vector.shape_cast %87 : vector<1x128x128xf32> to vector<128x128xf32>
    %cst_92 = arith.constant dense<0.000000e+00> : vector<1x128xf32>
    %89 = tpu.matmul %86, %88, %cst_92 {dimension_numbers = #tpu.dot_dimension_numbers<[1], [0], [0], [1], [0, 0, 1, 1], [], []>} : vector<1x128xf32>, vector<128x128xf32>, vector<1x128xf32> -> vector<1x128xf32>
    %90 = arith.addf %85, %89 : vector<1x128xf32>
    %91 = vector.extract_strided_slice %69 {offsets = [4, 0], sizes = [1, 128], strides = [1, 1]} : vector<16x128xf32> to vector<1x128xf32>
    %c4 = arith.constant 4 : index
    %c0_93 = arith.constant 0 : index
    %c0_94 = arith.constant 0 : index
    %92 = vector.load %arg9[%c4, %c0_93, %c0_94] : memref<8x128x128xf32, #tpu.memory_space<vmem>>, vector<1x128x128xf32>
    %93 = vector.shape_cast %92 : vector<1x128x128xf32> to vector<128x128xf32>
    %cst_95 = arith.constant dense<0.000000e+00> : vector<1x128xf32>
    %94 = tpu.matmul %91, %93, %cst_95 {dimension_numbers = #tpu.dot_dimension_numbers<[1], [0], [0], [1], [0, 0, 1, 1], [], []>} : vector<1x128xf32>, vector<128x128xf32>, vector<1x128xf32> -> vector<1x128xf32>
    %95 = arith.addf %90, %94 : vector<1x128xf32>
    %96 = vector.extract_strided_slice %69 {offsets = [5, 0], sizes = [1, 128], strides = [1, 1]} : vector<16x128xf32> to vector<1x128xf32>
    %c5 = arith.constant 5 : index
    %c0_96 = arith.constant 0 : index
    %c0_97 = arith.constant 0 : index
    %97 = vector.load %arg9[%c5, %c0_96, %c0_97] : memref<8x128x128xf32, #tpu.memory_space<vmem>>, vector<1x128x128xf32>
    %98 = vector.shape_cast %97 : vector<1x128x128xf32> to vector<128x128xf32>
    %cst_98 = arith.constant dense<0.000000e+00> : vector<1x128xf32>
    %99 = tpu.matmul %96, %98, %cst_98 {dimension_numbers = #tpu.dot_dimension_numbers<[1], [0], [0], [1], [0, 0, 1, 1], [], []>} : vector<1x128xf32>, vector<128x128xf32>, vector<1x128xf32> -> vector<1x128xf32>
    %100 = arith.addf %95, %99 : vector<1x128xf32>
    %101 = vector.extract_strided_slice %69 {offsets = [6, 0], sizes = [1, 128], strides = [1, 1]} : vector<16x128xf32> to vector<1x128xf32>
    %c6 = arith.constant 6 : index
    %c0_99 = arith.constant 0 : index
    %c0_100 = arith.constant 0 : index
    %102 = vector.load %arg9[%c6, %c0_99, %c0_100] : memref<8x128x128xf32, #tpu.memory_space<vmem>>, vector<1x128x128xf32>
    %103 = vector.shape_cast %102 : vector<1x128x128xf32> to vector<128x128xf32>
    %cst_101 = arith.constant dense<0.000000e+00> : vector<1x128xf32>
    %104 = tpu.matmul %101, %103, %cst_101 {dimension_numbers = #tpu.dot_dimension_numbers<[1], [0], [0], [1], [0, 0, 1, 1], [], []>} : vector<1x128xf32>, vector<128x128xf32>, vector<1x128xf32> -> vector<1x128xf32>
    %105 = arith.addf %100, %104 : vector<1x128xf32>
    %106 = vector.extract_strided_slice %69 {offsets = [7, 0], sizes = [1, 128], strides = [1, 1]} : vector<16x128xf32> to vector<1x128xf32>
    %c7 = arith.constant 7 : index
    %c0_102 = arith.constant 0 : index
    %c0_103 = arith.constant 0 : index
    %107 = vector.load %arg9[%c7, %c0_102, %c0_103] : memref<8x128x128xf32, #tpu.memory_space<vmem>>, vector<1x128x128xf32>
    %108 = vector.shape_cast %107 : vector<1x128x128xf32> to vector<128x128xf32>
    %cst_104 = arith.constant dense<0.000000e+00> : vector<1x128xf32>
    %109 = tpu.matmul %106, %108, %cst_104 {dimension_numbers = #tpu.dot_dimension_numbers<[1], [0], [0], [1], [0, 0, 1, 1], [], []>} : vector<1x128xf32>, vector<128x128xf32>, vector<1x128xf32> -> vector<1x128xf32>
    %110 = arith.addf %105, %109 : vector<1x128xf32>
    %c0_105 = arith.constant 0 : index
    %c0_106 = arith.constant 0 : index
    %111 = vector.load %arg10[%c0_105, %c0_106] : memref<1x128xf32, #tpu.memory_space<vmem>>, vector<1x128xf32>
    %112 = arith.addf %110, %111 : vector<1x128xf32>
    %cst_107 = arith.constant 0.000000e+00 : f32
    %113 = vector.broadcast %cst_107 : f32 to vector<1x128xf32>
    %114 = arith.maximumf %112, %113 : vector<1x128xf32>
    %c0_108 = arith.constant 0 : index
    %c0_109 = arith.constant 0 : index
    %115 = vector.load %arg11[%c0_108, %c0_109] : memref<128x128xf32, #tpu.memory_space<vmem>>, vector<128x128xf32>
    %cst_110 = arith.constant dense<0.000000e+00> : vector<1x128xf32>
    %116 = tpu.matmul %114, %115, %cst_110 {dimension_numbers = #tpu.dot_dimension_numbers<[1], [0], [0], [1], [0, 0, 1, 1], [], []>} : vector<1x128xf32>, vector<128x128xf32>, vector<1x128xf32> -> vector<1x128xf32>
    %c0_111 = arith.constant 0 : index
    %c0_112 = arith.constant 0 : index
    %117 = vector.load %arg12[%c0_111, %c0_112] : memref<1x128xf32, #tpu.memory_space<vmem>>, vector<1x128xf32>
    %118 = arith.addf %116, %117 : vector<1x128xf32>
    %c0_113 = arith.constant 0 : index
    %c0_114 = arith.constant 0 : index
    %119 = vector.load %arg13[%c0_113, %c0_114] : memref<2x128xf32, #tpu.memory_space<vmem>>, vector<1x128xf32>
    tpu.vector_store %arg13[%c0_113, %c0_114], %118 {strides = array<i32>} : memref<2x128xf32, #tpu.memory_space<vmem>>, vector<1x128xf32>,
    %cst_115 = arith.constant 0.000000e+00 : f32
    %120 = vector.broadcast %cst_115 : f32 to vector<1x128xf32>
    %121 = vector.extract_strided_slice %69 {offsets = [8, 0], sizes = [1, 128], strides = [1, 1]} : vector<16x128xf32> to vector<1x128xf32>
    %c0_116 = arith.constant 0 : index
    %c0_117 = arith.constant 0 : index
    %c0_118 = arith.constant 0 : index
    %122 = vector.load %arg9[%c0_116, %c0_117, %c0_118] : memref<8x128x128xf32, #tpu.memory_space<vmem>>, vector<1x128x128xf32>
    %123 = vector.shape_cast %122 : vector<1x128x128xf32> to vector<128x128xf32>
    %cst_119 = arith.constant dense<0.000000e+00> : vector<1x128xf32>
    %124 = tpu.matmul %121, %123, %cst_119 {dimension_numbers = #tpu.dot_dimension_numbers<[1], [0], [0], [1], [0, 0, 1, 1], [], []>} : vector<1x128xf32>, vector<128x128xf32>, vector<1x128xf32> -> vector<1x128xf32>
    %125 = arith.addf %120, %124 : vector<1x128xf32>
    %126 = vector.extract_strided_slice %69 {offsets = [9, 0], sizes = [1, 128], strides = [1, 1]} : vector<16x128xf32> to vector<1x128xf32>
    %c1_120 = arith.constant 1 : index
    %c0_121 = arith.constant 0 : index
    %c0_122 = arith.constant 0 : index
    %127 = vector.load %arg9[%c1_120, %c0_121, %c0_122] : memref<8x128x128xf32, #tpu.memory_space<vmem>>, vector<1x128x128xf32>
    %128 = vector.shape_cast %127 : vector<1x128x128xf32> to vector<128x128xf32>
    %cst_123 = arith.constant dense<0.000000e+00> : vector<1x128xf32>
    %129 = tpu.matmul %126, %128, %cst_123 {dimension_numbers = #tpu.dot_dimension_numbers<[1], [0], [0], [1], [0, 0, 1, 1], [], []>} : vector<1x128xf32>, vector<128x128xf32>, vector<1x128xf32> -> vector<1x128xf32>
    %130 = arith.addf %125, %129 : vector<1x128xf32>
    %131 = vector.extract_strided_slice %69 {offsets = [10, 0], sizes = [1, 128], strides = [1, 1]} : vector<16x128xf32> to vector<1x128xf32>
    %c2_124 = arith.constant 2 : index
    %c0_125 = arith.constant 0 : index
    %c0_126 = arith.constant 0 : index
    %132 = vector.load %arg9[%c2_124, %c0_125, %c0_126] : memref<8x128x128xf32, #tpu.memory_space<vmem>>, vector<1x128x128xf32>
    %133 = vector.shape_cast %132 : vector<1x128x128xf32> to vector<128x128xf32>
    %cst_127 = arith.constant dense<0.000000e+00> : vector<1x128xf32>
    %134 = tpu.matmul %131, %133, %cst_127 {dimension_numbers = #tpu.dot_dimension_numbers<[1], [0], [0], [1], [0, 0, 1, 1], [], []>} : vector<1x128xf32>, vector<128x128xf32>, vector<1x128xf32> -> vector<1x128xf32>
    %135 = arith.addf %130, %134 : vector<1x128xf32>
    %136 = vector.extract_strided_slice %69 {offsets = [11, 0], sizes = [1, 128], strides = [1, 1]} : vector<16x128xf32> to vector<1x128xf32>
    %c3_128 = arith.constant 3 : index
    %c0_129 = arith.constant 0 : index
    %c0_130 = arith.constant 0 : index
    %137 = vector.load %arg9[%c3_128, %c0_129, %c0_130] : memref<8x128x128xf32, #tpu.memory_space<vmem>>, vector<1x128x128xf32>
    %138 = vector.shape_cast %137 : vector<1x128x128xf32> to vector<128x128xf32>
    %cst_131 = arith.constant dense<0.000000e+00> : vector<1x128xf32>
    %139 = tpu.matmul %136, %138, %cst_131 {dimension_numbers = #tpu.dot_dimension_numbers<[1], [0], [0], [1], [0, 0, 1, 1], [], []>} : vector<1x128xf32>, vector<128x128xf32>, vector<1x128xf32> -> vector<1x128xf32>
    %140 = arith.addf %135, %139 : vector<1x128xf32>
    %141 = vector.extract_strided_slice %69 {offsets = [12, 0], sizes = [1, 128], strides = [1, 1]} : vector<16x128xf32> to vector<1x128xf32>
    %c4_132 = arith.constant 4 : index
    %c0_133 = arith.constant 0 : index
    %c0_134 = arith.constant 0 : index
    %142 = vector.load %arg9[%c4_132, %c0_133, %c0_134] : memref<8x128x128xf32, #tpu.memory_space<vmem>>, vector<1x128x128xf32>
    %143 = vector.shape_cast %142 : vector<1x128x128xf32> to vector<128x128xf32>
    %cst_135 = arith.constant dense<0.000000e+00> : vector<1x128xf32>
    %144 = tpu.matmul %141, %143, %cst_135 {dimension_numbers = #tpu.dot_dimension_numbers<[1], [0], [0], [1], [0, 0, 1, 1], [], []>} : vector<1x128xf32>, vector<128x128xf32>, vector<1x128xf32> -> vector<1x128xf32>
    %145 = arith.addf %140, %144 : vector<1x128xf32>
    %146 = vector.extract_strided_slice %69 {offsets = [13, 0], sizes = [1, 128], strides = [1, 1]} : vector<16x128xf32> to vector<1x128xf32>
    %c5_136 = arith.constant 5 : index
    %c0_137 = arith.constant 0 : index
    %c0_138 = arith.constant 0 : index
    %147 = vector.load %arg9[%c5_136, %c0_137, %c0_138] : memref<8x128x128xf32, #tpu.memory_space<vmem>>, vector<1x128x128xf32>
    %148 = vector.shape_cast %147 : vector<1x128x128xf32> to vector<128x128xf32>
    %cst_139 = arith.constant dense<0.000000e+00> : vector<1x128xf32>
    %149 = tpu.matmul %146, %148, %cst_139 {dimension_numbers = #tpu.dot_dimension_numbers<[1], [0], [0], [1], [0, 0, 1, 1], [], []>} : vector<1x128xf32>, vector<128x128xf32>, vector<1x128xf32> -> vector<1x128xf32>
    %150 = arith.addf %145, %149 : vector<1x128xf32>
    %151 = vector.extract_strided_slice %69 {offsets = [14, 0], sizes = [1, 128], strides = [1, 1]} : vector<16x128xf32> to vector<1x128xf32>
    %c6_140 = arith.constant 6 : index
    %c0_141 = arith.constant 0 : index
    %c0_142 = arith.constant 0 : index
    %152 = vector.load %arg9[%c6_140, %c0_141, %c0_142] : memref<8x128x128xf32, #tpu.memory_space<vmem>>, vector<1x128x128xf32>
    %153 = vector.shape_cast %152 : vector<1x128x128xf32> to vector<128x128xf32>
    %cst_143 = arith.constant dense<0.000000e+00> : vector<1x128xf32>
    %154 = tpu.matmul %151, %153, %cst_143 {dimension_numbers = #tpu.dot_dimension_numbers<[1], [0], [0], [1], [0, 0, 1, 1], [], []>} : vector<1x128xf32>, vector<128x128xf32>, vector<1x128xf32> -> vector<1x128xf32>
    %155 = arith.addf %150, %154 : vector<1x128xf32>
    %156 = vector.extract_strided_slice %69 {offsets = [15, 0], sizes = [1, 128], strides = [1, 1]} : vector<16x128xf32> to vector<1x128xf32>
    %c7_144 = arith.constant 7 : index
    %c0_145 = arith.constant 0 : index
    %c0_146 = arith.constant 0 : index
    %157 = vector.load %arg9[%c7_144, %c0_145, %c0_146] : memref<8x128x128xf32, #tpu.memory_space<vmem>>, vector<1x128x128xf32>
    %158 = vector.shape_cast %157 : vector<1x128x128xf32> to vector<128x128xf32>
    %cst_147 = arith.constant dense<0.000000e+00> : vector<1x128xf32>
    %159 = tpu.matmul %156, %158, %cst_147 {dimension_numbers = #tpu.dot_dimension_numbers<[1], [0], [0], [1], [0, 0, 1, 1], [], []>} : vector<1x128xf32>, vector<128x128xf32>, vector<1x128xf32> -> vector<1x128xf32>
    %160 = arith.addf %155, %159 : vector<1x128xf32>
    %c0_148 = arith.constant 0 : index
    %c0_149 = arith.constant 0 : index
    %161 = vector.load %arg10[%c0_148, %c0_149] : memref<1x128xf32, #tpu.memory_space<vmem>>, vector<1x128xf32>
    %162 = arith.addf %160, %161 : vector<1x128xf32>
    %cst_150 = arith.constant 0.000000e+00 : f32
    %163 = vector.broadcast %cst_150 : f32 to vector<1x128xf32>
    %164 = arith.maximumf %162, %163 : vector<1x128xf32>
    %c0_151 = arith.constant 0 : index
    %c0_152 = arith.constant 0 : index
    %165 = vector.load %arg11[%c0_151, %c0_152] : memref<128x128xf32, #tpu.memory_space<vmem>>, vector<128x128xf32>
    %cst_153 = arith.constant dense<0.000000e+00> : vector<1x128xf32>
    %166 = tpu.matmul %164, %165, %cst_153 {dimension_numbers = #tpu.dot_dimension_numbers<[1], [0], [0], [1], [0, 0, 1, 1], [], []>} : vector<1x128xf32>, vector<128x128xf32>, vector<1x128xf32> -> vector<1x128xf32>
    %c0_154 = arith.constant 0 : index
    %c0_155 = arith.constant 0 : index
    %167 = vector.load %arg12[%c0_154, %c0_155] : memref<1x128xf32, #tpu.memory_space<vmem>>, vector<1x128xf32>
    %168 = arith.addf %166, %167 : vector<1x128xf32>
    %c1_156 = arith.constant 1 : index
    %c0_157 = arith.constant 0 : index
    %169 = vector.load %arg13[%c1_156, %c0_157] : memref<2x128xf32, #tpu.memory_space<vmem>>, vector<1x128xf32>
    tpu.vector_store %arg13[%c1_156, %c0_157], %168 {strides = array<i32>} : memref<2x128xf32, #tpu.memory_space<vmem>>, vector<1x128xf32>,
    return
  }
}

</mosaic_0001>

<bundles_post_ra>
// kernel: cnn2_forward.1
= control target key start
LH: loop header
LB: loop body
LE: loop exit
PB: predicated region body
PF: predicated region fallthrough
CT: control target
= control target key end

     0   :  { %18 = vsyncpa [#allocation5], 0  ;;  %s6682_s0 = inlined_call_operand.vmem [shape: f32[2,32,96], index: 0, kind: input, shape index: {}]   ;;  %s6683_s1 = inlined_call_operand.vmem [shape: f32[3,96,256], index: 1, kind: input, shape index: {}]   ;;  %s6684_s2 = inlined_call_operand.vmem [shape: f32[1,256], index: 2, kind: input, shape index: {}]   ;;  %s6685_s3 = inlined_call_operand.hbm [shape: f32[256,128], index: 3, kind: input, shape index: {}]   ;;  %s6686_s4 = inlined_call_operand.hbm [shape: f32[256,128], index: 4, kind: input, shape index: {}]   ;;  %s6687_s5 = inlined_call_operand.hbm [shape: f32[3,128,256], index: 5, kind: input, shape index: {}]   ;;  %s6688_s6 = inlined_call_operand.vmem [shape: f32[1,256], index: 6, kind: input, shape index: {}]   ;;  %s6689_s7 = inlined_call_operand.hbm [shape: f32[256,128], index: 7, kind: input, shape index: {}]   ;;  %s6690_s8 = inlined_call_operand.hbm [shape: f32[256,128], index: 8, kind: input, shape index: {}]   ;;  %s6691_s9 = inlined_call_operand.hbm [shape: f32[8,128,128], index: 9, kind: input, shape index: {}]   ;;  %s6692_s10 = inlined_call_operand.vmem [shape: f32[1,128], index: 10, kind: input, shape index: {}]   ;;  %s6693_s11 = inlined_call_operand.hbm [shape: f32[128,128], index: 11, kind: input, shape index: {}]   ;;  %s6694_s12 = inlined_call_operand.vmem [shape: f32[1,128], index: 12, kind: input, shape index: {}]   ;;  %s6695_s13 = inlined_call_operand.hbm [shape: f32[2,128], index: 13, kind: output, shape index: {}]  }
   0x1   :  { %19 = vsyncpa [#allocation8], 0 }
   0x2   :  { %20 = vsyncpa [#allocation11], 0 }
   0x3   :  { %21 = vsyncpa [#allocation14], 0 }
   0x4   :  { %22 = vsyncpa [#allocation6], 0  ;;  %s5341_s25 = smov [#allocation7]   ;;  %s5342_s27 = smov [#allocation10]  }
   0x5   :  { %s46_s26 = sshll.u32 %s5341_s25, 4  ;;  %s72_s28 = sshll.u32 %s5342_s27, 4  ;;  %s47_s26 = int_to_ptr.vmem [resolvable:$true] %s46_s26  ;;  %s73_s28 = int_to_ptr.vmem [resolvable:$true] %s72_s28 }
   0x6   :  { %s5179_s29 = scalar_lea.vmem %s47_s26, 4096  ;;  %p5184_p1 = scmp.lt.s32.totalorder %s47_s26, %s47_s26 }
   0x7   :  { %p5180_p0 = scmp.ne.s32.totalorder %s47_s26, %s5179_s29  ;;  %p5185_p2 = scmp.lt.s32.totalorder %s5179_s29, %s5179_s29 }
   0x9   :  { %p5186_p3 = por %p5185_p2, %p5184_p1 }
   0xb   :  { %p5187_p4 = pnand %p5186_p3, %p5180_p0 }
   0xd   :  { %5190 = shalt.err (!%p5187_p4)
}
   0xe   :  { %s5343_s30 = smov 128   ;;  %s5344_s14 = smov 8  }
   0xf   :  { %52 = dma.hbm_to_vmem [thread:$0]  %s6686_s4, 4096, %s47_s26, [#allocation8], %s5343_s30, %s5343_s30, %s5344_s14  }
  0x10   :  { %s5199_s17 = scalar_lea.vmem %s73_s28, 4096  ;;  %p5204_p6 = scmp.lt.s32.totalorder %s73_s28, %s73_s28 }
  0x11   :  { %p5200_p5 = scmp.ne.s32.totalorder %s73_s28, %s5199_s17  ;;  %p5205_p7 = scmp.lt.s32.totalorder %s5199_s17, %s5199_s17 }
  0x13   :  { %p5206_p8 = por %p5205_p7, %p5204_p6 }
  0x15   :  { %p5207_p9 = pnand %p5206_p8, %p5200_p5 }
  0x17   :  { %5210 = shalt.err (!%p5207_p9)
}
  0x18   :  { %78 = dma.hbm_to_vmem [thread:$0]  %s6689_s7, 4096, %s73_s28, [#allocation11], %s5343_s30, %s5343_s30, %s5344_s14  }
  0x19   :  { %s5345_s20 = smov [#allocation13]   ;;  %s5346_s22 = smov [#allocation4]  }
  0x1a   :  { %s96_s21 = sshll.u32 %s5345_s20, 4  ;;  %s34_s23 = sshll.u32 %s5346_s22, 4  ;;  %s97_s21 = int_to_ptr.vmem [resolvable:$true] %s96_s21  ;;  %s35_s23 = int_to_ptr.vmem [resolvable:$true] %s34_s23 }
  0x1b   :  { %s5219_s4 = scalar_lea.vmem %s97_s21, 16384  ;;  %p5224_p11 = scmp.lt.s32.totalorder %s97_s21, %s97_s21 }
  0x1c   :  { %p5220_p10 = scmp.ne.s32.totalorder %s97_s21, %s5219_s4  ;;  %p5225_p12 = scmp.lt.s32.totalorder %s5219_s4, %s5219_s4 }
  0x1e   :  { %p5226_p13 = por %p5225_p12, %p5224_p11 }
  0x20   :  { %p5227_p0 = pnand %p5226_p13, %p5220_p10 }
  0x22   :  { %5230 = shalt.err (!%p5227_p0)
}
  0x23   :  { %102 = dma.hbm_to_vmem [thread:$0]  %s6691_s9, 16384, %s97_s21, [#allocation14], %s5343_s30, %s5343_s30, %s5344_s14  }
  0x24   :  { %s5239_s7 = scalar_lea.vmem %s35_s23, 4096  ;;  %p5244_p2 = scmp.lt.s32.totalorder %s35_s23, %s35_s23 }
  0x25   :  { %p5240_p1 = scmp.ne.s32.totalorder %s35_s23, %s5239_s7  ;;  %p5245_p3 = scmp.lt.s32.totalorder %s5239_s7, %s5239_s7 }
  0x27   :  { %p5246_p4 = por %p5245_p3, %p5244_p2 }
  0x29   :  { %p5247_p5 = pnand %p5246_p4, %p5240_p1 }
  0x2b   :  { %5250 = shalt.err (!%p5247_p5)
}
  0x2c   :  { %40 = dma.hbm_to_vmem [thread:$0]  %s6685_s3, 4096, %s35_s23, [#allocation5], %s5343_s30, %s5343_s30, %s5344_s14  }
  0x2d   :  { %s5347_s28 = smov [#allocation9]  }
  0x2e   :  { %s58_s29 = sshll.u32 %s5347_s28, 4  ;;  %s59_s29 = int_to_ptr.vmem [resolvable:$true] %s58_s29 }
  0x2f   :  { %s5259_s15 = scalar_lea.vmem %s59_s29, 12288  ;;  %p5264_p7 = scmp.lt.s32.totalorder %s59_s29, %s59_s29 }
  0x30   :  { %p5260_p6 = scmp.ne.s32.totalorder %s59_s29, %s5259_s15  ;;  %p5265_p8 = scmp.lt.s32.totalorder %s5259_s15, %s5259_s15 }
  0x32   :  { %p5266_p9 = por %p5265_p8, %p5264_p7 }
  0x34   :  { %p5267_p10 = pnand %p5266_p9, %p5260_p6 }
  0x36   :  { %5270 = shalt.err (!%p5267_p10)
}
  0x37   :  { %s5348_s9 = smov 256   ;;  %s5349_s16 = smov 16  }
  0x38   :  { %64 = dma.hbm_to_vmem [thread:$0]  %s6687_s5, 12288, %s59_s29, [#allocation8], %s5348_s9, %s5348_s9, %s5349_s16  }
  0x39   :  { %s5350_s19 = smov [#allocation12]   ;;  %s5351_s3 = smov [#allocation15]  }
  0x3a   :  { %s84_s20 = sshll.u32 %s5350_s19, 4  ;;  %s110_s21 = sshll.u32 %s5351_s3, 4  ;;  %s85_s20 = int_to_ptr.vmem [resolvable:$true] %s84_s20  ;;  %s111_s21 = int_to_ptr.vmem [resolvable:$true] %s110_s21 }
  0x3b   :  { %s5279_s22 = scalar_lea.vmem %s85_s20, 4096  ;;  %p5284_p12 = scmp.lt.s32.totalorder %s85_s20, %s85_s20 }
  0x3c   :  { %p5280_p11 = scmp.ne.s32.totalorder %s85_s20, %s5279_s22  ;;  %p5285_p13 = scmp.lt.s32.totalorder %s5279_s22, %s5279_s22 }
  0x3e   :  { %p5286_p0 = por %p5285_p13, %p5284_p12 }
  0x40   :  { %p5287_p1 = pnand %p5286_p0, %p5280_p11 }
  0x42   :  { %5290 = shalt.err (!%p5287_p1)
}
  0x43   :  { %90 = dma.hbm_to_vmem [thread:$0]  %s6690_s8, 4096, %s85_s20, [#allocation11], %s5343_s30, %s5343_s30, %s5344_s14  }
  0x44   :  { %s5299_s5 = scalar_lea.vmem %s111_s21, 2048  ;;  %p5304_p3 = scmp.lt.s32.totalorder %s111_s21, %s111_s21 }
  0x45   :  { %p5300_p2 = scmp.ne.s32.totalorder %s111_s21, %s5299_s5  ;;  %p5305_p4 = scmp.lt.s32.totalorder %s5299_s5, %s5299_s5 }
  0x47   :  { %p5306_p5 = por %p5305_p4, %p5304_p3 }
  0x49   :  { %p5307_p6 = pnand %p5306_p5, %p5300_p2 }
  0x4b   :  { %5310 = shalt.err (!%p5307_p6)
}
  0x4c   :  { %116 = dma.hbm_to_vmem [thread:$0]  %s6693_s11, 2048, %s111_s21, [#allocation14], %s5343_s30, %s5343_s30, %s5344_s14  }
  0x4d   :  { %5331 = dma.done.wait [#allocation5], 4096  }
  0x4e   :  { %5332 = vsyncadd [#allocation5], 4294963200 }
  0x4f   :  { %5333 = dma.done.wait [#allocation8], 16384  }
  0x50   :  { %5334 = vsyncadd [#allocation8], 4294950912 }
  0x51   :  { %5335 = dma.done.wait [#allocation11], 8192  }
  0x52   :  { %5336 = vsyncadd [#allocation11], 4294959104 }
  0x53   :  { %5337 = dma.done.wait [#allocation14], 18432  }
  0x54   :  { %5338 = vsyncadd [#allocation14], 4294948864  ;;  %vm140_vm0 = vcmask 785408   ;;  %vm145_vm1 = vcmask 779264   ;;  %v5352_v0 = vmov 0.0   ;;  %v3970_v1 = vld [vmem:[%s6683_s1 + $0x178] sm:$0xff] }
  0x55   :  { %321 = vmatprep.mubr.f32.mxu0 %v5352_v0  ;;  %1420 = vst [vmem:[#allocation3] sm:$0xff] %v5352_v0  ;;  %1421 = vst [vmem:[#allocation3 + $0x8] sm:$0xff] %v5352_v0  ;;  %458 = vmatprep.mubr.f32.mxu1 %v5352_v0  ;;  %v199_v2 = vld [vmem:[%s6683_s1 + $0xb8] sm:$0xff]  ;;  %v3969_v3 = vld [vmem:[%s6683_s1 + $0x170] sm:$0xff]  ;;  %vm1195_vm2 = vcmask 1041408   ;;  %vm1458_vm3 = vcmask 1041409  }
  0x56   :  { %1422 = vst [vmem:[#allocation3 + $0x10] sm:$0x3] %v5352_v0  ;;  %1423 = vst [vmem:[#allocation3 + $0x18] sm:$0xff] %v5352_v0  ;;  %265 = vmatprep.subr.mxu0 %v3970_v1  ;;  %402 = vmatprep.subr.mxu1 %v199_v2  ;;  %v198_v4 = vld [vmem:[%s6683_s1 + $0xb0] sm:$0xff]  ;;  %v3968_v5 = vld [vmem:[%s6683_s1 + $0x168] sm:$0xff]  ;;  %vm1460_vm4 = vcmask 1042434  }
  0x57   :  { %1424 = vst [vmem:[#allocation3 + $0x20] sm:$0xff] %v5352_v0  ;;  %1425 = vst [vmem:[#allocation3 + $0x28] sm:$0x3] %v5352_v0  ;;  %v197_v6 = vld [vmem:[%s6683_s1 + $0xa8] sm:$0xff]  ;;  %266 = vmatpush1.msra.mxu0 %v3969_v3  ;;  %403 = vmatpush1.msra.mxu1 %v198_v4  ;;  %v3967_v7 = vld [vmem:[%s6683_s1 + $0x160] sm:$0xff]  ;;  %vm1462_vm5 = vcmask 1043459  }
  0x58   :  { %141 = vst.msk [vmem:[#allocation2] sm:$0xff] %vm140_vm0, %v5352_v0  ;;  %142 = vst.msk [vmem:[#allocation2 + $0x8] sm:$0xff] %vm140_vm0, %v5352_v0  ;;  %v196_v8 = vld [vmem:[%s6683_s1 + $0xa0] sm:$0xff]  ;;  %v3966_v9 = vld [vmem:[%s6683_s1 + $0x158] sm:$0xff]  ;;  %267 = vmatprep.subr.mxu0 %v3968_v5  ;;  %404 = vmatprep.subr.mxu1 %v197_v6  ;;  %vm1464_vm6 = vcmask 1044484   ;;  %vm1466_vm7 = vcmask 1045509  }
  0x59   :  { %143 = vst.msk [vmem:[#allocation2 + $0x10] sm:$0xff] %vm140_vm0, %v5352_v0  ;;  %144 = vst.msk [vmem:[#allocation2 + $0x18] sm:$0xff] %vm140_vm0, %v5352_v0  ;;  %v195_v10 = vld [vmem:[%s6683_s1 + $0x98] sm:$0xff]  ;;  %v3965_v11 = vld [vmem:[%s6683_s1 + $0x150] sm:$0xff]  ;;  %268 = vmatpush1.msra.mxu0 %v3967_v7  ;;  %405 = vmatpush1.msra.mxu1 %v196_v8  ;;  %vm1468_vm8 = vcmask 1046534   ;;  %vm1470_vm9 = vcmask 1047559  }
  0x5a   :  { %147 = vst.msk [vmem:[#allocation2 + $0x28] sm:$0xff] %vm140_vm0, %v5352_v0  ;;  %148 = vst.msk [vmem:[#allocation2 + $0x30] sm:$0xff] %vm140_vm0, %v5352_v0  ;;  %v194_v12 = vld [vmem:[%s6683_s1 + $0x90] sm:$0xff]  ;;  %v3964_v13 = vld [vmem:[%s6683_s1 + $0x148] sm:$0xff]  ;;  %269 = vmatprep.subr.mxu0 %v3966_v9  ;;  %406 = vmatprep.subr.mxu1 %v195_v10  ;;  %vm5354_vm10 = vmmov 0   ;;  %s5355_s25 = smov [#allocation16]  }
  0x5b   :  { %149 = vst.msk [vmem:[#allocation2 + $0x38] sm:$0xff] %vm140_vm0, %v5352_v0  ;;  %150 = vst.msk [vmem:[#allocation2 + $0x40] sm:$0xff] %vm140_vm0, %v5352_v0  ;;  %v193_v14 = vld [vmem:[%s6683_s1 + $0x88] sm:$0xff]  ;;  %v3963_v15 = vld [vmem:[%s6683_s1 + $0x140] sm:$0xff]  ;;  %270 = vmatpush1.msra.mxu0 %v3965_v11  ;;  %407 = vmatpush1.msra.mxu1 %v194_v12  ;;  %s3935_s8 = sshll.u32 %s5355_s25, 4  ;;  %s3936_s8 = int_to_ptr.vmem [resolvable:$true] %s3935_s8 }
  0x5c   :  { %146 = vst.msk [vmem:[#allocation2 + $0x20] sm:$0x3] %vm145_vm1, %v5352_v0  ;;  %151 = vst.msk [vmem:[#allocation2 + $0x48] sm:$0x3] %vm145_vm1, %v5352_v0  ;;  %v192_v16 = vld [vmem:[%s6683_s1 + $0x80] sm:$0xff]  ;;  %v3962_v17 = vld [vmem:[%s6683_s1 + $0x138] sm:$0xff]  ;;  %271 = vmatprep.subr.mxu0 %v3964_v13  ;;  %408 = vmatprep.subr.mxu1 %v193_v14  ;;  %p5316_p8 = scmp.lt.s32.totalorder %s3936_s8, %s3936_s8 }
  0x5d   :  { %v191_v18 = vld [vmem:[%s6683_s1 + $0x78] sm:$0xff]  ;;  %v3961_v19 = vld [vmem:[%s6683_s1 + $0x130] sm:$0xff]  ;;  %272 = vmatpush1.msra.mxu0 %v3963_v15  ;;  %409 = vmatpush1.msra.mxu1 %v192_v16  ;;  %v3960_v21 = vld [vmem:[%s6683_s1 + $0x128] sm:$0xff]  ;;  %s5311_s11 = scalar_lea.vmem %s3936_s8, 32 }
  0x5e   :  { %v190_v20 = vld [vmem:[%s6683_s1 + $0x70] sm:$0xff]  ;;  %v189_v22 = vld [vmem:[%s6683_s1 + $0x68] sm:$0xff]  ;;  %273 = vmatprep.subr.mxu0 %v3962_v17  ;;  %410 = vmatprep.subr.mxu1 %v191_v18  ;;  %v3959_v23 = vld [vmem:[%s6683_s1 + $0x120] sm:$0xff]  ;;  %p5312_p7 = scmp.ne.s32.totalorder %s3936_s8, %s5311_s11  ;;  %p5317_p9 = scmp.lt.s32.totalorder %s5311_s11, %s5311_s11 }
  0x5f   :  { %v188_v24 = vld [vmem:[%s6683_s1 + $0x60] sm:$0xff]  ;;  %274 = vmatpush1.msra.mxu0 %v3961_v19  ;;  %411 = vmatpush1.msra.mxu1 %v190_v20  ;;  %v3958_v25 = vld [vmem:[%s6683_s1 + $0x118] sm:$0xff]  ;;  %v3957_v27 = vld [vmem:[%s6683_s1 + $0x110] sm:$0xff] }
  0x60   :  { %v187_v26 = vld [vmem:[%s6683_s1 + $0x58] sm:$0xff]  ;;  %275 = vmatprep.subr.mxu0 %v3960_v21  ;;  %412 = vmatprep.subr.mxu1 %v189_v22  ;;  %v186_v28 = vld [vmem:[%s6683_s1 + $0x50] sm:$0xff]  ;;  %v3956_v29 = vld [vmem:[%s6683_s1 + $0x108] sm:$0xff]  ;;  %p5318_p10 = por %p5317_p9, %p5316_p8 }
  0x61   :  { %276 = vmatpush1.msra.mxu0 %v3959_v23  ;;  %413 = vmatpush1.msra.mxu1 %v188_v24  ;;  %v185_v30 = vld [vmem:[%s6683_s1 + $0x48] sm:$0xff]  ;;  %v3955_v31 = vld [vmem:[%s6683_s1 + $0x100] sm:$0xff]  ;;  %v3954_v33 = vld [vmem:[%s6683_s1 + $0xf8] sm:$0xff] }
  0x62   :  { %277 = vmatprep.subr.mxu0 %v3958_v25  ;;  %414 = vmatprep.subr.mxu1 %v187_v26  ;;  %v184_v32 = vld [vmem:[%s6683_s1 + $0x40] sm:$0xff]  ;;  %v183_v34 = vld [vmem:[%s6683_s1 + $0x38] sm:$0xff]  ;;  %v3953_v35 = vld [vmem:[%s6683_s1 + $0xf0] sm:$0xff]  ;;  %p5319_p11 = pnand %p5318_p10, %p5312_p7 }
  0x63   :  { %278 = vmatpush1.msra.mxu0 %v3957_v27  ;;  %415 = vmatpush1.msra.mxu1 %v186_v28  ;;  %v182_v36 = vld [vmem:[%s6683_s1 + $0x30] sm:$0xff]  ;;  %v3952_v37 = vld [vmem:[%s6683_s1 + $0xe8] sm:$0xff]  ;;  %v152_v39 = vld [vmem:[%s6682_s0] sm:$0xff] }
  0x64   :  { %279 = vmatprep.subr.mxu0 %v3956_v29  ;;  %416 = vmatprep.subr.mxu1 %v185_v30  ;;  %v181_v38 = vld [vmem:[%s6683_s1 + $0x28] sm:$0xff]  ;;  %v3951_v40 = vld [vmem:[%s6683_s1 + $0xe0] sm:$0xff]  ;;  %160 = vst.msk [vmem:[#allocation2 + $0x1] sm:$0xff] %vm140_vm0, %v152_v39  ;;  %v3950_v43 = vld [vmem:[%s6683_s1 + $0xd8] sm:$0xff] }
  0x65   :  { %280 = vmatpush1.msra.mxu0 %v3955_v31  ;;  %417 = vmatpush1.msra.mxu1 %v184_v32  ;;  %v180_v41 = vld [vmem:[%s6683_s1 + $0x20] sm:$0xff]  ;;  %v153_v42 = vld [vmem:[%s6682_s0 + $0x8] sm:$0xff]  ;;  %v179_v44 = vld [vmem:[%s6683_s1 + $0x18] sm:$0xff] }
  0x66   :  { %281 = vmatprep.subr.mxu0 %v3954_v33  ;;  %418 = vmatprep.subr.mxu1 %v183_v34  ;;  %161 = vst.msk [vmem:[#allocation2 + $0x9] sm:$0xff] %vm140_vm0, %v153_v42  ;;  %v154_v45 = vld [vmem:[%s6682_s0 + $0x10] sm:$0xff]  ;;  %v3948_v48 = vld [vmem:[%s6683_s1 + $0xc8] sm:$0xff]  ;;  %v155_v50 = vld [vmem:[%s6682_s0 + $0x18] sm:$0xff] }
  0x67   :  { %282 = vmatpush1.msra.mxu0 %v3953_v35  ;;  %419 = vmatpush1.msra.mxu1 %v182_v36  ;;  %v3949_v46 = vld [vmem:[%s6683_s1 + $0xd0] sm:$0xff]  ;;  %162 = vst.msk [vmem:[#allocation2 + $0x11] sm:$0xff] %vm140_vm0, %v154_v45  ;;  %v177_v49 = vld [vmem:[%s6683_s1 + $0x8] sm:$0xff]  ;;  %v3947_v51 = vld [vmem:[%s6683_s1 + $0xc0] sm:$0xff] }
  0x68   :  { %283 = vmatprep.subr.mxu0 %v3952_v37  ;;  %420 = vmatprep.subr.mxu1 %v181_v38  ;;  %v178_v47 = vld [vmem:[%s6683_s1 + $0x10] sm:$0xff]  ;;  %v176_v52 = vld [vmem:[%s6683_s1] sm:$0xff]  ;;  %163 = vst.msk [vmem:[#allocation2 + $0x19] sm:$0xff] %vm140_vm0, %v155_v50  ;;  %v157_v54 = vld [vmem:[%s6682_s0 + $0x28] sm:$0xff] }
  0x69   :  { %284 = vmatpush1.msra.mxu0 %v3951_v40  ;;  %421 = vmatpush1.msra.mxu1 %v180_v41  ;;  %v156_v53 = vld [vmem:[%s6682_s0 + $0x20] sm:$0xff]  ;;  %v4010_v55 = vld [vmem:[%s6683_s1 + $0x238] sm:$0xff]  ;;  %v4009_v56 = vld [vmem:[%s6683_s1 + $0x230] sm:$0xff]  ;;  %165 = vst.msk [vmem:[#allocation2 + $0x31] sm:$0xff] %vm140_vm0, %v157_v54 }
  0x6a   :  { %285 = vmatprep.subr.mxu0 %v3950_v43  ;;  %422 = vmatprep.subr.mxu1 %v179_v44  ;;  %164 = vst.msk [vmem:[#allocation2 + $0x29] sm:$0xff] %vm140_vm0, %v156_v53  ;;  %v158_v59 = vld [vmem:[%s6682_s0 + $0x30] sm:$0xff]  ;;  %v4008_v60 = vld [vmem:[%s6683_s1 + $0x228] sm:$0xff]  ;;  %v4007_v63 = vld [vmem:[%s6683_s1 + $0x220] sm:$0xff] }
  0x6b   :  { %286 = vmatpush1.msra.mxu0 %v3949_v46  ;;  %423 = vmatpush1.msra.mxu1 %v178_v47  ;;  %v200_v57 = vld [vmem:[#allocation2 + $0x1] sm:$0xff]  ;;  %166 = vst.msk [vmem:[#allocation2 + $0x39] sm:$0xff] %vm140_vm0, %v158_v59  ;;  %v159_v1 = vld [vmem:[%s6682_s0 + $0x38] sm:$0xff]  ;;  %v4005_v3 = vld [vmem:[%s6683_s1 + $0x210] sm:$0xff] }
  0x6c   :  { %287 = vmatprep.subr.mxu0 %v3948_v48  ;;  %424 = vmatprep.subr.mxu1 %v177_v49  ;;  %v168_v58 = vld [vmem:[#allocation2] sm:$0xff]  ;;  %v4006_v2 = vld [vmem:[%s6683_s1 + $0x218] sm:$0xff]  ;;  %167 = vst.msk [vmem:[#allocation2 + $0x41] sm:$0xff] %vm140_vm0, %v159_v1  ;;  %v4004_v6 = vld [vmem:[%s6683_s1 + $0x208] sm:$0xff] }
  0x6d   :  { %288 = vmatpush1.msra.mxu0 %v3947_v51  ;;  %425 = vmatpush1.msra.mxu1 %v176_v52  ;;  %v201_v61 = vld [vmem:[#allocation2 + $0x9] sm:$0xff]  ;;  %v4003_v7 = vld [vmem:[%s6683_s1 + $0x200] sm:$0xff]  ;;  %v4002_v8 = vld [vmem:[%s6683_s1 + $0x1f8] sm:$0xff] }
  0x6e   :  { %3971 = vmatmul.mubr.msk.f32.vlgmr.msra.gmra.mxu0 %vm140_vm0, %v200_v57  ;;  %3979 = vmatmul.mubr.msk.f32.vlgmr.msra.gmra.mxu1 %vm140_vm0, %v168_v58  ;;  %v169_v62 = vld [vmem:[#allocation2 + $0x8] sm:$0xff]  ;;  %v202_v4 = vld [vmem:[#allocation2 + $0x11] sm:$0xff]  ;;  %v3999_v13 = vld [vmem:[%s6683_s1 + $0x1e0] sm:$0xff] }
  0x6f   :  { %572 = vmatprep.subr.mxu0 %v4010_v55  ;;  %327 = vmatprep.mubr.f32.mxu0 %v5352_v0  ;;  %v170_v5 = vld [vmem:[#allocation2 + $0x10] sm:$0xff]  ;;  %v203_v9 = vld [vmem:[#allocation2 + $0x19] sm:$0xff]  ;;  %v4000_v12 = vld [vmem:[%s6683_s1 + $0x1e8] sm:$0xff] }
  0x70   :  { %573 = vmatpush1.msra.mxu0 %v4009_v56  ;;  %464 = vmatprep.mubr.f32.mxu1 %v5352_v0  ;;  %v171_v10 = vld [vmem:[#allocation2 + $0x18] sm:$0xff]  ;;  %v4001_v11 = vld [vmem:[%s6683_s1 + $0x1f0] sm:$0xff]  ;;  %v3996_v18 = vld [vmem:[%s6683_s1 + $0x1c8] sm:$0xff] }
  0x71   :  { %574 = vmatprep.subr.mxu0 %v4008_v60  ;;  %v204_v14 = vld [vmem:[#allocation2 + $0x29] sm:$0xff]  ;;  %v3998_v16 = vld [vmem:[%s6683_s1 + $0x1d8] sm:$0xff]  ;;  %v3995_v21 = vld [vmem:[%s6683_s1 + $0x1c0] sm:$0xff] }
  0x72   :  { %3972 = vmatmul.mubr.msk.f32.gmra.mxu0 %vm140_vm0, %v201_v61  ;;  %3980 = vmatmul.mubr.msk.f32.gmra.mxu1 %vm140_vm0, %v169_v62  ;;  %v172_v15 = vld [vmem:[#allocation2 + $0x28] sm:$0xff]  ;;  %v3997_v17 = vld [vmem:[%s6683_s1 + $0x1d0] sm:$0xff]  ;;  %v3994_v22 = vld [vmem:[%s6683_s1 + $0x1b8] sm:$0xff] }
  0x73   :  { %575 = vmatpush1.msra.mxu0 %v4007_v63  ;;  %333 = vmatprep.mubr.f32.mxu0 %v5352_v0  ;;  %v205_v19 = vld [vmem:[#allocation2 + $0x31] sm:$0xff]  ;;  %v206_v24 = vld [vmem:[#allocation2 + $0x39] sm:$0xff]  ;;  %v3992_v26 = vld [vmem:[%s6683_s1 + $0x1a8] sm:$0xff] }
  0x74   :  { %576 = vmatprep.subr.mxu0 %v4006_v2  ;;  %470 = vmatprep.mubr.f32.mxu1 %v5352_v0  ;;  %v173_v20 = vld [vmem:[#allocation2 + $0x30] sm:$0xff]  ;;  %v174_v25 = vld [vmem:[#allocation2 + $0x38] sm:$0xff]  ;;  %v3991_v27 = vld [vmem:[%s6683_s1 + $0x1a0] sm:$0xff] }
  0x75   :  { %577 = vmatpush1.msra.mxu0 %v4005_v3  ;;  %v3993_v23 = vld [vmem:[%s6683_s1 + $0x1b0] sm:$0xff]  ;;  %v3990_v28 = vld [vmem:[%s6683_s1 + $0x198] sm:$0xff]  ;;  %v207_v29 = vld [vmem:[#allocation2 + $0x41] sm:$0xff] }
  0x76   :  { %3973 = vmatmul.mubr.msk.f32.gmra.mxu0 %vm140_vm0, %v202_v4  ;;  %3981 = vmatmul.mubr.msk.f32.gmra.mxu1 %vm140_vm0, %v170_v5  ;;  %v175_v30 = vld [vmem:[#allocation2 + $0x40] sm:$0xff]  ;;  %v3989_v31 = vld [vmem:[%s6683_s1 + $0x190] sm:$0xff]  ;;  %v3988_v32 = vld [vmem:[%s6683_s1 + $0x188] sm:$0xff] }
  0x77   :  { %578 = vmatprep.subr.mxu0 %v4004_v6  ;;  %339 = vmatprep.mubr.f32.mxu0 %v5352_v0  ;;  %v3987_v33 = vld [vmem:[%s6683_s1 + $0x180] sm:$0xff]  ;;  %v508_v35 = vld [vmem:[#allocation2 + $0xa] sm:$0xff]  ;;  %v509_v36 = vld [vmem:[#allocation2 + $0x12] sm:$0xff] }
  0x78   :  { %579 = vmatpush1.msra.mxu0 %v4003_v7  ;;  %476 = vmatprep.mubr.f32.mxu1 %v5352_v0  ;;  %v507_v34 = vld [vmem:[#allocation2 + $0x2] sm:$0xff]  ;;  %v510_v37 = vld [vmem:[#allocation2 + $0x1a] sm:$0xff]  ;;  %v511_v38 = vld [vmem:[#allocation2 + $0x2a] sm:$0xff] }
  0x79   :  { %580 = vmatprep.subr.mxu0 %v4002_v8  ;;  %v512_v39 = vld [vmem:[#allocation2 + $0x32] sm:$0xff]  ;;  %v513_v40 = vld [vmem:[#allocation2 + $0x3a] sm:$0xff]  ;;  %v514_v41 = vld [vmem:[#allocation2 + $0x42] sm:$0xff] }
  0x7a   :  { %3974 = vmatmul.mubr.msk.f32.gmra.mxu0 %vm140_vm0, %v203_v9  ;;  %3982 = vmatmul.mubr.msk.f32.gmra.mxu1 %vm140_vm0, %v171_v10  ;;  %v768_v42 = vld [vmem:[#allocation4 + $0xf8] sm:$0xff]  ;;  %v767_v46 = vld [vmem:[#allocation4 + $0xf0] sm:$0xff]  ;;  %v903_v50 = vld [vmem:[#allocation7 + $0xe8] sm:$0xff] }
  0x7b   :  { %581 = vmatpush1.msra.mxu0 %v4001_v11  ;;  %345 = vmatprep.mubr.f32.mxu0 %v5352_v0  ;;  %v905_v43 = vld [vmem:[#allocation7 + $0xf8] sm:$0xff]  ;;  %v904_v47 = vld [vmem:[#allocation7 + $0xf0] sm:$0xff]  ;;  %v750_v51 = vld [vmem:[#allocation4 + $0x68] sm:$0xff] }
  0x7c   :  { %582 = vmatprep.subr.mxu0 %v4000_v12  ;;  %482 = vmatprep.mubr.f32.mxu1 %v5352_v0  ;;  %v752_v44 = vld [vmem:[#allocation4 + $0x78] sm:$0xff]  ;;  %v751_v48 = vld [vmem:[#allocation4 + $0x70] sm:$0xff]  ;;  %v887_v52 = vld [vmem:[#allocation7 + $0x68] sm:$0xff] }
  0x7d   :  { %583 = vmatpush1.msra.mxu0 %v3999_v13  ;;  %4019 = vmatprep.subr.mxu1 %v768_v42  ;;  %v889_v45 = vld [vmem:[#allocation7 + $0x78] sm:$0xff]  ;;  %v888_v49 = vld [vmem:[#allocation7 + $0x70] sm:$0xff]  ;;  %v765_v53 = vld [vmem:[#allocation4 + $0xe0] sm:$0xff] }
  0x7e   :  { %3975 = vmatmul.mubr.msk.f32.gmra.mxu0 %vm140_vm0, %v204_v14  ;;  %3983 = vmatmul.mubr.msk.f32.gmra.mxu1 %vm140_vm0, %v172_v15  ;;  %v902_v54 = vld [vmem:[#allocation7 + $0xe0] sm:$0xff]  ;;  %v764_v57 = vld [vmem:[#allocation4 + $0xd8] sm:$0xff]  ;;  %v763_v61 = vld [vmem:[#allocation4 + $0xd0] sm:$0xff] }
  0x7f   :  { %584 = vmatprep.subr.mxu0 %v3998_v16  ;;  %351 = vmatprep.mubr.f32.mxu0 %v5352_v0  ;;  %v749_v55 = vld [vmem:[#allocation4 + $0x60] sm:$0xff]  ;;  %v901_v58 = vld [vmem:[#allocation7 + $0xd8] sm:$0xff]  ;;  %v900_v62 = vld [vmem:[#allocation7 + $0xd0] sm:$0xff] }
  0x80   :  { %585 = vmatpush1.msra.mxu0 %v3997_v17  ;;  %488 = vmatprep.mubr.f32.mxu1 %v5352_v0  ;;  %v886_v56 = vld [vmem:[#allocation7 + $0x60] sm:$0xff]  ;;  %v748_v59 = vld [vmem:[#allocation4 + $0x58] sm:$0xff]  ;;  %v747_v63 = vld [vmem:[#allocation4 + $0x50] sm:$0xff] }
  0x81   :  { %586 = vmatprep.subr.mxu0 %v3996_v18  ;;  %4020 = vmatpush3.msra.mxu1 %v752_v44  ;;  %v885_v60 = vld [vmem:[#allocation7 + $0x58] sm:$0xff]  ;;  %v884_v1 = vld [vmem:[#allocation7 + $0x50] sm:$0xff]  ;;  %v762_v2 = vld [vmem:[#allocation4 + $0xc8] sm:$0xff] }
  0x82   :  { %3976 = vmatmul.mubr.msk.f32.gmra.mxu0 %vm140_vm0, %v205_v19  ;;  %3984 = vmatmul.mubr.msk.f32.gmra.mxu1 %vm140_vm0, %v173_v20  ;;  %v899_v3 = vld [vmem:[#allocation7 + $0xc8] sm:$0xff]  ;;  %v761_v6 = vld [vmem:[#allocation4 + $0xc0] sm:$0xff]  ;;  %v760_v10 = vld [vmem:[#allocation4 + $0xb8] sm:$0xff] }
  0x83   :  { %587 = vmatpush1.msra.mxu0 %v3995_v21  ;;  %357 = vmatprep.mubr.f32.mxu0 %v5352_v0  ;;  %v746_v4 = vld [vmem:[#allocation4 + $0x48] sm:$0xff]  ;;  %v898_v7 = vld [vmem:[#allocation7 + $0xc0] sm:$0xff]  ;;  %v897_v11 = vld [vmem:[#allocation7 + $0xb8] sm:$0xff] }
  0x84   :  { %588 = vmatprep.subr.mxu0 %v3994_v22  ;;  %494 = vmatprep.mubr.f32.mxu1 %v5352_v0  ;;  %v883_v5 = vld [vmem:[#allocation7 + $0x48] sm:$0xff]  ;;  %v745_v8 = vld [vmem:[#allocation4 + $0x40] sm:$0xff]  ;;  %v744_v12 = vld [vmem:[#allocation4 + $0x38] sm:$0xff] }
  0x85   :  { %589 = vmatpush1.msra.mxu0 %v3993_v23  ;;  %4021 = vmatprep.subr.mxu1 %v767_v46  ;;  %v882_v9 = vld [vmem:[#allocation7 + $0x40] sm:$0xff]  ;;  %v881_v13 = vld [vmem:[#allocation7 + $0x38] sm:$0xff]  ;;  %v759_v14 = vld [vmem:[#allocation4 + $0xb0] sm:$0xff] }
  0x86   :  { %3977 = vmatmul.mubr.msk.f32.gmra.mxu0 %vm140_vm0, %v206_v24  ;;  %3985 = vmatmul.mubr.msk.f32.gmra.mxu1 %vm140_vm0, %v174_v25  ;;  %v896_v15 = vld [vmem:[#allocation7 + $0xb0] sm:$0xff]  ;;  %v758_v18 = vld [vmem:[#allocation4 + $0xa8] sm:$0xff]  ;;  %v757_v22 = vld [vmem:[#allocation4 + $0xa0] sm:$0xff] }
  0x87   :  { %590 = vmatprep.subr.mxu0 %v3992_v26  ;;  %363 = vmatprep.mubr.f32.mxu0 %v5352_v0  ;;  %v743_v16 = vld [vmem:[#allocation4 + $0x30] sm:$0xff]  ;;  %v895_v19 = vld [vmem:[#allocation7 + $0xa8] sm:$0xff]  ;;  %v894_v23 = vld [vmem:[#allocation7 + $0xa0] sm:$0xff] }
  0x88   :  { %591 = vmatpush1.msra.mxu0 %v3991_v27  ;;  %500 = vmatprep.mubr.f32.mxu1 %v5352_v0  ;;  %v880_v17 = vld [vmem:[#allocation7 + $0x30] sm:$0xff]  ;;  %v742_v20 = vld [vmem:[#allocation4 + $0x28] sm:$0xff]  ;;  %v741_v24 = vld [vmem:[#allocation4 + $0x20] sm:$0xff] }
  0x89   :  { %592 = vmatprep.subr.mxu0 %v3990_v28  ;;  %4022 = vmatpush3.msra.mxu1 %v751_v48  ;;  %v879_v21 = vld [vmem:[#allocation7 + $0x28] sm:$0xff]  ;;  %v878_v25 = vld [vmem:[#allocation7 + $0x20] sm:$0xff]  ;;  %v756_v26 = vld [vmem:[#allocation4 + $0x98] sm:$0xff] }
  0x8a   :  { %3978 = vmatmul.mubr.msk.f32.gmra.mxu0 %vm140_vm0, %v207_v29  ;;  %3986 = vmatmul.mubr.msk.f32.gmra.mxu1 %vm140_vm0, %v175_v30  ;;  %v893_v27 = vld [vmem:[#allocation7 + $0x98] sm:$0xff]  ;;  %v755_v30 = vld [vmem:[#allocation4 + $0x90] sm:$0xff] }
  0x8b   :  { %593 = vmatpush1.msra.mxu0 %v3989_v31  ;;  %628 = vmatprep.mubr.f32.mxu0 %v5352_v0  ;;  %v740_v28 = vld [vmem:[#allocation4 + $0x18] sm:$0xff]  ;;  %v892_v31 = vld [vmem:[#allocation7 + $0x90] sm:$0xff] }
  0x8c   :  { %594 = vmatprep.subr.mxu0 %v3988_v32  ;;  %v877_v29 = vld [vmem:[#allocation7 + $0x18] sm:$0xff]  ;;  %v739_v32 = vld [vmem:[#allocation4 + $0x10] sm:$0xff] }
  0x8d   :  { %595 = vmatpush1.msra.mxu0 %v3987_v33  ;;  %v876_v33 = vld [vmem:[#allocation7 + $0x10] sm:$0xff] }
  0x8e   :  { %4011 = vmatmul.mubr.msk.f32.vlgmr.msra.gmra.mxu0 %vm140_vm0, %v507_v34  ;;  %4075 = vmatprep.subr.mxu0 %v905_v43  ;;  %v754_v34 = vld [vmem:[#allocation4 + $0x88] sm:$0xff] }
  0x8f   :  { %634 = vmatprep.mubr.f32.mxu0 %v5352_v0  ;;  %4076 = vmatpush3.msra.mxu0 %v889_v45 }
  0x90   :  { %4077 = vmatprep.subr.mxu0 %v904_v47 }
  0x91   :  { %4078 = vmatpush3.msra.mxu0 %v888_v49 }
  0x92   :  { %4012 = vmatmul.mubr.msk.f32.gmra.mxu0 %vm140_vm0, %v508_v35  ;;  %4079 = vmatprep.subr.mxu0 %v903_v50  ;;  %v891_v35 = vld [vmem:[#allocation7 + $0x88] sm:$0xff] }
  0x93   :  { %640 = vmatprep.mubr.f32.mxu0 %v5352_v0  ;;  %4080 = vmatpush3.msra.mxu0 %v887_v52 }
  0x94   :  { %4081 = vmatprep.subr.mxu0 %v902_v54 }
  0x95   :  { %4082 = vmatpush3.msra.mxu0 %v886_v56 }
  0x96   :  { %4013 = vmatmul.mubr.msk.f32.gmra.mxu0 %vm140_vm0, %v509_v36  ;;  %4083 = vmatprep.subr.mxu0 %v901_v58  ;;  %v738_v36 = vld [vmem:[#allocation4 + $0x8] sm:$0xff]  ;;  %v695_v58 = vlaneseq }
  0x97   :  { %646 = vmatprep.mubr.f32.mxu0 %v5352_v0  ;;  %4084 = vmatpush3.msra.mxu0 %v885_v60 }
  0x98   :  { %4085 = vmatprep.subr.mxu0 %v900_v62  ;;  %v5797_v62 = vshrl.u32 %v695_v58, 7 }
  0x99   :  { %4086 = vmatpush3.msra.mxu0 %v884_v1 }
  0x9a   :  { %4014 = vmatmul.mubr.msk.f32.gmra.mxu0 %vm140_vm0, %v510_v37  ;;  %4087 = vmatprep.subr.mxu0 %v899_v3  ;;  %v875_v37 = vld [vmem:[#allocation7 + $0x8] sm:$0xff]  ;;  %v697_v3 = vsub.s32 0, %v5797_v62 }
  0x9b   :  { %652 = vmatprep.mubr.f32.mxu0 %v5352_v0  ;;  %4088 = vmatpush3.msra.mxu0 %v883_v5  ;;  %v701_v5 = vsub.s32 1, %v5797_v62 }
  0x9c   :  { %4089 = vmatprep.subr.mxu0 %v898_v7 }
  0x9d   :  { %4090 = vmatpush3.msra.mxu0 %v882_v9 }
  0x9e   :  { %4015 = vmatmul.mubr.msk.f32.gmra.mxu0 %vm140_vm0, %v511_v38  ;;  %4091 = vmatprep.subr.mxu0 %v897_v11  ;;  %v753_v38 = vld [vmem:[#allocation4 + $0x80] sm:$0xff] }
  0x9f   :  { %658 = vmatprep.mubr.f32.mxu0 %v5352_v0  ;;  %4092 = vmatpush3.msra.mxu0 %v881_v13 }
  0xa0   :  { %4093 = vmatprep.subr.mxu0 %v896_v15 }
  0xa1   :  { %4094 = vmatpush3.msra.mxu0 %v880_v17 }
  0xa2   :  { %4016 = vmatmul.mubr.msk.f32.gmra.mxu0 %vm140_vm0, %v512_v39  ;;  %4095 = vmatprep.subr.mxu0 %v895_v19  ;;  %v890_v39 = vld [vmem:[#allocation7 + $0x80] sm:$0xff] }
  0xa3   :  { %664 = vmatprep.mubr.f32.mxu0 %v5352_v0  ;;  %4096 = vmatpush3.msra.mxu0 %v879_v21 }
  0xa4   :  { %4097 = vmatprep.subr.mxu0 %v894_v23 }
  0xa5   :  { %4098 = vmatpush3.msra.mxu0 %v878_v25 }
  0xa6   :  { %4017 = vmatmul.mubr.msk.f32.gmra.mxu0 %vm140_vm0, %v513_v40  ;;  %4099 = vmatprep.subr.mxu0 %v893_v27  ;;  %v737_v40 = vld [vmem:[#allocation4] sm:$0xff] }
  0xa7   :  { %670 = vmatprep.mubr.f32.mxu0 %v5352_v0  ;;  %v766_v0 = vld [vmem:[#allocation4 + $0xe8] sm:$0xff]  ;;  %4100 = vmatpush3.msra.mxu0 %v877_v29 }
  0xa8   :  { %4023 = vmatprep.subr.mxu1 %v766_v0  ;;  %4101 = vmatprep.subr.mxu0 %v892_v31 }
  0xa9   :  { %4024 = vmatpush3.msra.mxu1 %v750_v51  ;;  %4102 = vmatpush3.msra.mxu0 %v876_v33 }
  0xaa   :  { %4018 = vmatmul.mubr.msk.f32.gmra.mxu0 %vm140_vm0, %v514_v41  ;;  %4025 = vmatprep.subr.mxu1 %v765_v53  ;;  %v874_v41 = vld [vmem:[#allocation7] sm:$0xff] }
  0xab   :  { %4026 = vmatpush3.msra.mxu1 %v749_v55  ;;  %4103 = vmatprep.subr.mxu0 %v891_v35 }
  0xac   :  { %4027 = vmatprep.subr.mxu1 %v764_v57  ;;  %4104 = vmatpush3.msra.mxu0 %v875_v37 }
  0xad   :  { %4028 = vmatpush3.msra.mxu1 %v748_v59  ;;  %4105 = vmatprep.subr.mxu0 %v890_v39 }
  0xae   :  { %4029 = vmatprep.subr.mxu1 %v763_v61  ;;  %4106 = vmatpush3.msra.mxu0 %v874_v41 }
  0xaf   :  { %4030 = vmatpush3.msra.mxu1 %v747_v63 }
  0xb0   :  { %4031 = vmatprep.subr.mxu1 %v762_v2 }
  0xb1   :  { %4032 = vmatpush3.msra.mxu1 %v746_v4  ;;  %v693_v4 = vld [vmem:[%s6684_s2] sm:$0x3] }
  0xb2   :  { %4033 = vmatprep.subr.mxu1 %v761_v6  ;;  %v5816_v13 = vrot.slane %v693_v4, %v701_v5 }
  0xb3   :  { %4034 = vmatpush3.msra.mxu1 %v745_v8 }
  0xb4   :  { %4035 = vmatprep.subr.mxu1 %v760_v10  ;;  %v5812_v10 = vrot.slane %v693_v4, %v697_v3 }
  0xb5   :  { %4036 = vmatpush3.msra.mxu1 %v744_v12 }
  0xb6   :  { %4037 = vmatprep.subr.mxu1 %v759_v14 }
  0xb7   :  { %4038 = vmatpush3.msra.mxu1 %v743_v16 }
  0xb8   :  { %4039 = vmatprep.subr.mxu1 %v758_v18 }
  0xb9   :  { %4040 = vmatpush3.msra.mxu1 %v742_v20 }
  0xba   :  { %4041 = vmatprep.subr.mxu1 %v757_v22 }
  0xbb   :  { %4042 = vmatpush3.msra.mxu1 %v741_v24 }
  0xbc   :  { %4043 = vmatprep.subr.mxu1 %v756_v26 }
  0xbd   :  { %4044 = vmatpush3.msra.mxu1 %v740_v28 }
  0xbe   :  { %4045 = vmatprep.subr.mxu1 %v755_v30 }
  0xbf   :  { %4046 = vmatpush3.msra.mxu1 %v739_v32 }
  0xc0   :  { %4047 = vmatprep.subr.mxu1 %v754_v34 }
  0xc1   :  { %4048 = vmatpush3.msra.mxu1 %v738_v36 }
  0xc2   :  { %4049 = vmatprep.subr.mxu1 %v753_v38 }
  0xc3   :  { %4050 = vmatpush3.msra.mxu1 %v737_v40 }
 0x12e   :  { %v323_v42 = vpop.f32.mrf.mxu0  ;;  %v460_v43 = vpop.f32.mrf.mxu1 }
 0x12f   :  { %v461_v8 = vadd.f32 %v460_v43, %v323_v42 }
 0x130   :  { %v325_v44 = vpop.f32.mrf.mxu0  ;;  %v462_v45 = vpop.f32.mrf.mxu1 }
 0x131   :  { %v463_v11 = vadd.f32 %v462_v45, %v325_v44 }
 0x132   :  { %v329_v46 = vpop.f32.mrf.mxu0  ;;  %v466_v47 = vpop.f32.mrf.mxu1 }
 0x133   :  { %v467_v16 = vadd.f32 %v466_v47, %v329_v46 }
 0x134   :  { %v331_v48 = vpop.f32.mrf.mxu0  ;;  %v468_v0 = vpop.f32.mrf.mxu1 }
 0x135   :  { %v469_v20 = vadd.f32 %v468_v0, %v331_v48 }
 0x136   :  { %v335_v49 = vpop.f32.mrf.mxu0  ;;  %v472_v52 = vpop.f32.mrf.mxu1 }
 0x137   :  { %v473_v25 = vadd.f32 %v472_v52, %v335_v49 }
 0x138   :  { %v337_v50 = vpop.f32.mrf.mxu0  ;;  %v474_v55 = vpop.f32.mrf.mxu1 }
 0x139   :  { %v475_v31 = vadd.f32 %v474_v55, %v337_v50 }
 0x13a   :  { %v341_v51 = vpop.f32.mrf.mxu0  ;;  %v478_v59 = vpop.f32.mrf.mxu1 }
 0x13b   :  { %v479_v36 = vadd.f32 %v478_v59, %v341_v51 }
 0x13c   :  { %v343_v53 = vpop.f32.mrf.mxu0  ;;  %v480_v63 = vpop.f32.mrf.mxu1 }
 0x13d   :  { %v481_v42 = vadd.f32 %v480_v63, %v343_v53 }
 0x13e   :  { %v5787_v54 = vpop.f32.mrf.mxu0  ;;  %v484_v6 = vpop.f32.mrf.mxu1 }
 0x13f   :  { %v485_v47 = vadd.f32 %v484_v6, %v5787_v54 }
 0x140   :  { %v5789_v56 = vpop.f32.mrf.mxu0  ;;  %v486_v14 = vpop.f32.mrf.mxu1 }
 0x141   :  { %v487_v52 = vadd.f32 %v486_v14, %v5789_v56 }
 0x142   :  { %v5791_v57 = vpop.f32.mrf.mxu0  ;;  %v490_v23 = vpop.f32.mrf.mxu1 }
 0x143   :  { %v491_v63 = vadd.f32 %v490_v23, %v5791_v57 }
 0x144   :  { %v5793_v60 = vpop.f32.mrf.mxu0  ;;  %v492_v34 = vpop.f32.mrf.mxu1 }
 0x146   :  { %v5795_v61 = vpop.f32.mrf.mxu0  ;;  %v496_v45 = vpop.f32.mrf.mxu1 }
 0x148   :  { %v5799_v1 = vpop.f32.mrf.mxu0  ;;  %v498_v58 = vpop.f32.mrf.mxu1 }
 0x14a   :  { %v5801_v2 = vpop.f32.mrf.mxu0  ;;  %v502_v14 = vpop.f32.mrf.mxu1 }
 0x14c   :  { %v5808_v7 = vpop.f32.mrf.mxu0  ;;  %v504_v23 = vpop.f32.mrf.mxu1 }
 0x14e   :  { %v630_v9 = vpop.f32.mrf.mxu0 }
 0x14f   :  { %v677_v12 = vadd.f32 %v630_v9, %v461_v8 }
 0x150   :  { %v632_v15 = vpop.f32.mrf.mxu0 }
 0x151   :  { %v678_v17 = vadd.f32 %v632_v15, %v463_v11  ;;  %v705_v18 = vadd.f32 %v5812_v10, %v677_v12  ;;  %v493_v11 = vadd.f32 %v492_v34, %v5793_v60 }
 0x152   :  { %v636_v19 = vpop.f32.mrf.mxu0 }
 0x153   :  { %v706_v21 = vadd.f32 %v5816_v13, %v678_v17  ;;  %v679_v22 = vadd.f32 %v636_v19, %v467_v16  ;;  %v721_v28 = vmax.f32 %v705_v18, 0.0  ;;  %v497_v16 = vadd.f32 %v496_v45, %v5795_v61  ;;  %v1568_v45 = vld [vmem:[#allocation9 + $0x1d0] sm:$0xff] }
 0x154   :  { %v638_v24 = vpop.f32.mrf.mxu0 }
 0x155   :  { %v722_v26 = vmax.f32 %v706_v21, 0.0  ;;  %v680_v27 = vadd.f32 %v638_v24, %v469_v20  ;;  %v707_v29 = vadd.f32 %v5812_v10, %v679_v22  ;;  %v499_v21 = vadd.f32 %v498_v58, %v5799_v1  ;;  %v1561_v58 = vld [vmem:[#allocation9 + $0x198] sm:$0xff] }
 0x156   :  { %v642_v30 = vpop.f32.mrf.mxu0 }
 0x157   :  { %v708_v32 = vadd.f32 %v5816_v13, %v680_v27  ;;  %v681_v33 = vadd.f32 %v642_v30, %v473_v25  ;;  %833 = vmatprep.mubr.f32.mxu1 %v722_v26  ;;  %970 = vmatprep.mubr.f32.mxu0 %v722_v26  ;;  %v723_v39 = vmax.f32 %v707_v29, 0.0  ;;  %v503_v25 = vadd.f32 %v502_v14, %v5801_v2  ;;  %v1522_v14 = vld [vmem:[#allocation9 + $0x88] sm:$0xff] }
 0x158   :  { %v644_v35 = vpop.f32.mrf.mxu0  ;;  %834 = vmatmul.mubr.f32.vlgmr.msra.gmra.mxu1 %v721_v28  ;;  %971 = vmatmul.mubr.f32.vlgmr.msra.gmra.mxu0 %v721_v28  ;;  %v505_v30 = vadd.f32 %v504_v23, %v5808_v7  ;;  %v1551_v23 = vld [vmem:[#allocation9 + $0x148] sm:$0xff] }
 0x159   :  { %v724_v37 = vmax.f32 %v708_v32, 0.0  ;;  %v682_v38 = vadd.f32 %v644_v35, %v475_v31  ;;  %v709_v40 = vadd.f32 %v5812_v10, %v681_v33 }
 0x15a   :  { %v648_v41 = vpop.f32.mrf.mxu0 }
 0x15b   :  { %v710_v43 = vadd.f32 %v5816_v13, %v682_v38  ;;  %v683_v44 = vadd.f32 %v648_v41, %v479_v36  ;;  %838 = vmatprep.mubr.f32.mxu1 %v724_v37  ;;  %975 = vmatprep.mubr.f32.mxu0 %v724_v37  ;;  %v725_v0 = vmax.f32 %v709_v40, 0.0  ;;  %v5842_v38 = vld [vmem:[#allocation3] sm:$0xff]  ;;  %v1570_v40 = vld [vmem:[#allocation9 + $0x1e0] sm:$0xff]  ;;  %v1536_v41 = vld [vmem:[#allocation9 + $0xf8] sm:$0xff] }
 0x15c   :  { %v650_v46 = vpop.f32.mrf.mxu0  ;;  %839 = vmatmul.mubr.f32.gmra.mxu1 %v723_v39  ;;  %976 = vmatmul.mubr.f32.gmra.mxu0 %v723_v39  ;;  %v1573_v39 = vld [vmem:[#allocation9 + $0x1f8] sm:$0xff] }
 0x15d   :  { %v726_v48 = vmax.f32 %v710_v43, 0.0  ;;  %v684_v49 = vadd.f32 %v650_v46, %v481_v42  ;;  %v711_v50 = vadd.f32 %v5812_v10, %v683_v44  ;;  %1574 = vmatprep.subr.mxu1 %v1573_v39  ;;  %1663 = vmatprep.subr.mxu0 %v1536_v41  ;;  %v1535_v42 = vld [vmem:[#allocation9 + $0xf0] sm:$0xff]  ;;  %v1534_v43 = vld [vmem:[#allocation9 + $0xe8] sm:$0xff]  ;;  %v1569_v44 = vld [vmem:[#allocation9 + $0x1d8] sm:$0xff] }
 0x15e   :  { %v654_v51 = vpop.f32.mrf.mxu0  ;;  %1664 = vmatpush1.msra.mxu0 %v1535_v42  ;;  %v1567_v46 = vld [vmem:[#allocation9 + $0x1c8] sm:$0xff]  ;;  %v1509_v39 = vld [vmem:[#allocation9 + $0x20] sm:$0xff]  ;;  %v5353_v42 = vmov 1983009808  }
 0x15f   :  { %v712_v53 = vadd.f32 %v5816_v13, %v684_v49  ;;  %v685_v55 = vadd.f32 %v654_v51, %v485_v47  ;;  %843 = vmatprep.mubr.f32.mxu1 %v726_v48  ;;  %980 = vmatprep.mubr.f32.mxu0 %v726_v48  ;;  %v727_v6 = vmax.f32 %v711_v50, 0.0  ;;  %v1566_v47 = vld [vmem:[#allocation9 + $0x1c0] sm:$0xff]  ;;  %v1532_v49 = vld [vmem:[#allocation9 + $0xd8] sm:$0xff]  ;;  %v1530_v50 = vld [vmem:[#allocation9 + $0xc8] sm:$0xff] }
 0x160   :  { %v656_v59 = vpop.f32.mrf.mxu0  ;;  %844 = vmatmul.mubr.f32.gmra.mxu1 %v725_v0  ;;  %981 = vmatmul.mubr.f32.gmra.mxu0 %v725_v0  ;;  %v1533_v48 = vld [vmem:[#allocation9 + $0xe0] sm:$0xff]  ;;  %v1531_v0 = vld [vmem:[#allocation9 + $0xd0] sm:$0xff]  ;;  %v1565_v51 = vld [vmem:[#allocation9 + $0x1b8] sm:$0xff] }
 0x161   :  { %v728_v54 = vmax.f32 %v712_v53, 0.0  ;;  %v686_v4 = vadd.f32 %v656_v59, %v487_v52  ;;  %v713_v8 = vadd.f32 %v5812_v10, %v685_v55  ;;  %1665 = vmatprep.subr.mxu0 %v1534_v43  ;;  %v1564_v52 = vld [vmem:[#allocation9 + $0x1b0] sm:$0xff]  ;;  %v1563_v53 = vld [vmem:[#allocation9 + $0x1a8] sm:$0xff]  ;;  %v1562_v55 = vld [vmem:[#allocation9 + $0x1a0] sm:$0xff]  ;;  %v1029_v43 = vunpack.c.l.s4 %v5353_v42 }
 0x162   :  { %v660_v9 = vpop.f32.mrf.mxu0  ;;  %1666 = vmatpush1.msra.mxu0 %v1533_v48  ;;  %v1529_v59 = vld [vmem:[#allocation9 + $0xc0] sm:$0xff] }
 0x163   :  { %v714_v56 = vadd.f32 %v5816_v13, %v686_v4  ;;  %v687_v12 = vadd.f32 %v660_v9, %v491_v63  ;;  %848 = vmatprep.mubr.f32.mxu1 %v728_v54  ;;  %985 = vmatprep.mubr.f32.mxu0 %v728_v54  ;;  %v729_v18 = vmax.f32 %v713_v8, 0.0  ;;  %v1560_v63 = vld [vmem:[#allocation9 + $0x190] sm:$0xff]  ;;  %v1528_v54 = vld [vmem:[#allocation9 + $0xb8] sm:$0xff]  ;;  %v1559_v4 = vld [vmem:[#allocation9 + $0x188] sm:$0xff] }
 0x164   :  { %v662_v15 = vpop.f32.mrf.mxu0  ;;  %849 = vmatmul.mubr.f32.gmra.mxu1 %v727_v6  ;;  %986 = vmatmul.mubr.f32.gmra.mxu0 %v727_v6  ;;  %v1527_v6 = vld [vmem:[#allocation9 + $0xb0] sm:$0xff]  ;;  %v1558_v8 = vld [vmem:[#allocation9 + $0x180] sm:$0xff]  ;;  %v1526_v9 = vld [vmem:[#allocation9 + $0xa8] sm:$0xff] }
 0x165   :  { %v730_v57 = vmax.f32 %v714_v56, 0.0  ;;  %v688_v17 = vadd.f32 %v662_v15, %v493_v11  ;;  %v715_v19 = vadd.f32 %v5812_v10, %v687_v12  ;;  %1667 = vmatprep.subr.mxu0 %v1532_v49  ;;  %v1525_v11 = vld [vmem:[#allocation9 + $0xa0] sm:$0xff]  ;;  %v1524_v56 = vld [vmem:[#allocation9 + $0x98] sm:$0xff]  ;;  %v1523_v12 = vld [vmem:[#allocation9 + $0x90] sm:$0xff] }
 0x166   :  { %v666_v20 = vpop.f32.mrf.mxu0  ;;  %1668 = vmatpush1.msra.mxu0 %v1531_v0  ;;  %v1557_v15 = vld [vmem:[#allocation9 + $0x178] sm:$0xff]  ;;  %v1505_v41 = vld [vmem:[#allocation9] sm:$0xff] }
 0x167   :  { %v716_v60 = vadd.f32 %v5816_v13, %v688_v17  ;;  %v689_v22 = vadd.f32 %v666_v20, %v497_v16  ;;  %853 = vmatprep.mubr.f32.mxu1 %v730_v57  ;;  %990 = vmatprep.mubr.f32.mxu0 %v730_v57  ;;  %v731_v27 = vmax.f32 %v715_v19, 0.0  ;;  %v1556_v16 = vld [vmem:[#allocation9 + $0x170] sm:$0xff]  ;;  %v1555_v57 = vld [vmem:[#allocation9 + $0x168] sm:$0xff]  ;;  %v1554_v17 = vld [vmem:[#allocation9 + $0x160] sm:$0xff] }
 0x168   :  { %v668_v24 = vpop.f32.mrf.mxu0  ;;  %854 = vmatmul.mubr.f32.gmra.mxu1 %v729_v18  ;;  %991 = vmatmul.mubr.f32.gmra.mxu0 %v729_v18  ;;  %v1521_v18 = vld [vmem:[#allocation9 + $0x80] sm:$0xff]  ;;  %v1520_v19 = vld [vmem:[#allocation9 + $0x78] sm:$0xff]  ;;  %v1519_v20 = vld [vmem:[#allocation9 + $0x70] sm:$0xff] }
 0x169   :  { %v732_v61 = vmax.f32 %v716_v60, 0.0  ;;  %v690_v26 = vadd.f32 %v668_v24, %v499_v21  ;;  %v717_v28 = vadd.f32 %v5812_v10, %v689_v22  ;;  %1669 = vmatprep.subr.mxu0 %v1530_v50  ;;  %v1518_v21 = vld [vmem:[#allocation9 + $0x68] sm:$0xff]  ;;  %v1553_v60 = vld [vmem:[#allocation9 + $0x158] sm:$0xff]  ;;  %v1552_v22 = vld [vmem:[#allocation9 + $0x150] sm:$0xff] }
 0x16a   :  { %v672_v29 = vpop.f32.mrf.mxu0  ;;  %1670 = vmatpush1.msra.mxu0 %v1529_v59  ;;  %v1550_v24 = vld [vmem:[#allocation9 + $0x140] sm:$0xff] }
 0x16b   :  { %v718_v1 = vadd.f32 %v5816_v13, %v690_v26  ;;  %v691_v31 = vadd.f32 %v672_v29, %v503_v25  ;;  %858 = vmatprep.mubr.f32.mxu1 %v732_v61  ;;  %995 = vmatprep.mubr.f32.mxu0 %v732_v61  ;;  %v733_v35 = vmax.f32 %v717_v28, 0.0  ;;  %v1549_v25 = vld [vmem:[#allocation9 + $0x138] sm:$0xff]  ;;  %v1517_v61 = vld [vmem:[#allocation9 + $0x60] sm:$0xff]  ;;  %v1548_v26 = vld [vmem:[#allocation9 + $0x130] sm:$0xff] }
 0x16c   :  { %v674_v32 = vpop.f32.mrf.mxu0  ;;  %859 = vmatmul.mubr.f32.gmra.mxu1 %v731_v27  ;;  %996 = vmatmul.mubr.f32.gmra.mxu0 %v731_v27  ;;  %v1516_v27 = vld [vmem:[#allocation9 + $0x58] sm:$0xff]  ;;  %v1547_v28 = vld [vmem:[#allocation9 + $0x128] sm:$0xff]  ;;  %v1515_v29 = vld [vmem:[#allocation9 + $0x50] sm:$0xff] }
 0x16d   :  { %v734_v33 = vmax.f32 %v718_v1, 0.0  ;;  %v692_v34 = vadd.f32 %v674_v32, %v505_v30  ;;  %v719_v2 = vadd.f32 %v5812_v10, %v691_v31  ;;  %v1572_v10 = vld [vmem:[#allocation9 + $0x1f0] sm:$0xff]  ;;  %1671 = vmatprep.subr.mxu0 %v1528_v54  ;;  %v1546_v30 = vld [vmem:[#allocation9 + $0x120] sm:$0xff]  ;;  %v1514_v1 = vld [vmem:[#allocation9 + $0x48] sm:$0xff] }
 0x16e   :  { %1575 = vmatpush1.msra.mxu1 %v1572_v10  ;;  %1672 = vmatpush1.msra.mxu0 %v1527_v6  ;;  %v1545_v31 = vld [vmem:[#allocation9 + $0x118] sm:$0xff]  ;;  %v1544_v32 = vld [vmem:[#allocation9 + $0x110] sm:$0xff] }
 0x16f   :  { %v720_v36 = vadd.f32 %v5816_v13, %v692_v34  ;;  %863 = vmatprep.mubr.f32.mxu1 %v734_v33  ;;  %1000 = vmatprep.mubr.f32.mxu0 %v734_v33  ;;  %v735_v37 = vmax.f32 %v719_v2, 0.0  ;;  %v1571_v13 = vld [vmem:[#allocation9 + $0x1e8] sm:$0xff]  ;;  %v1542_v34 = vld [vmem:[#allocation9 + $0x100] sm:$0xff]  ;;  %v1788_v2 = vld [vmem:[#allocation9 + $0x2f8] sm:$0xff] }
 0x170   :  { %864 = vmatmul.mubr.f32.gmra.mxu1 %v733_v35  ;;  %1001 = vmatmul.mubr.f32.gmra.mxu0 %v733_v35  ;;  %v1543_v33 = vld [vmem:[#allocation9 + $0x108] sm:$0xff]  ;;  %v1513_v35 = vld [vmem:[#allocation9 + $0x40] sm:$0xff]  ;;  %v1508_v10 = vld [vmem:[#allocation9 + $0x18] sm:$0xff] }
 0x171   :  { %v736_v7 = vmax.f32 %v720_v36, 0.0  ;;  %1576 = vmatprep.subr.mxu1 %v1571_v13  ;;  %1673 = vmatprep.subr.mxu0 %v1526_v9  ;;  %v1512_v36 = vld [vmem:[#allocation9 + $0x38] sm:$0xff]  ;;  %v1507_v13 = vld [vmem:[#allocation9 + $0x10] sm:$0xff] }
 0x172   :  { %1577 = vmatpush1.msra.mxu1 %v1570_v40  ;;  %1674 = vmatpush1.msra.mxu0 %v1525_v11  ;;  %v1506_v40 = vld [vmem:[#allocation9 + $0x8] sm:$0xff] }
 0x173   :  { %868 = vmatprep.mubr.f32.mxu1 %v736_v7  ;;  %1005 = vmatprep.mubr.f32.mxu0 %v736_v7  ;;  %v1511_v7 = vld [vmem:[#allocation9 + $0x30] sm:$0xff] }
 0x174   :  { %869 = vmatmul.mubr.f32.gmra.mxu1 %v735_v37  ;;  %1006 = vmatmul.mubr.f32.gmra.mxu0 %v735_v37  ;;  %v1510_v37 = vld [vmem:[#allocation9 + $0x28] sm:$0xff] }
 0x175   :  { %1638 = vmatprep.mubr.f32.mxu1 %v5842_v38  ;;  %1727 = vmatprep.mubr.f32.mxu0 %v5842_v38 }
 0x176   :  { %1578 = vmatprep.subr.mxu1 %v1569_v44  ;;  %1675 = vmatprep.subr.mxu0 %v1524_v56  ;;  %v1030_v44 = vunpack.c.0.s8 %v1029_v43 }
 0x177   :  { %1579 = vmatpush1.msra.mxu1 %v1568_v45  ;;  %1676 = vmatpush1.msra.mxu0 %v1523_v12 }
 0x178   :  { %1580 = vmatprep.subr.mxu1 %v1567_v46  ;;  %1677 = vmatprep.subr.mxu0 %v1522_v14  ;;  %v5847_v49 = vsub.s32 %v1030_v44, %v5797_v62  ;;  %v2384_v62 = vld [vmem:[#allocation13 + $0xf8] sm:$0xff] }
 0x179   :  { %1581 = vmatpush1.msra.mxu1 %v1566_v47  ;;  %1678 = vmatpush1.msra.mxu0 %v1521_v18 }
 0x17a   :  { %1582 = vmatprep.subr.mxu1 %v1565_v51  ;;  %1679 = vmatprep.subr.mxu0 %v1520_v19 }
 0x17b   :  { %1583 = vmatpush1.msra.mxu1 %v1564_v52  ;;  %1680 = vmatpush1.msra.mxu0 %v1519_v20 }
 0x17c   :  { %1584 = vmatprep.subr.mxu1 %v1563_v53  ;;  %1681 = vmatprep.subr.mxu0 %v1518_v21 }
 0x17d   :  { %1585 = vmatpush1.msra.mxu1 %v1562_v55  ;;  %1682 = vmatpush1.msra.mxu0 %v1517_v61 }
 0x17e   :  { %1586 = vmatprep.subr.mxu1 %v1561_v58  ;;  %1683 = vmatprep.subr.mxu0 %v1516_v27 }
 0x17f   :  { %1587 = vmatpush1.msra.mxu1 %v1560_v63  ;;  %1684 = vmatpush1.msra.mxu0 %v1515_v29 }
 0x180   :  { %1588 = vmatprep.subr.mxu1 %v1559_v4  ;;  %1685 = vmatprep.subr.mxu0 %v1514_v1 }
 0x181   :  { %1589 = vmatpush1.msra.mxu1 %v1558_v8  ;;  %1686 = vmatpush1.msra.mxu0 %v1513_v35 }
 0x182   :  { %1590 = vmatprep.subr.mxu1 %v1557_v15  ;;  %1687 = vmatprep.subr.mxu0 %v1512_v36 }
 0x183   :  { %1591 = vmatpush1.msra.mxu1 %v1556_v16  ;;  %1688 = vmatpush1.msra.mxu0 %v1511_v7 }
 0x184   :  { %1592 = vmatprep.subr.mxu1 %v1555_v57  ;;  %1689 = vmatprep.subr.mxu0 %v1510_v37 }
 0x185   :  { %1593 = vmatpush1.msra.mxu1 %v1554_v17  ;;  %1690 = vmatpush1.msra.mxu0 %v1509_v39 }
 0x186   :  { %1594 = vmatprep.subr.mxu1 %v1553_v60  ;;  %1691 = vmatprep.subr.mxu0 %v1508_v10 }
 0x187   :  { %1595 = vmatpush1.msra.mxu1 %v1552_v22  ;;  %1692 = vmatpush1.msra.mxu0 %v1507_v13 }
 0x188   :  { %1596 = vmatprep.subr.mxu1 %v1551_v23  ;;  %1693 = vmatprep.subr.mxu0 %v1506_v40 }
 0x189   :  { %1597 = vmatpush1.msra.mxu1 %v1550_v24  ;;  %1694 = vmatpush1.msra.mxu0 %v1505_v41 }
 0x18a   :  { %1598 = vmatprep.subr.mxu1 %v1549_v25 }
 0x18b   :  { %1599 = vmatpush1.msra.mxu1 %v1548_v26 }
 0x18c   :  { %1600 = vmatprep.subr.mxu1 %v1547_v28 }
 0x18d   :  { %1601 = vmatpush1.msra.mxu1 %v1546_v30 }
 0x18e   :  { %1602 = vmatprep.subr.mxu1 %v1545_v31 }
 0x18f   :  { %1603 = vmatpush1.msra.mxu1 %v1544_v32 }
 0x190   :  { %1604 = vmatprep.subr.mxu1 %v1543_v33 }
 0x191   :  { %1605 = vmatpush1.msra.mxu1 %v1542_v34 }
 0x192   :  { %1789 = vmatprep.subr.mxu1 %v1788_v2 }
 0x218   :  { %v4051_v45 = vpop.f32.mrf.mxu1  ;;  %v4107_v46 = vpop.f32.mrf.mxu0 }
 0x21a   :  { %v4052_v47 = vpop.f32.mrf.mxu1  ;;  %v4108_v48 = vpop.f32.mrf.mxu0 }
 0x21b   :  { %v4053_v0 = vadd.f32 %v4052_v47, %v4051_v45  ;;  %v4109_v50 = vadd.f32 %v4108_v48, %v4107_v46 }
 0x21c   :  { %v4054_v51 = vpop.f32.mrf.mxu1  ;;  %v4110_v52 = vpop.f32.mrf.mxu0 }
 0x21d   :  { %v1011_v53 = vmax.f32 %v4053_v0, %v4109_v50 }
 0x21e   :  { %v4055_v55 = vpop.f32.mrf.mxu1  ;;  %v4111_v58 = vpop.f32.mrf.mxu0 }
 0x21f   :  { %v1027_v59 = vcombine.high %v1011_v53, %v1011_v53  ;;  %v1034_v63 = vrot.slane %v1011_v53, %v5847_v49  ;;  %v4056_v54 = vadd.f32 %v4055_v55, %v4054_v51  ;;  %v4112_v4 = vadd.f32 %v4111_v58, %v4110_v52 }
 0x220   :  { %v4057_v6 = vpop.f32.mrf.mxu1  ;;  %v4113_v8 = vpop.f32.mrf.mxu0 }
 0x221   :  { %v1041_v9 = vrot.slane %v1027_v59, %v5847_v49  ;;  %v1042_v11 = vcombine.high %v1034_v63, %v1034_v63  ;;  %v1196_v56 = vsel %vm1195_vm2, %v1034_v63, -inf  ;;  %v1012_v12 = vmax.f32 %v4056_v54, %v4112_v4 }
 0x222   :  { %v1197_v14 = vrot.slane %v1196_v56, 4  ;;  %v4058_v15 = vpop.f32.mrf.mxu1  ;;  %v4114_v16 = vpop.f32.mrf.mxu0 }
 0x223   :  { %v1043_v57 = vcombine.high %v1041_v9, %v1041_v9  ;;  %v1203_v17 = vsel %vm1195_vm2, %v1042_v11, -inf  ;;  %v1210_v18 = vsel %vm1195_vm2, %v1041_v9, -inf  ;;  %v1044_v19 = vcombine.high %v1012_v12, %v1012_v12 }
 0x224   :  { %v1198_v20 = vmax.f32 %v1196_v56, %v1197_v14  ;;  %v1204_v21 = vrot.slane %v1203_v17, 4  ;;  %v1211_v60 = vrot.slane %v1210_v18, 4  ;;  %v1051_v22 = vrot.slane %v1012_v12, %v5847_v49  ;;  %v5855_v23 = vpop.f32.mrf.mxu1  ;;  %v5857_v24 = vpop.f32.mrf.mxu0 }
 0x225   :  { %v1217_v25 = vsel %vm1195_vm2, %v1043_v57, -inf  ;;  %v1058_v61 = vrot.slane %v1044_v19, %v5847_v49  ;;  %v4059_v26 = vadd.f32 %v4058_v15, %v4057_v6  ;;  %v4115_v27 = vadd.f32 %v4114_v16, %v4113_v8 }
 0x226   :  { %v1199_v28 = vrot.slane %v1198_v20, 2  ;;  %v1205_v29 = vmax.f32 %v1203_v17, %v1204_v21  ;;  %v1212_v30 = vmax.f32 %v1210_v18, %v1211_v60  ;;  %v1218_v1 = vrot.slane %v1217_v25, 4  ;;  %v5863_v37 = vpop.f32.mrf.mxu1  ;;  %v5865_v39 = vpop.f32.mrf.mxu0 }
 0x227   :  { %v1059_v31 = vcombine.high %v1051_v22, %v1051_v22  ;;  %v1060_v32 = vcombine.high %v1058_v61, %v1058_v61  ;;  %v1224_v33 = vsel %vm1195_vm2, %v1051_v22, -inf  ;;  %v1238_v34 = vsel %vm1195_vm2, %v1058_v61, -inf }
 0x228   :  { %v1200_v35 = vmax.f32 %v1198_v20, %v1199_v28  ;;  %v1206_v2 = vrot.slane %v1205_v29, 2  ;;  %v1213_v36 = vrot.slane %v1212_v30, 2  ;;  %v1219_v7 = vmax.f32 %v1217_v25, %v1218_v1  ;;  %v4063_v55 = vpop.f32.mrf.mxu1  ;;  %v5869_v58 = vpop.f32.mrf.mxu0 }
 0x229   :  { %v1225_v10 = vrot.slane %v1224_v33, 4  ;;  %v1231_v13 = vsel %vm1195_vm2, %v1059_v31, -inf  ;;  %v1239_v40 = vrot.slane %v1238_v34, 4  ;;  %v1245_v41 = vsel %vm1195_vm2, %v1060_v32, -inf }
 0x22a   :  { %v1201_v42 = vrot.slane %v1200_v35, 1  ;;  %v1207_v43 = vmax.f32 %v1205_v29, %v1206_v2  ;;  %v1214_v44 = vmax.f32 %v1212_v30, %v1213_v36  ;;  %v1220_v45 = vrot.slane %v1219_v7, 2  ;;  %v4064_v19 = vpop.f32.mrf.mxu1  ;;  %v4120_v20 = vpop.f32.mrf.mxu0 }
 0x22b   :  { %v1226_v46 = vmax.f32 %v1224_v33, %v1225_v10  ;;  %v1232_v47 = vrot.slane %v1231_v13, 4  ;;  %v1240_v48 = vmax.f32 %v1238_v34, %v1239_v40  ;;  %v1246_v0 = vrot.slane %v1245_v41, 4 }
 0x22c   :  { %v1202_v50 = vmax.f32 %v1200_v35, %v1201_v42  ;;  %v1208_v51 = vrot.slane %v1207_v43, 1  ;;  %v1215_v52 = vrot.slane %v1214_v44, 1  ;;  %v1221_v53 = vmax.f32 %v1219_v7, %v1220_v45  ;;  %v4066_v2 = vpop.f32.mrf.mxu1  ;;  %v4122_v36 = vpop.f32.mrf.mxu0 }
 0x22d   :  { %v1227_v59 = vrot.slane %v1226_v46, 2  ;;  %v1233_v63 = vmax.f32 %v1231_v13, %v1232_v47  ;;  %v1241_v54 = vrot.slane %v1240_v48, 2  ;;  %v1247_v4 = vmax.f32 %v1245_v41, %v1246_v0 }
 0x22e   :  { %v1209_v6 = vmax.f32 %v1207_v43, %v1208_v51  ;;  %v1216_v8 = vmax.f32 %v1214_v44, %v1215_v52  ;;  %v1222_v9 = vrot.slane %v1221_v53, 1  ;;  %v1013_v11 = vmax.f32 %v4059_v26, %v4115_v27 }
 0x22f   :  { %v1228_v56 = vmax.f32 %v1226_v46, %v1227_v59  ;;  %v1234_v12 = vrot.slane %v1233_v63, 2  ;;  %v1242_v14 = vmax.f32 %v1240_v48, %v1241_v54  ;;  %v1248_v15 = vrot.slane %v1247_v4, 2  ;;  %v4123_v59 = vpop.f32.mrf.mxu0 }
 0x230   :  { %v1223_v16 = vmax.f32 %v1221_v53, %v1222_v9  ;;  %v1459_v57 = vsel %vm1458_vm3, %v1209_v6, %v1202_v50  ;;  %v1061_v17 = vcombine.high %v1013_v11, %v1013_v11  ;;  %v1068_v18 = vrot.slane %v1013_v11, %v5847_v49  ;;  %v4067_v53 = vpop.f32.mrf.mxu1  ;;  %v1786_v9 = vld [vmem:[#allocation9 + $0x2e8] sm:$0xff] }
 0x231   :  { %v1461_v21 = vsel %vm1460_vm4, %v1216_v8, %v1459_v57  ;;  %v1229_v60 = vrot.slane %v1228_v56, 1  ;;  %v1235_v22 = vmax.f32 %v1233_v63, %v1234_v12  ;;  %v1243_v25 = vrot.slane %v1242_v14, 1  ;;  %v1787_v63 = vld [vmem:[#allocation9 + $0x2f0] sm:$0xff]  ;;  %v1785_v12 = vld [vmem:[#allocation9 + $0x2e0] sm:$0xff] }
 0x232   :  { %v1249_v61 = vmax.f32 %v1247_v4, %v1248_v15  ;;  %v1463_v26 = vsel %vm1462_vm5, %v1223_v16, %v1461_v21  ;;  %v1075_v27 = vrot.slane %v1061_v17, %v5847_v49  ;;  %v1076_v28 = vcombine.high %v1068_v18, %v1068_v18  ;;  %v1784_v16 = vld [vmem:[#allocation9 + $0x2d8] sm:$0xff] }
 0x233   :  { %v1230_v29 = vmax.f32 %v1228_v56, %v1229_v60  ;;  %v1236_v30 = vrot.slane %v1235_v22, 1  ;;  %v1244_v1 = vmax.f32 %v1242_v14, %v1243_v25  ;;  %v1252_v31 = vsel %vm1195_vm2, %v1068_v18, -inf }
 0x234   :  { %v1250_v32 = vrot.slane %v1249_v61, 1  ;;  %v1077_v33 = vcombine.high %v1075_v27, %v1075_v27  ;;  %v1253_v34 = vrot.slane %v1252_v31, 4  ;;  %v1259_v35 = vsel %vm1195_vm2, %v1076_v28, -inf  ;;  %v1781_v28 = vld [vmem:[#allocation9 + $0x2c0] sm:$0xff] }
 0x235   :  { %v1237_v7 = vmax.f32 %v1235_v22, %v1236_v30  ;;  %v1465_v10 = vsel %vm1464_vm6, %v1230_v29, %v1463_v26  ;;  %v1260_v13 = vrot.slane %v1259_v35, 4  ;;  %v1266_v40 = vsel %vm1195_vm2, %v1075_v27, -inf  ;;  %v1782_v22 = vld [vmem:[#allocation9 + $0x2c8] sm:$0xff] }
 0x236   :  { %v1251_v41 = vmax.f32 %v1249_v61, %v1250_v32  ;;  %v1254_v42 = vmax.f32 %v1252_v31, %v1253_v34  ;;  %v1267_v43 = vrot.slane %v1266_v40, 4  ;;  %v1273_v44 = vsel %vm1195_vm2, %v1077_v33, -inf  ;;  %v1780_v32 = vld [vmem:[#allocation9 + $0x2b8] sm:$0xff] }
 0x237   :  { %v1467_v45 = vsel %vm1466_vm7, %v1237_v7, %v1465_v10  ;;  %v1261_v46 = vmax.f32 %v1259_v35, %v1260_v13  ;;  %v1274_v47 = vrot.slane %v1273_v44, 4  ;;  %v4062_v48 = vadd.f32 %v5863_v37, %v5855_v23 }
 0x238   :  { %v1469_v0 = vsel %vm1468_vm8, %v1244_v1, %v1467_v45  ;;  %v1255_v50 = vrot.slane %v1254_v42, 2  ;;  %v1268_v51 = vmax.f32 %v1266_v40, %v1267_v43  ;;  %v4118_v52 = vadd.f32 %v5865_v39, %v5857_v24 }
 0x239   :  { %v1471_v54 = vsel %vm1470_vm9, %v1251_v41, %v1469_v0  ;;  %v1262_v4 = vrot.slane %v1261_v46, 2  ;;  %v1275_v6 = vmax.f32 %v1273_v44, %v1274_v47  ;;  %v4065_v8 = vadd.f32 %v4064_v19, %v4063_v55  ;;  %v1783_v19 = vld [vmem:[#allocation9 + $0x2d0] sm:$0xff]  ;;  %v1777_v47 = vld [vmem:[#allocation9 + $0x2a0] sm:$0xff] }
 0x23a   :  { %1497 = vst [vmem:[#allocation3 + $0x1] sm:$0xff] %v1471_v54  ;;  %v1256_v11 = vmax.f32 %v1254_v42, %v1255_v50  ;;  %v1269_v56 = vrot.slane %v1268_v51, 2  ;;  %v1014_v23 = vmax.f32 %v4062_v48, %v4118_v52  ;;  %v4121_v37 = vadd.f32 %v4120_v20, %v5869_v58  ;;  %1639 = vmatmul.mubr.f32.vlgmr.msra.gmra.mxu1 %v1471_v54  ;;  %v1778_v42 = vld [vmem:[#allocation9 + $0x2a8] sm:$0xff]  ;;  %v1776_v52 = vld [vmem:[#allocation9 + $0x298] sm:$0xff] }
 0x23b   :  { %v1263_v14 = vmax.f32 %v1261_v46, %v1262_v4  ;;  %v1276_v15 = vrot.slane %v1275_v6, 2  ;;  %v4068_v24 = vadd.f32 %v4067_v53, %v4066_v2  ;;  %v4124_v39 = vadd.f32 %v4123_v59, %v4122_v36  ;;  %1790 = vmatpush1.msra.mxu1 %v1787_v63  ;;  %1644 = vmatprep.mubr.f32.mxu1 %v5842_v38  ;;  %v1779_v36 = vld [vmem:[#allocation9 + $0x2b0] sm:$0xff] }
 0x23c   :  { %v1257_v57 = vrot.slane %v1256_v11, 1  ;;  %v1270_v17 = vmax.f32 %v1268_v51, %v1269_v56  ;;  %v1078_v55 = vcombine.high %v1014_v23, %v1014_v23  ;;  %v1085_v18 = vrot.slane %v1014_v23, %v5847_v49  ;;  %1791 = vmatprep.subr.mxu1 %v1786_v9  ;;  %v1775_v4 = vld [vmem:[#allocation9 + $0x290] sm:$0xff]  ;;  %v1774_v56 = vld [vmem:[#allocation9 + $0x288] sm:$0xff] }
 0x23d   :  { %v1264_v21 = vrot.slane %v1263_v14, 1  ;;  %v1277_v60 = vmax.f32 %v1275_v6, %v1276_v15  ;;  %v1015_v58 = vmax.f32 %v4065_v8, %v4121_v37  ;;  %v5891_v20 = vmax.f32 %v4068_v24, %v4124_v39  ;;  %1792 = vmatpush1.msra.mxu1 %v1785_v12  ;;  %v1773_v15 = vld [vmem:[#allocation9 + $0x280] sm:$0xff] }
 0x23e   :  { %v1258_v25 = vmax.f32 %v1256_v11, %v1257_v57  ;;  %v1271_v61 = vrot.slane %v1270_v17, 1  ;;  %v1092_v26 = vrot.slane %v1078_v55, %v5847_v49  ;;  %v1093_v27 = vcombine.high %v1085_v18, %v1085_v18  ;;  %1793 = vmatprep.subr.mxu1 %v1784_v16  ;;  %v1772_v55 = vld [vmem:[#allocation9 + $0x278] sm:$0xff] }
 0x23f   :  { %v1265_v29 = vmax.f32 %v1263_v14, %v1264_v21  ;;  %v1278_v30 = vrot.slane %v1277_v60, 1  ;;  %v1280_v1 = vsel %vm1195_vm2, %v1085_v18, -inf  ;;  %v1095_v31 = vcombine.high %v1015_v58, %v1015_v58  ;;  %1794 = vmatpush1.msra.mxu1 %v1783_v19 }
 0x240   :  { %v1272_v33 = vmax.f32 %v1270_v17, %v1271_v61  ;;  %v1094_v34 = vcombine.high %v1092_v26, %v1092_v26  ;;  %v1281_v35 = vrot.slane %v1280_v1, 4  ;;  %v1287_v2 = vsel %vm1195_vm2, %v1093_v27, -inf  ;;  %1795 = vmatprep.subr.mxu1 %v1782_v22  ;;  %v5909_v17 = vpop.f32.mrf.mxu1  ;;  %v1771_v22 = vld [vmem:[#allocation9 + $0x270] sm:$0xff] }
 0x241   :  { %v1279_v7 = vmax.f32 %v1277_v60, %v1278_v30  ;;  %v1472_v10 = vsel %vm1458_vm3, %v1265_v29, %v1258_v25  ;;  %v1288_v13 = vrot.slane %v1287_v2, 4  ;;  %v1294_v40 = vsel %vm1195_vm2, %v1092_v26, -inf  ;;  %v1501_v41 = vld [vmem:[#allocation3] sm:$0xff]  ;;  %1796 = vmatpush1.msra.mxu1 %v1781_v28  ;;  %v1770_v28 = vld [vmem:[#allocation9 + $0x268] sm:$0xff] }
 0x242   :  { %v1473_v43 = vsel %vm1460_vm4, %v1272_v33, %v1472_v10  ;;  %v1282_v44 = vmax.f32 %v1280_v1, %v1281_v35  ;;  %v1295_v45 = vrot.slane %v1294_v40, 4  ;;  %v1301_v46 = vsel %vm1195_vm2, %v1094_v34, -inf  ;;  %1728 = vmatmul.mubr.f32.vlgmr.msra.gmra.mxu0 %v1501_v41  ;;  %1797 = vmatprep.subr.mxu1 %v1780_v32  ;;  %v1769_v32 = vld [vmem:[#allocation9 + $0x260] sm:$0xff] }
 0x243   :  { %v1289_v48 = vmax.f32 %v1287_v2, %v1288_v13  ;;  %v1302_v0 = vrot.slane %v1301_v46, 4  ;;  %v1474_v50 = vsel %vm1462_vm5, %v1279_v7, %v1473_v43  ;;  %v1102_v51 = vrot.slane %v1015_v58, %v5847_v49  ;;  %1733 = vmatprep.mubr.f32.mxu0 %v5842_v38  ;;  %1798 = vmatpush1.msra.mxu1 %v1779_v36  ;;  %v5911_v58 = vpop.f32.mrf.mxu0  ;;  %v4070_v36 = vpop.f32.mrf.mxu1  ;;  %v1768_v7 = vld [vmem:[#allocation9 + $0x258] sm:$0xff]  ;;  %v1767_v43 = vld [vmem:[#allocation9 + $0x250] sm:$0xff] }
 0x244   :  { %v1283_v53 = vrot.slane %v1282_v44, 2  ;;  %v1296_v59 = vmax.f32 %v1294_v40, %v1295_v45  ;;  %v1109_v63 = vrot.slane %v1095_v31, %v5847_v49  ;;  %v1112_v54 = vcombine.high %v5891_v20, %v5891_v20  ;;  %1799 = vmatprep.subr.mxu1 %v1778_v42 }
 0x245   :  { %v1290_v6 = vrot.slane %v1289_v48, 2  ;;  %v1303_v8 = vmax.f32 %v1301_v46, %v1302_v0  ;;  %v1110_v9 = vcombine.high %v1102_v51, %v1102_v51  ;;  %v1308_v11 = vsel %vm1195_vm2, %v1102_v51, -inf  ;;  %1800 = vmatpush1.msra.mxu1 %v1777_v47  ;;  %v4126_v42 = vpop.f32.mrf.mxu0 }
 0x246   :  { %v1284_v23 = vmax.f32 %v1282_v44, %v1283_v53  ;;  %v1297_v37 = vrot.slane %v1296_v59, 2  ;;  %v1111_v12 = vcombine.high %v1109_v63, %v1109_v63  ;;  %v1309_v14 = vrot.slane %v1308_v11, 4  ;;  %1801 = vmatprep.subr.mxu1 %v1776_v52 }
 0x247   :  { %v1291_v24 = vmax.f32 %v1289_v48, %v1290_v6  ;;  %v1304_v39 = vrot.slane %v1303_v8, 2  ;;  %v1315_v16 = vsel %vm1195_vm2, %v1110_v9, -inf  ;;  %v1322_v57 = vsel %vm1195_vm2, %v1109_v63, -inf  ;;  %1802 = vmatpush1.msra.mxu1 %v1775_v4  ;;  %v1766_v48 = vld [vmem:[#allocation9 + $0x248] sm:$0xff]  ;;  %v1764_v9 = vld [vmem:[#allocation9 + $0x238] sm:$0xff] }
 0x248   :  { %v1285_v18 = vrot.slane %v1284_v23, 1  ;;  %v1298_v19 = vmax.f32 %v1296_v59, %v1297_v37  ;;  %v1310_v21 = vmax.f32 %v1308_v11, %v1309_v14  ;;  %v1316_v60 = vrot.slane %v1315_v16, 4  ;;  %1803 = vmatprep.subr.mxu1 %v1774_v56  ;;  %v1763_v14 = vld [vmem:[#allocation9 + $0x230] sm:$0xff] }
 0x249   :  { %v1292_v25 = vrot.slane %v1291_v24, 1  ;;  %v1305_v61 = vmax.f32 %v1303_v8, %v1304_v39  ;;  %v1323_v26 = vrot.slane %v1322_v57, 4  ;;  %v1329_v27 = vsel %vm1195_vm2, %v1111_v12, -inf  ;;  %1804 = vmatpush1.msra.mxu1 %v1773_v15  ;;  %v4072_v8 = vpop.f32.mrf.mxu1  ;;  %v4128_v12 = vpop.f32.mrf.mxu0 }
 0x24a   :  { %v1286_v29 = vmax.f32 %v1284_v23, %v1285_v18  ;;  %v1299_v30 = vrot.slane %v1298_v19, 1  ;;  %v1311_v1 = vrot.slane %v1310_v21, 2  ;;  %v1317_v31 = vmax.f32 %v1315_v16, %v1316_v60  ;;  %1805 = vmatprep.subr.mxu1 %v1772_v55 }
 0x24b   :  { %v1293_v33 = vmax.f32 %v1291_v24, %v1292_v25  ;;  %v1306_v34 = vrot.slane %v1305_v61, 1  ;;  %v1324_v35 = vmax.f32 %v1322_v57, %v1323_v26  ;;  %v1330_v2 = vrot.slane %v1329_v27, 4  ;;  %1806 = vmatpush1.msra.mxu1 %v1771_v22  ;;  %v1760_v26 = vld [vmem:[#allocation9 + $0x218] sm:$0xff] }
 0x24c   :  { %v1300_v10 = vmax.f32 %v1298_v19, %v1299_v30  ;;  %v1475_v13 = vsel %vm1464_vm6, %v1286_v29, %v1474_v50  ;;  %v1312_v40 = vmax.f32 %v1310_v21, %v1311_v1  ;;  %v1318_v41 = vrot.slane %v1317_v31, 2  ;;  %1807 = vmatprep.subr.mxu1 %v1770_v28  ;;  %v1765_v50 = vld [vmem:[#allocation9 + $0x240] sm:$0xff]  ;;  %v4129_v1 = vpop.f32.mrf.mxu0 }
 0x24d   :  { %v1307_v44 = vmax.f32 %v1305_v61, %v1306_v34  ;;  %v1476_v45 = vsel %vm1466_vm7, %v1293_v33, %v1475_v13  ;;  %v1325_v46 = vrot.slane %v1324_v35, 2  ;;  %v1331_v47 = vmax.f32 %v1329_v27, %v1330_v2  ;;  %1808 = vmatpush1.msra.mxu1 %v1769_v32  ;;  %v1761_v19 = vld [vmem:[#allocation9 + $0x220] sm:$0xff]  ;;  %v4073_v61 = vpop.f32.mrf.mxu1 }
 0x24e   :  { %v1477_v0 = vsel %vm1468_vm8, %v1300_v10, %v1476_v45  ;;  %v1313_v51 = vrot.slane %v1312_v40, 1  ;;  %v1319_v52 = vmax.f32 %v1317_v31, %v1318_v41  ;;  %v1119_v53 = vrot.slane %v5891_v20, %v5847_v49  ;;  %1809 = vmatprep.subr.mxu1 %v1768_v7  ;;  %v1762_v20 = vld [vmem:[#allocation9 + $0x228] sm:$0xff]  ;;  %v1759_v31 = vld [vmem:[#allocation9 + $0x210] sm:$0xff]  ;;  %v1757_v13 = vld [vmem:[#allocation9 + $0x200] sm:$0xff] }
 0x24f   :  { %v1478_v59 = vsel %vm1470_vm9, %v1307_v44, %v1477_v0  ;;  %v1326_v63 = vmax.f32 %v1324_v35, %v1325_v46  ;;  %v1332_v4 = vrot.slane %v1331_v47, 2  ;;  %v1126_v6 = vrot.slane %v1112_v54, %v5847_v49  ;;  %1810 = vmatpush1.msra.mxu1 %v1767_v43  ;;  %v1758_v35 = vld [vmem:[#allocation9 + $0x208] sm:$0xff] }
 0x250   :  { %1498 = vst [vmem:[#allocation3 + $0x9] sm:$0xff] %v1478_v59  ;;  %v1314_v11 = vmax.f32 %v1312_v40, %v1313_v51  ;;  %v1320_v56 = vrot.slane %v1319_v52, 1  ;;  %v1127_v23 = vcombine.high %v1119_v53, %v1119_v53  ;;  %v1336_v37 = vsel %vm1195_vm2, %v1119_v53, -inf  ;;  %1645 = vmatmul.mubr.f32.gmra.mxu1 %v1478_v59  ;;  %1811 = vmatprep.subr.mxu1 %v1766_v48 }
 0x251   :  { %v1327_v15 = vrot.slane %v1326_v63, 1  ;;  %v1333_v24 = vmax.f32 %v1331_v47, %v1332_v4  ;;  %v1128_v39 = vcombine.high %v1126_v6, %v1126_v6  ;;  %v1337_v16 = vrot.slane %v1336_v37, 4  ;;  %1650 = vmatprep.mubr.f32.mxu1 %v5842_v38  ;;  %1812 = vmatpush1.msra.mxu1 %v1765_v50 }
 0x252   :  { %v1321_v54 = vmax.f32 %v1319_v52, %v1320_v56  ;;  %v1343_v57 = vsel %vm1195_vm2, %v1127_v23, -inf  ;;  %v1350_v55 = vsel %vm1195_vm2, %v1126_v6, -inf  ;;  %v4071_v18 = vadd.f32 %v4070_v36, %v5909_v17  ;;  %1813 = vmatprep.subr.mxu1 %v1764_v9 }
 0x253   :  { %v1328_v21 = vmax.f32 %v1326_v63, %v1327_v15  ;;  %v1334_v60 = vrot.slane %v1333_v24, 1  ;;  %v1338_v22 = vmax.f32 %v1336_v37, %v1337_v16  ;;  %v1344_v25 = vrot.slane %v1343_v57, 4  ;;  %1814 = vmatpush1.msra.mxu1 %v1763_v14 }
 0x254   :  { %v1479_v27 = vsel %vm1458_vm3, %v1321_v54, %v1314_v11  ;;  %v1351_v28 = vrot.slane %v1350_v55, 4  ;;  %v1357_v29 = vsel %vm1195_vm2, %v1128_v39, -inf  ;;  %v4127_v30 = vadd.f32 %v4126_v42, %v5911_v58  ;;  %1815 = vmatprep.subr.mxu1 %v1762_v20 }
 0x255   :  { %v1335_v17 = vmax.f32 %v1333_v24, %v1334_v60  ;;  %v1480_v32 = vsel %vm1460_vm4, %v1328_v21, %v1479_v27  ;;  %v1339_v33 = vrot.slane %v1338_v22, 2  ;;  %v1345_v34 = vmax.f32 %v1343_v57, %v1344_v25  ;;  %1816 = vmatpush1.msra.mxu1 %v1761_v19 }
 0x256   :  { %v1352_v2 = vmax.f32 %v1350_v55, %v1351_v28  ;;  %v1358_v36 = vrot.slane %v1357_v29, 4  ;;  %v1017_v7 = vmax.f32 %v4071_v18, %v4127_v30  ;;  %v4074_v10 = vadd.f32 %v4073_v61, %v4072_v8  ;;  %1817 = vmatprep.subr.mxu1 %v1760_v26 }
 0x257   :  { %v1340_v40 = vmax.f32 %v1338_v22, %v1339_v33  ;;  %v1346_v41 = vrot.slane %v1345_v34, 2  ;;  %v4130_v43 = vadd.f32 %v4129_v1, %v4128_v12  ;;  %v1502_v58 = vld [vmem:[#allocation3 + $0x8] sm:$0xff]  ;;  %1818 = vmatpush1.msra.mxu1 %v1759_v31  ;;  %v1481_v0 = vsel %vm1462_vm5, %v1335_v17, %v1480_v32 }
 0x258   :  { %v1353_v42 = vrot.slane %v1352_v2, 2  ;;  %v1359_v44 = vmax.f32 %v1357_v29, %v1358_v36  ;;  %v1129_v45 = vcombine.high %v1017_v7, %v1017_v7  ;;  %v1136_v46 = vrot.slane %v1017_v7, %v5847_v49  ;;  %1734 = vmatmul.mubr.f32.gmra.mxu0 %v1502_v58  ;;  %1819 = vmatprep.subr.mxu1 %v1758_v35 }
 0x259   :  { %v1341_v47 = vrot.slane %v1340_v40, 1  ;;  %v1347_v48 = vmax.f32 %v1345_v34, %v1346_v41  ;;  %v1018_v51 = vmax.f32 %v4074_v10, %v4130_v43  ;;  %1739 = vmatprep.mubr.f32.mxu0 %v5842_v38  ;;  %1820 = vmatpush1.msra.mxu1 %v1757_v13 }
 0x25a   :  { %v1354_v52 = vmax.f32 %v1352_v2, %v1353_v42  ;;  %v1360_v53 = vrot.slane %v1359_v44, 2  ;;  %v1143_v50 = vrot.slane %v1129_v45, %v5847_v49  ;;  %v1144_v59 = vcombine.high %v1136_v46, %v1136_v46 }
 0x25b   :  { %v1342_v63 = vmax.f32 %v1340_v40, %v1341_v47  ;;  %v1348_v4 = vrot.slane %v1347_v48, 1  ;;  %v1364_v6 = vsel %vm1195_vm2, %v1136_v46, -inf  ;;  %v1146_v8 = vcombine.high %v1018_v51, %v1018_v51 }
 0x25c   :  { %v1355_v9 = vrot.slane %v1354_v52, 1  ;;  %v1361_v11 = vmax.f32 %v1359_v44, %v1360_v53  ;;  %v1145_v56 = vcombine.high %v1143_v50, %v1143_v50  ;;  %v1365_v23 = vrot.slane %v1364_v6, 4 }
 0x25d   :  { %v1349_v37 = vmax.f32 %v1347_v48, %v1348_v4  ;;  %v1482_v12 = vsel %vm1464_vm6, %v1342_v63, %v1481_v0  ;;  %v1371_v14 = vsel %vm1195_vm2, %v1144_v59, -inf  ;;  %v1378_v15 = vsel %vm1195_vm2, %v1143_v50, -inf }
 0x25e   :  { %v1356_v24 = vmax.f32 %v1354_v52, %v1355_v9  ;;  %v1362_v39 = vrot.slane %v1361_v11, 1  ;;  %v1366_v16 = vmax.f32 %v1364_v6, %v1365_v23  ;;  %v1372_v20 = vrot.slane %v1371_v14, 4 }
 0x25f   :  { %v1483_v54 = vsel %vm1466_vm7, %v1349_v37, %v1482_v12  ;;  %v1379_v57 = vrot.slane %v1378_v15, 4  ;;  %v1385_v55 = vsel %vm1195_vm2, %v1145_v56, -inf  ;;  %v1153_v18 = vrot.slane %v1018_v51, %v5847_v49 }
 0x260   :  { %v1363_v19 = vmax.f32 %v1361_v11, %v1362_v39  ;;  %v1484_v21 = vsel %vm1468_vm8, %v1356_v24, %v1483_v54  ;;  %v1367_v60 = vrot.slane %v1366_v16, 2  ;;  %v1373_v22 = vmax.f32 %v1371_v14, %v1372_v20 }
 0x261   :  { %v1380_v25 = vmax.f32 %v1378_v15, %v1379_v57  ;;  %v1386_v61 = vrot.slane %v1385_v55, 4  ;;  %v1160_v26 = vrot.slane %v1146_v8, %v5847_v49  ;;  %v1161_v27 = vcombine.high %v1153_v18, %v1153_v18 }
 0x262   :  { %v1485_v28 = vsel %vm1470_vm9, %v1363_v19, %v1484_v21  ;;  %v1368_v29 = vmax.f32 %v1366_v16, %v1367_v60  ;;  %v1374_v30 = vrot.slane %v1373_v22, 2  ;;  %v1392_v1 = vsel %vm1195_vm2, %v1153_v18, -inf }
 0x263   :  { %1499 = vst [vmem:[#allocation3 + $0x19] sm:$0xff] %v1485_v28  ;;  %v1381_v31 = vrot.slane %v1380_v25, 2  ;;  %v1387_v17 = vmax.f32 %v1385_v55, %v1386_v61  ;;  %v1162_v32 = vcombine.high %v1160_v26, %v1160_v26  ;;  %v1393_v33 = vrot.slane %v1392_v1, 4  ;;  %1651 = vmatmul.mubr.f32.gmra.mxu1 %v1485_v28  ;;  %v1753_v61 = vld [vmem:[#allocation3 + $0xa] sm:$0xff] }
 0x264   :  { %v1369_v34 = vrot.slane %v1368_v29, 1  ;;  %v1375_v35 = vmax.f32 %v1373_v22, %v1374_v30  ;;  %v1399_v2 = vsel %vm1195_vm2, %v1161_v27, -inf  ;;  %v1406_v36 = vsel %vm1195_vm2, %v1160_v26, -inf  ;;  %1656 = vmatprep.mubr.f32.mxu1 %v5842_v38  ;;  %v1752_v22 = vld [vmem:[#allocation3 + $0x2] sm:$0xff] }
 0x265   :  { %v1382_v7 = vmax.f32 %v1380_v25, %v1381_v31  ;;  %v1388_v10 = vrot.slane %v1387_v17, 2  ;;  %v1394_v13 = vmax.f32 %v1392_v1, %v1393_v33  ;;  %v1400_v40 = vrot.slane %v1399_v2, 4  ;;  %v1945_v28 = vld [vmem:[#allocation10 + $0xf8] sm:$0xff]  ;;  %v1944_v31 = vld [vmem:[#allocation10 + $0xf0] sm:$0xff] }
 0x266   :  { %v1376_v41 = vrot.slane %v1375_v35, 1  ;;  %v1407_v43 = vrot.slane %v1406_v36, 4  ;;  %v1413_v58 = vsel %vm1195_vm2, %v1162_v32, -inf  ;;  %v1370_v47 = vmax.f32 %v1368_v29, %v1369_v34  ;;  %v2062_v29 = vld [vmem:[#allocation12 + $0xf8] sm:$0xff]  ;;  %4131 = vmatprep.subr.mxu0 %v1945_v28  ;;  %v1928_v32 = vld [vmem:[#allocation10 + $0x70] sm:$0xff]  ;;  %v1943_v34 = vld [vmem:[#allocation10 + $0xe8] sm:$0xff] }
 0x267   :  { %v1383_v42 = vrot.slane %v1382_v7, 1  ;;  %v1389_v44 = vmax.f32 %v1387_v17, %v1388_v10  ;;  %v1395_v45 = vrot.slane %v1394_v13, 2  ;;  %v1401_v46 = vmax.f32 %v1399_v2, %v1400_v40  ;;  %4175 = vmatprep.subr.mxu1 %v2062_v29  ;;  %v1929_v30 = vld [vmem:[#allocation10 + $0x78] sm:$0xff]  ;;  %v2061_v17 = vld [vmem:[#allocation12 + $0xf0] sm:$0xff]  ;;  %v1927_v2 = vld [vmem:[#allocation10 + $0x68] sm:$0xff] }
 0x268   :  { %v1377_v48 = vmax.f32 %v1375_v35, %v1376_v41  ;;  %v1408_v0 = vmax.f32 %v1406_v36, %v1407_v43  ;;  %v1414_v51 = vrot.slane %v1413_v58, 4  ;;  %v2046_v1 = vld [vmem:[#allocation12 + $0x78] sm:$0xff]  ;;  %4132 = vmatpush3.msra.mxu0 %v1929_v30  ;;  %v2045_v33 = vld [vmem:[#allocation12 + $0x70] sm:$0xff]  ;;  %v2060_v35 = vld [vmem:[#allocation12 + $0xe8] sm:$0xff] }
 0x269   :  { %v1384_v52 = vmax.f32 %v1382_v7, %v1383_v42  ;;  %v1390_v53 = vrot.slane %v1389_v44, 1  ;;  %v1396_v50 = vmax.f32 %v1394_v13, %v1395_v45  ;;  %v1402_v59 = vrot.slane %v1401_v46, 2  ;;  %4133 = vmatprep.subr.mxu0 %v1944_v31  ;;  %v2044_v36 = vld [vmem:[#allocation12 + $0x68] sm:$0xff]  ;;  %v1942_v7 = vld [vmem:[#allocation10 + $0xe0] sm:$0xff]  ;;  %v1941_v41 = vld [vmem:[#allocation10 + $0xd8] sm:$0xff] }
 0x26a   :  { %v1486_v63 = vsel %vm1458_vm3, %v1377_v48, %v1370_v47  ;;  %v1409_v4 = vrot.slane %v1408_v0, 2  ;;  %v1415_v6 = vmax.f32 %v1413_v58, %v1414_v51  ;;  %v1503_v8 = vld [vmem:[#allocation3 + $0x18] sm:$0xff]  ;;  %4134 = vmatpush3.msra.mxu0 %v1928_v32  ;;  %v2059_v10 = vld [vmem:[#allocation12 + $0xe0] sm:$0xff]  ;;  %v2058_v43 = vld [vmem:[#allocation12 + $0xd8] sm:$0xff] }
 0x26b   :  { %v1391_v9 = vmax.f32 %v1389_v44, %v1390_v53  ;;  %v1487_v11 = vsel %vm1460_vm4, %v1384_v52, %v1486_v63  ;;  %v1397_v56 = vrot.slane %v1396_v50, 1  ;;  %v1403_v23 = vmax.f32 %v1401_v46, %v1402_v59  ;;  %1740 = vmatmul.mubr.f32.gmra.mxu0 %v1503_v8  ;;  %4135 = vmatprep.subr.mxu0 %v1943_v34  ;;  %v1926_v13 = vld [vmem:[#allocation10 + $0x60] sm:$0xff]  ;;  %v1925_v58 = vld [vmem:[#allocation10 + $0x58] sm:$0xff]  ;;  %v1940_v44 = vld [vmem:[#allocation10 + $0xd0] sm:$0xff] }
 0x26c   :  { %v1410_v37 = vmax.f32 %v1408_v0, %v1409_v4  ;;  %v1416_v12 = vrot.slane %v1415_v6, 2  ;;  %1745 = vmatprep.mubr.f32.mxu0 %v5842_v38  ;;  %4136 = vmatpush3.msra.mxu0 %v1927_v2  ;;  %v2043_v40 = vld [vmem:[#allocation12 + $0x60] sm:$0xff]  ;;  %v2042_v42 = vld [vmem:[#allocation12 + $0x58] sm:$0xff]  ;;  %v2057_v45 = vld [vmem:[#allocation12 + $0xd0] sm:$0xff] }
 0x26d   :  { %v1398_v14 = vmax.f32 %v1396_v50, %v1397_v56  ;;  %v1404_v15 = vrot.slane %v1403_v23, 1  ;;  %v1488_v24 = vsel %vm1462_vm5, %v1391_v9, %v1487_v11  ;;  %4137 = vmatprep.subr.mxu0 %v1942_v7  ;;  %v1924_v46 = vld [vmem:[#allocation10 + $0x50] sm:$0xff]  ;;  %v1939_v48 = vld [vmem:[#allocation10 + $0xc8] sm:$0xff]  ;;  %v1938_v53 = vld [vmem:[#allocation10 + $0xc0] sm:$0xff] }
 0x26e   :  { %v1411_v39 = vrot.slane %v1410_v37, 1  ;;  %v1417_v16 = vmax.f32 %v1415_v6, %v1416_v12  ;;  %4138 = vmatpush3.msra.mxu0 %v1926_v13  ;;  %v2041_v47 = vld [vmem:[#allocation12 + $0x50] sm:$0xff]  ;;  %v2056_v0 = vld [vmem:[#allocation12 + $0xc8] sm:$0xff]  ;;  %v2055_v50 = vld [vmem:[#allocation12 + $0xc0] sm:$0xff] }
 0x26f   :  { %v1405_v20 = vmax.f32 %v1403_v23, %v1404_v15  ;;  %v1489_v54 = vsel %vm1464_vm6, %v1398_v14, %v1488_v24  ;;  %4139 = vmatprep.subr.mxu0 %v1941_v41  ;;  %v1923_v51 = vld [vmem:[#allocation10 + $0x48] sm:$0xff]  ;;  %v1922_v59 = vld [vmem:[#allocation10 + $0x40] sm:$0xff]  ;;  %v1937_v4 = vld [vmem:[#allocation10 + $0xb8] sm:$0xff] }
 0x270   :  { %v1412_v57 = vmax.f32 %v1410_v37, %v1411_v39  ;;  %v1418_v55 = vrot.slane %v1417_v16, 1  ;;  %4140 = vmatpush3.msra.mxu0 %v1925_v58  ;;  %v2040_v52 = vld [vmem:[#allocation12 + $0x48] sm:$0xff]  ;;  %v2039_v63 = vld [vmem:[#allocation12 + $0x40] sm:$0xff]  ;;  %v2054_v6 = vld [vmem:[#allocation12 + $0xb8] sm:$0xff] }
 0x271   :  { %v1490_v18 = vsel %vm1466_vm7, %v1405_v20, %v1489_v54  ;;  %4141 = vmatprep.subr.mxu0 %v1940_v44  ;;  %v1921_v8 = vld [vmem:[#allocation10 + $0x38] sm:$0xff]  ;;  %v1936_v11 = vld [vmem:[#allocation10 + $0xb0] sm:$0xff]  ;;  %v1935_v12 = vld [vmem:[#allocation10 + $0xa8] sm:$0xff] }
 0x272   :  { %v1419_v19 = vmax.f32 %v1417_v16, %v1418_v55  ;;  %v1491_v21 = vsel %vm1468_vm8, %v1412_v57, %v1490_v18  ;;  %4142 = vmatpush3.msra.mxu0 %v1924_v46  ;;  %v2038_v9 = vld [vmem:[#allocation12 + $0x38] sm:$0xff]  ;;  %v2053_v56 = vld [vmem:[#allocation12 + $0xb0] sm:$0xff]  ;;  %v2052_v14 = vld [vmem:[#allocation12 + $0xa8] sm:$0xff] }
 0x273   :  { %4143 = vmatprep.subr.mxu0 %v1939_v48  ;;  %v1920_v23 = vld [vmem:[#allocation10 + $0x30] sm:$0xff]  ;;  %v1919_v15 = vld [vmem:[#allocation10 + $0x28] sm:$0xff]  ;;  %v1934_v39 = vld [vmem:[#allocation10 + $0xa0] sm:$0xff] }
 0x274   :  { %v1492_v60 = vsel %vm1470_vm9, %v1419_v19, %v1491_v21  ;;  %4144 = vmatpush3.msra.mxu0 %v1923_v51  ;;  %v2037_v37 = vld [vmem:[#allocation12 + $0x30] sm:$0xff]  ;;  %v2036_v24 = vld [vmem:[#allocation12 + $0x28] sm:$0xff]  ;;  %v2051_v16 = vld [vmem:[#allocation12 + $0xa0] sm:$0xff] }
 0x275   :  { %1500 = vst [vmem:[#allocation3 + $0x21] sm:$0xff] %v1492_v60  ;;  %1657 = vmatmul.mubr.f32.gmra.mxu1 %v1492_v60  ;;  %4145 = vmatprep.subr.mxu0 %v1938_v53  ;;  %v1918_v20 = vld [vmem:[#allocation10 + $0x20] sm:$0xff]  ;;  %v1933_v57 = vld [vmem:[#allocation10 + $0x98] sm:$0xff]  ;;  %v1932_v21 = vld [vmem:[#allocation10 + $0x90] sm:$0xff] }
 0x276   :  { %1853 = vmatprep.mubr.f32.mxu1 %v5842_v38  ;;  %4146 = vmatpush3.msra.mxu0 %v1922_v59  ;;  %v2035_v54 = vld [vmem:[#allocation12 + $0x20] sm:$0xff]  ;;  %v2050_v55 = vld [vmem:[#allocation12 + $0x98] sm:$0xff]  ;;  %v2049_v60 = vld [vmem:[#allocation12 + $0x90] sm:$0xff] }
 0x277   :  { %4147 = vmatprep.subr.mxu0 %v1937_v4  ;;  %v1917_v18 = vld [vmem:[#allocation10 + $0x18] sm:$0xff]  ;;  %v2032_v28 = vld [vmem:[#allocation12 + $0x8] sm:$0xff]  ;;  %v1930_v29 = vld [vmem:[#allocation10 + $0x80] sm:$0xff] }
 0x278   :  { %4148 = vmatpush3.msra.mxu0 %v1921_v8  ;;  %v2034_v19 = vld [vmem:[#allocation12 + $0x18] sm:$0xff]  ;;  %v2047_v30 = vld [vmem:[#allocation12 + $0x80] sm:$0xff] }
 0x279   :  { %1854 = vmatmul.mubr.f32.vlgmr.msra.gmra.mxu1 %v1752_v22  ;;  %4149 = vmatprep.subr.mxu0 %v1936_v11  ;;  %v1916_v22 = vld [vmem:[#allocation10 + $0x10] sm:$0xff]  ;;  %v2031_v31 = vld [vmem:[#allocation12] sm:$0xff] }
 0x27a   :  { %1859 = vmatprep.mubr.f32.mxu1 %v5842_v38  ;;  %4176 = vmatpush3.msra.mxu1 %v2046_v1  ;;  %v1914_v1 = vld [vmem:[#allocation10] sm:$0xff] }
 0x27b   :  { %4177 = vmatprep.subr.mxu1 %v2061_v17  ;;  %4150 = vmatpush3.msra.mxu0 %v1920_v23 }
 0x27c   :  { %v1504_v25 = vld [vmem:[#allocation3 + $0x20] sm:$0xff]  ;;  %4178 = vmatpush3.msra.mxu1 %v2045_v33  ;;  %4151 = vmatprep.subr.mxu0 %v1935_v12 }
 0x27d   :  { %1746 = vmatmul.mubr.f32.gmra.mxu0 %v1504_v25  ;;  %1860 = vmatmul.mubr.f32.gmra.mxu1 %v1753_v61  ;;  %v1754_v26 = vld [vmem:[#allocation3 + $0x1a] sm:$0xff]  ;;  %v1755_v27 = vld [vmem:[#allocation3 + $0x22] sm:$0xff] }
 0x27e   :  { %1865 = vmatprep.mubr.f32.mxu1 %v5842_v38  ;;  %4179 = vmatprep.subr.mxu1 %v2060_v35  ;;  %v2033_v25 = vld [vmem:[#allocation12 + $0x10] sm:$0xff]  ;;  %v1931_v61 = vld [vmem:[#allocation10 + $0x88] sm:$0xff] }
 0x27f   :  { %4180 = vmatpush3.msra.mxu1 %v2044_v36  ;;  %4152 = vmatpush3.msra.mxu0 %v1919_v15 }
 0x280   :  { %4181 = vmatprep.subr.mxu1 %v2059_v10  ;;  %4153 = vmatprep.subr.mxu0 %v1934_v39 }
 0x281   :  { %1866 = vmatmul.mubr.f32.gmra.mxu1 %v1754_v26  ;;  %4154 = vmatpush3.msra.mxu0 %v1918_v20  ;;  %v2048_v26 = vld [vmem:[#allocation12 + $0x88] sm:$0xff] }
 0x282   :  { %1871 = vmatprep.mubr.f32.mxu1 %v5842_v38  ;;  %4182 = vmatpush3.msra.mxu1 %v2043_v40  ;;  %v1886_v40 = vld [vmem:[%s6688_s6] sm:$0x3] }
 0x283   :  { %4183 = vmatprep.subr.mxu1 %v2058_v43  ;;  %4155 = vmatprep.subr.mxu0 %v1933_v57  ;;  %v1895_v48 = vrot.slane %v1886_v40, %v701_v5 }
 0x284   :  { %4184 = vmatpush3.msra.mxu1 %v2042_v42  ;;  %4156 = vmatpush3.msra.mxu0 %v1917_v18 }
 0x285   :  { %1872 = vmatmul.mubr.f32.gmra.mxu1 %v1755_v27  ;;  %4185 = vmatprep.subr.mxu1 %v2057_v45  ;;  %v1915_v27 = vld [vmem:[#allocation10 + $0x8] sm:$0xff]  ;;  %v1891_v45 = vrot.slane %v1886_v40, %v697_v3 }
 0x286   :  { %4186 = vmatpush3.msra.mxu1 %v2041_v47  ;;  %4157 = vmatprep.subr.mxu0 %v1932_v21  ;;  %v2366_v21 = vld [vmem:[#allocation13 + $0x70] sm:$0xff]  ;;  %v5992_v40 = vld [vmem:[#allocation13 + $0xc8] sm:$0xff] }
 0x287   :  { %4187 = vmatprep.subr.mxu1 %v2056_v0  ;;  %4158 = vmatpush3.msra.mxu0 %v1916_v22 }
 0x288   :  { %4188 = vmatpush3.msra.mxu1 %v2040_v52  ;;  %4159 = vmatprep.subr.mxu0 %v1931_v61 }
 0x289   :  { %4189 = vmatprep.subr.mxu1 %v2055_v50  ;;  %4160 = vmatpush3.msra.mxu0 %v1915_v27 }
 0x28a   :  { %4190 = vmatpush3.msra.mxu1 %v2039_v63  ;;  %4161 = vmatprep.subr.mxu0 %v1930_v29 }
 0x28b   :  { %4191 = vmatprep.subr.mxu1 %v2054_v6  ;;  %4162 = vmatpush3.msra.mxu0 %v1914_v1  ;;  %v2365_v1 = vld [vmem:[#allocation13 + $0x68] sm:$0xff] }
 0x28c   :  { %4192 = vmatpush3.msra.mxu1 %v2038_v9  ;;  %4525 = vmatprep.subr.mxu0 %v5842_v38 }
 0x28d   :  { %4193 = vmatprep.subr.mxu1 %v2053_v56 }
 0x28e   :  { %4194 = vmatpush3.msra.mxu1 %v2037_v37 }
 0x28f   :  { %4195 = vmatprep.subr.mxu1 %v2052_v14  ;;  %v2367_v14 = vld [vmem:[#allocation13 + $0x78] sm:$0xff] }
 0x290   :  { %4196 = vmatpush3.msra.mxu1 %v2036_v24 }
 0x291   :  { %4197 = vmatprep.subr.mxu1 %v2051_v16 }
 0x292   :  { %4198 = vmatpush3.msra.mxu1 %v2035_v54 }
 0x293   :  { %4199 = vmatprep.subr.mxu1 %v2050_v55 }
 0x294   :  { %4200 = vmatpush3.msra.mxu1 %v2034_v19 }
 0x295   :  { %4201 = vmatprep.subr.mxu1 %v2049_v60  ;;  %v2383_v60 = vld [vmem:[#allocation13 + $0xf0] sm:$0xff] }
 0x296   :  { %4202 = vmatpush3.msra.mxu1 %v2033_v25 }
 0x297   :  { %4203 = vmatprep.subr.mxu1 %v2048_v26 }
 0x298   :  { %4204 = vmatpush3.msra.mxu1 %v2032_v28 }
 0x299   :  { %4205 = vmatprep.subr.mxu1 %v2047_v30 }
 0x29a   :  { %4206 = vmatpush3.msra.mxu1 %v2031_v31  ;;  %v2382_v31 = vld [vmem:[#allocation13 + $0xe8] sm:$0xff] }
 0x29b   :  { %4560 = vmatprep.subr.mxu1 %v5842_v38 }
 0x2fa   :  { %v1640_v17 = vpop.f32.mrf.mxu1 }
 0x2fc   :  { %v1642_v32 = vpop.f32.mrf.mxu1 }
 0x302   :  { %v1729_v34 = vpop.f32.mrf.mxu0 }
 0x303   :  { %v1730_v58 = vadd.f32 %v1729_v34, %v1640_v17  ;;  %v2364_v34 = vld [vmem:[#allocation13 + $0x60] sm:$0xff] }
 0x304   :  { %v1731_v36 = vpop.f32.mrf.mxu0 }
 0x305   :  { %v1732_v46 = vadd.f32 %v1731_v36, %v1642_v32  ;;  %v5982_v36 = vld [vmem:[#allocation13 + $0xd8] sm:$0xff] }
 0x310   :  { %v1646_v33 = vpop.f32.mrf.mxu1 }
 0x312   :  { %v1648_v35 = vpop.f32.mrf.mxu1 }
 0x318   :  { %v1735_v7 = vpop.f32.mrf.mxu0 }
 0x319   :  { %v1736_v51 = vadd.f32 %v1735_v7, %v1646_v33  ;;  %v2362_v7 = vld [vmem:[#allocation13 + $0x50] sm:$0xff] }
 0x31a   :  { %v1737_v41 = vpop.f32.mrf.mxu0 }
 0x31b   :  { %v1738_v63 = vadd.f32 %v1737_v41, %v1648_v35  ;;  %v2381_v35 = vld [vmem:[#allocation13 + $0xe0] sm:$0xff] }
 0x31c   :  { %v2360_v41 = vld [vmem:[#allocation13 + $0x40] sm:$0xff] }
 0x323   :  { %v1652_v2 = vpop.f32.mrf.mxu1 }
 0x325   :  { %v1654_v10 = vpop.f32.mrf.mxu1 }
 0x32b   :  { %v1741_v42 = vpop.f32.mrf.mxu0 }
 0x32c   :  { %v1742_v11 = vadd.f32 %v1741_v42, %v1652_v2  ;;  %v2363_v2 = vld [vmem:[#allocation13 + $0x58] sm:$0xff] }
 0x32d   :  { %v1743_v53 = vpop.f32.mrf.mxu0  ;;  %v6002_v42 = vld [vmem:[#allocation13 + $0xb8] sm:$0xff] }
 0x32e   :  { %v1744_v5 = vadd.f32 %v1743_v53, %v1654_v10  ;;  %v5987_v10 = vld [vmem:[#allocation13 + $0xd0] sm:$0xff] }
 0x32f   :  { %v2354_v53 = vld [vmem:[#allocation13 + $0x10] sm:$0xff] }
 0x335   :  { %v1658_v13 = vpop.f32.mrf.mxu1 }
 0x337   :  { %v1660_v43 = vpop.f32.mrf.mxu1 }
 0x339   :  { %v1855_v44 = vpop.f32.mrf.mxu1 }
 0x33a   :  { %v1878_v47 = vadd.f32 %v1855_v44, %v1730_v58  ;;  %v2359_v58 = vld [vmem:[#allocation13 + $0x38] sm:$0xff]  ;;  %v2358_v44 = vld [vmem:[#allocation13 + $0x30] sm:$0xff] }
 0x33b   :  { %v1857_v0 = vpop.f32.mrf.mxu1 }
 0x33c   :  { %v1879_v52 = vadd.f32 %v1857_v0, %v1732_v46  ;;  %v1898_v50 = vadd.f32 %v1891_v45, %v1878_v47  ;;  %v2357_v46 = vld [vmem:[#allocation13 + $0x28] sm:$0xff]  ;;  %v6017_v0 = vld [vmem:[#allocation13 + $0xa0] sm:$0xff] }
 0x33d   :  { %v1861_v59 = vpop.f32.mrf.mxu1  ;;  %v1747_v8 = vpop.f32.mrf.mxu0  ;;  %v6012_v47 = vld [vmem:[#allocation13 + $0xa8] sm:$0xff] }
 0x33e   :  { %v1899_v4 = vadd.f32 %v1895_v48, %v1879_v52  ;;  %v1880_v6 = vadd.f32 %v1861_v59, %v1736_v51  ;;  %v1906_v3 = vmax.f32 %v1898_v50, 0.0  ;;  %v1748_v20 = vadd.f32 %v1747_v8, %v1658_v13  ;;  %v2361_v13 = vld [vmem:[#allocation13 + $0x48] sm:$0xff]  ;;  %v2355_v51 = vld [vmem:[#allocation13 + $0x18] sm:$0xff]  ;;  %v6027_v50 = vld [vmem:[#allocation13 + $0x90] sm:$0xff] }
 0x33f   :  { %v1863_v9 = vpop.f32.mrf.mxu1  ;;  %v1749_v39 = vpop.f32.mrf.mxu0  ;;  %v6022_v52 = vld [vmem:[#allocation13 + $0x98] sm:$0xff]  ;;  %v2353_v59 = vld [vmem:[#allocation13 + $0x8] sm:$0xff] }
 0x340   :  { %v1907_v56 = vmax.f32 %v1899_v4, 0.0  ;;  %v1881_v23 = vadd.f32 %v1863_v9, %v1738_v63  ;;  %v1900_v37 = vadd.f32 %v1891_v45, %v1880_v6  ;;  %v1750_v22 = vadd.f32 %v1749_v39, %v1660_v43  ;;  %v5997_v43 = vld [vmem:[#allocation13 + $0xc0] sm:$0xff]  ;;  %v6032_v63 = vld [vmem:[#allocation13 + $0x88] sm:$0xff] }
 0x341   :  { %v1867_v12 = vpop.f32.mrf.mxu1  ;;  %v2352_v4 = vld [vmem:[#allocation13] sm:$0xff] }
 0x342   :  { %v1901_v15 = vadd.f32 %v1895_v48, %v1881_v23  ;;  %v1882_v24 = vadd.f32 %v1867_v12, %v1742_v11  ;;  %2010 = vmatprep.mubr.f32.mxu0 %v1907_v56  ;;  %2127 = vmatprep.mubr.f32.mxu1 %v1907_v56  ;;  %v1908_v55 = vmax.f32 %v1900_v37, 0.0  ;;  %v6038_v6 = vld [vmem:[#allocation13 + $0x80] sm:$0xff] }
 0x343   :  { %v1869_v16 = vpop.f32.mrf.mxu1  ;;  %2011 = vmatmul.mubr.f32.vlgmr.msra.gmra.mxu0 %v1906_v3  ;;  %2128 = vmatmul.mubr.f32.vlgmr.msra.gmra.mxu1 %v1906_v3 }
 0x344   :  { %v1909_v54 = vmax.f32 %v1901_v15, 0.0  ;;  %v1883_v57 = vadd.f32 %v1869_v16, %v1744_v5  ;;  %4561 = vmatpush3.msra.mxu1 %v2367_v14  ;;  %4526 = vmatpush3.msra.mxu0 %v2384_v62  ;;  %v1902_v18 = vadd.f32 %v1891_v45, %v1882_v24 }
 0x345   :  { %v1873_v19 = vpop.f32.mrf.mxu1  ;;  %4562 = vmatprep.subr.mxu1 %v5842_v38  ;;  %4527 = vmatprep.subr.mxu0 %v5842_v38 }
 0x346   :  { %v1903_v25 = vadd.f32 %v1895_v48, %v1883_v57  ;;  %v1884_v61 = vadd.f32 %v1873_v19, %v1748_v20  ;;  %2015 = vmatprep.mubr.f32.mxu0 %v1909_v54  ;;  %2132 = vmatprep.mubr.f32.mxu1 %v1909_v54  ;;  %v1910_v29 = vmax.f32 %v1902_v18, 0.0 }
 0x347   :  { %v1875_v26 = vpop.f32.mrf.mxu1  ;;  %2016 = vmatmul.mubr.f32.gmra.mxu0 %v1908_v55  ;;  %2133 = vmatmul.mubr.f32.gmra.mxu1 %v1908_v55 }
 0x348   :  { %v1911_v27 = vmax.f32 %v1903_v25, 0.0  ;;  %v1885_v28 = vadd.f32 %v1875_v26, %v1750_v22  ;;  %4563 = vmatpush3.msra.mxu1 %v2366_v21  ;;  %4528 = vmatpush3.msra.mxu0 %v2383_v60  ;;  %v1904_v30 = vadd.f32 %v1891_v45, %v1884_v61  ;;  %v6007_v45 = vld [vmem:[#allocation13 + $0xb0] sm:$0xff]  ;;  %v2629_v22 = vld [vmem:[#allocation13 + $0x1f8] sm:$0xff] }
 0x349   :  { %4564 = vmatprep.subr.mxu1 %v5842_v38  ;;  %4529 = vmatprep.subr.mxu0 %v5842_v38  ;;  %v6049_v26 = vld [vmem:[#allocation13 + $0x178] sm:$0xff] }
 0x34a   :  { %v1905_v17 = vadd.f32 %v1895_v48, %v1885_v28  ;;  %2020 = vmatprep.mubr.f32.mxu0 %v1911_v27  ;;  %2137 = vmatprep.mubr.f32.mxu1 %v1911_v27  ;;  %v1912_v33 = vmax.f32 %v1904_v30, 0.0  ;;  %v2356_v48 = vld [vmem:[#allocation13 + $0x20] sm:$0xff]  ;;  %v2628_v27 = vld [vmem:[#allocation13 + $0x1f0] sm:$0xff] }
 0x34b   :  { %2021 = vmatmul.mubr.f32.gmra.mxu0 %v1910_v29  ;;  %2138 = vmatmul.mubr.f32.gmra.mxu1 %v1910_v29  ;;  %v6054_v28 = vld [vmem:[#allocation13 + $0x170] sm:$0xff]  ;;  %v2627_v29 = vld [vmem:[#allocation13 + $0x1e8] sm:$0xff] }
 0x34c   :  { %v1913_v32 = vmax.f32 %v1905_v17, 0.0  ;;  %4565 = vmatpush3.msra.mxu1 %v2365_v1  ;;  %4530 = vmatpush3.msra.mxu0 %v2382_v31  ;;  %v6059_v1 = vld [vmem:[#allocation13 + $0x168] sm:$0xff]  ;;  %v2626_v31 = vld [vmem:[#allocation13 + $0x1e0] sm:$0xff] }
 0x34d   :  { %4566 = vmatprep.subr.mxu1 %v5842_v38  ;;  %4531 = vmatprep.subr.mxu0 %v5842_v38  ;;  %v6064_v17 = vld [vmem:[#allocation13 + $0x160] sm:$0xff] }
 0x34e   :  { %2025 = vmatprep.mubr.f32.mxu0 %v1913_v32  ;;  %2142 = vmatprep.mubr.f32.mxu1 %v1913_v32  ;;  %v2625_v32 = vld [vmem:[#allocation13 + $0x1d8] sm:$0xff] }
 0x34f   :  { %2026 = vmatmul.mubr.f32.gmra.mxu0 %v1912_v33  ;;  %2143 = vmatmul.mubr.f32.gmra.mxu1 %v1912_v33 }
 0x350   :  { %4567 = vmatpush3.msra.mxu1 %v2364_v34  ;;  %4532 = vmatpush3.msra.mxu0 %v2381_v35  ;;  %v6070_v34 = vld [vmem:[#allocation13 + $0x158] sm:$0xff]  ;;  %v2624_v35 = vld [vmem:[#allocation13 + $0x1d0] sm:$0xff] }
 0x351   :  { %4568 = vmatprep.subr.mxu1 %v5842_v38  ;;  %4533 = vmatprep.subr.mxu0 %v5842_v38 }
 0x352   :  { %4569 = vmatpush3.msra.mxu1 %v2363_v2  ;;  %4534 = vmatpush3.msra.mxu0 %v5982_v36 }
 0x353   :  { %4570 = vmatprep.subr.mxu1 %v5842_v38  ;;  %4535 = vmatprep.subr.mxu0 %v5842_v38 }
 0x354   :  { %4571 = vmatpush3.msra.mxu1 %v2362_v7  ;;  %4536 = vmatpush3.msra.mxu0 %v5987_v10 }
 0x355   :  { %4572 = vmatprep.subr.mxu1 %v5842_v38  ;;  %4537 = vmatprep.subr.mxu0 %v5842_v38 }
 0x356   :  { %4573 = vmatpush3.msra.mxu1 %v2361_v13  ;;  %4538 = vmatpush3.msra.mxu0 %v5992_v40  ;;  %v6076_v13 = vld [vmem:[#allocation13 + $0x150] sm:$0xff] }
 0x357   :  { %4574 = vmatprep.subr.mxu1 %v5842_v38  ;;  %4539 = vmatprep.subr.mxu0 %v5842_v38 }
 0x358   :  { %4575 = vmatpush3.msra.mxu1 %v2360_v41  ;;  %4540 = vmatpush3.msra.mxu0 %v5997_v43  ;;  %v2623_v41 = vld [vmem:[#allocation13 + $0x1c8] sm:$0xff] }
 0x359   :  { %4576 = vmatprep.subr.mxu1 %v5842_v38  ;;  %4541 = vmatprep.subr.mxu0 %v5842_v38 }
 0x35a   :  { %4577 = vmatpush3.msra.mxu1 %v2359_v58  ;;  %4542 = vmatpush3.msra.mxu0 %v6002_v42  ;;  %v6081_v58 = vld [vmem:[#allocation13 + $0x148] sm:$0xff] }
 0x35b   :  { %4578 = vmatprep.subr.mxu1 %v5842_v38  ;;  %4543 = vmatprep.subr.mxu0 %v5842_v38 }
 0x35c   :  { %4579 = vmatpush3.msra.mxu1 %v2358_v44  ;;  %4544 = vmatpush3.msra.mxu0 %v6007_v45  ;;  %v2622_v44 = vld [vmem:[#allocation13 + $0x1c0] sm:$0xff] }
 0x35d   :  { %4580 = vmatprep.subr.mxu1 %v5842_v38  ;;  %4545 = vmatprep.subr.mxu0 %v5842_v38 }
 0x35e   :  { %4581 = vmatpush3.msra.mxu1 %v2357_v46  ;;  %4546 = vmatpush3.msra.mxu0 %v6012_v47 }
 0x35f   :  { %4582 = vmatprep.subr.mxu1 %v5842_v38  ;;  %4547 = vmatprep.subr.mxu0 %v5842_v38 }
 0x360   :  { %4583 = vmatpush3.msra.mxu1 %v2356_v48  ;;  %4548 = vmatpush3.msra.mxu0 %v6017_v0  ;;  %v6086_v48 = vld [vmem:[#allocation13 + $0x140] sm:$0xff] }
 0x361   :  { %4584 = vmatprep.subr.mxu1 %v5842_v38  ;;  %4549 = vmatprep.subr.mxu0 %v5842_v38 }
 0x362   :  { %4585 = vmatpush3.msra.mxu1 %v2355_v51  ;;  %4550 = vmatpush3.msra.mxu0 %v6022_v52  ;;  %v2621_v51 = vld [vmem:[#allocation13 + $0x1b8] sm:$0xff] }
 0x363   :  { %4586 = vmatprep.subr.mxu1 %v5842_v38  ;;  %4551 = vmatprep.subr.mxu0 %v5842_v38 }
 0x364   :  { %4587 = vmatpush3.msra.mxu1 %v2354_v53  ;;  %4552 = vmatpush3.msra.mxu0 %v6027_v50 }
 0x365   :  { %4588 = vmatprep.subr.mxu1 %v5842_v38  ;;  %4553 = vmatprep.subr.mxu0 %v5842_v38 }
 0x366   :  { %4589 = vmatpush3.msra.mxu1 %v2353_v59  ;;  %4554 = vmatpush3.msra.mxu0 %v6032_v63  ;;  %v6091_v59 = vld [vmem:[#allocation13 + $0x138] sm:$0xff] }
 0x367   :  { %4590 = vmatprep.subr.mxu1 %v5842_v38  ;;  %4555 = vmatprep.subr.mxu0 %v5842_v38 }
 0x368   :  { %4591 = vmatpush3.msra.mxu1 %v2352_v4  ;;  %4592 = vmatprep.mubr.msk.f32.mxu1 %vm5354_vm10, %v5842_v38  ;;  %v2620_v4 = vld [vmem:[#allocation13 + $0x1b0] sm:$0xff] }
 0x369   :  { %4630 = vmatprep.subr.mxu1 %v5842_v38  ;;  %4556 = vmatpush3.msra.mxu0 %v6038_v6 }
 0x36a   :  { %4557 = vmatprep.mubr.msk.f32.mxu0 %vm5354_vm10, %v5842_v38  ;;  %4595 = vmatprep.subr.mxu0 %v5842_v38 }
 0x403   :  { %v4163_v8 = vpop.f32.mrf.mxu0  ;;  %v4207_v9 = vpop.f32.mrf.mxu1 }
 0x405   :  { %v4164_v11 = vpop.f32.mrf.mxu0  ;;  %v4208_v56 = vpop.f32.mrf.mxu1 }
 0x406   :  { %v4165_v23 = vadd.f32 %v4164_v11, %v4163_v8  ;;  %v4209_v3 = vadd.f32 %v4208_v56, %v4207_v9  ;;  %v6096_v56 = vld [vmem:[#allocation13 + $0x130] sm:$0xff] }
 0x407   :  { %v4166_v9 = vpop.f32.mrf.mxu0  ;;  %v4210_v11 = vpop.f32.mrf.mxu1 }
 0x408   :  { %v2148_v37 = vmax.f32 %v4165_v23, %v4209_v3  ;;  %v2619_v23 = vld [vmem:[#allocation13 + $0x1a8] sm:$0xff] }
 0x40a   :  { %v2163_v12 = vrot.slane %v2148_v37, %v5847_v49  ;;  %v2156_v55 = vcombine.high %v2148_v37, %v2148_v37  ;;  %v6101_v37 = vld [vmem:[#allocation13 + $0x128] sm:$0xff] }
 0x40c   :  { %v2171_v14 = vcombine.high %v2163_v12, %v2163_v12  ;;  %v2240_v62 = vsel %vm1195_vm2, %v2163_v12, -inf  ;;  %v2170_v25 = vrot.slane %v2156_v55, %v5847_v49  ;;  %v2618_v12 = vld [vmem:[#allocation13 + $0x1a0] sm:$0xff] }
 0x40d   :  { %v2241_v5 = vrot.slane %v2240_v62, 4 }
 0x40e   :  { %v2247_v15 = vsel %vm1195_vm2, %v2171_v14, -inf  ;;  %v2172_v30 = vcombine.high %v2170_v25, %v2170_v25  ;;  %v2254_v2 = vsel %vm1195_vm2, %v2170_v25, -inf }
 0x40f   :  { %v2242_v24 = vmax.f32 %v2240_v62, %v2241_v5  ;;  %v2248_v39 = vrot.slane %v2247_v15, 4  ;;  %v2255_v46 = vrot.slane %v2254_v2, 4  ;;  %v4167_v62 = vpop.f32.mrf.mxu0  ;;  %v4211_v5 = vpop.f32.mrf.mxu1 }
 0x410   :  { %v2261_v33 = vsel %vm1195_vm2, %v2172_v30, -inf  ;;  %v2805_v30 = vld [vmem:[#allocation13 + $0x2f8] sm:$0xff] }
 0x411   :  { %v2243_v16 = vrot.slane %v2242_v24, 2  ;;  %v2249_v20 = vmax.f32 %v2247_v15, %v2248_v39  ;;  %v2262_v7 = vrot.slane %v2261_v33, 4  ;;  %v2256_v8 = vmax.f32 %v2254_v2, %v2255_v46  ;;  %v6106_v15 = vld [vmem:[#allocation13 + $0x120] sm:$0xff]  ;;  %v6141_v2 = vld [vmem:[#allocation13 + $0x270] sm:$0xff] }
 0x412   :  { %v2802_v46 = vld [vmem:[#allocation13 + $0x2e0] sm:$0xff] }
 0x413   :  { %v2244_v54 = vmax.f32 %v2242_v24, %v2243_v16  ;;  %v2250_v57 = vrot.slane %v2249_v20, 2  ;;  %v2263_v53 = vmax.f32 %v2261_v33, %v2262_v7  ;;  %v2257_v14 = vrot.slane %v2256_v8, 2  ;;  %v2617_v24 = vld [vmem:[#allocation13 + $0x198] sm:$0xff]  ;;  %v2803_v7 = vld [vmem:[#allocation13 + $0x2e8] sm:$0xff] }
 0x414   :  { %v6111_v16 = vld [vmem:[#allocation13 + $0x118] sm:$0xff] }
 0x415   :  { %v2245_v18 = vrot.slane %v2244_v54, 1  ;;  %v2251_v19 = vmax.f32 %v2249_v20, %v2250_v57  ;;  %v2264_v3 = vrot.slane %v2263_v53, 2  ;;  %v2616_v20 = vld [vmem:[#allocation13 + $0x190] sm:$0xff]  ;;  %v4212_v57 = vadd.f32 %v4211_v5, %v4210_v11  ;;  %v6136_v33 = vld [vmem:[#allocation13 + $0x278] sm:$0xff] }
 0x416   :  { %v2258_v55 = vmax.f32 %v2256_v8, %v2257_v14  ;;  %v6157_v8 = vld [vmem:[#allocation13 + $0x258] sm:$0xff]  ;;  %v6162_v11 = vld [vmem:[#allocation13 + $0x250] sm:$0xff]  ;;  %v6168_v14 = vld [vmem:[#allocation13 + $0x248] sm:$0xff] }
 0x417   :  { %v2246_v21 = vmax.f32 %v2244_v54, %v2245_v18  ;;  %v2252_v60 = vrot.slane %v2251_v19, 1  ;;  %v2265_v39 = vmax.f32 %v2263_v53, %v2264_v3  ;;  %v4168_v54 = vadd.f32 %v4167_v62, %v4166_v9  ;;  %v6116_v18 = vld [vmem:[#allocation13 + $0x110] sm:$0xff]  ;;  %v2801_v53 = vld [vmem:[#allocation13 + $0x2d8] sm:$0xff]  ;;  %v2798_v62 = vld [vmem:[#allocation13 + $0x2c0] sm:$0xff] }
 0x418   :  { %v2800_v9 = vld [vmem:[#allocation13 + $0x2d0] sm:$0xff] }
 0x419   :  { %4593 = vmatmul.mubr.f32.vlgmr.msra.gmra.mxu1 %v2246_v21  ;;  %v2253_v61 = vmax.f32 %v2251_v19, %v2252_v60  ;;  %v2615_v19 = vld [vmem:[#allocation13 + $0x188] sm:$0xff]  ;;  %v2266_v21 = vrot.slane %v2265_v39, 1  ;;  %v6123_v25 = vmax.f32 %v4168_v54, %v4212_v57  ;;  %v6178_v54 = vld [vmem:[#allocation13 + $0x238] sm:$0xff]  ;;  %v2796_v57 = vld [vmem:[#allocation13 + $0x2b0] sm:$0xff] }
 0x41a   :  { %4631 = vmatpush3.msra.mxu1 %v2629_v22  ;;  %4662 = vmatprep.mubr.msk.f32.mxu1 %vm5354_vm10, %v5842_v38  ;;  %v6121_v60 = vld [vmem:[#allocation13 + $0x108] sm:$0xff]  ;;  %v2614_v22 = vld [vmem:[#allocation13 + $0x180] sm:$0xff] }
 0x41b   :  { %4632 = vmatprep.subr.mxu1 %v5842_v38  ;;  %4558 = vmatmul.mubr.f32.vlgmr.msra.gmra.mxu0 %v2253_v61  ;;  %v2259_v61 = vrot.slane %v2258_v55, 1 }
 0x41c   :  { %4596 = vmatpush3.msra.mxu0 %v6049_v26  ;;  %4633 = vmatpush3.msra.mxu1 %v2628_v27  ;;  %v2267_v27 = vmax.f32 %v2265_v39, %v2266_v21  ;;  %v2795_v21 = vld [vmem:[#allocation13 + $0x2a8] sm:$0xff] }
 0x41d   :  { %4597 = vmatprep.subr.mxu0 %v5842_v38  ;;  %4634 = vmatprep.subr.mxu1 %v5842_v38 }
 0x41e   :  { %4598 = vmatpush3.msra.mxu0 %v6054_v28  ;;  %4635 = vmatpush3.msra.mxu1 %v2627_v29  ;;  %v6128_v29 = vld [vmem:[#allocation13 + $0x100] sm:$0xff] }
 0x41f   :  { %4599 = vmatprep.subr.mxu0 %v5842_v38  ;;  %4636 = vmatprep.subr.mxu1 %v5842_v38 }
 0x420   :  { %4600 = vmatpush3.msra.mxu0 %v6059_v1  ;;  %4637 = vmatpush3.msra.mxu1 %v2626_v31  ;;  %v2180_v31 = vrot.slane %v6123_v25, %v5847_v49 }
 0x421   :  { %4601 = vmatprep.subr.mxu0 %v5842_v38  ;;  %4638 = vmatprep.subr.mxu1 %v5842_v38 }
 0x422   :  { %4602 = vmatpush3.msra.mxu0 %v6064_v17  ;;  %4639 = vmatpush3.msra.mxu1 %v2625_v32  ;;  %v2260_v32 = vmax.f32 %v2258_v55, %v2259_v61  ;;  %v6188_v61 = vld [vmem:[#allocation13 + $0x228] sm:$0xff] }
 0x423   :  { %4603 = vmatprep.subr.mxu0 %v5842_v38  ;;  %4640 = vmatprep.subr.mxu1 %v5842_v38 }
 0x424   :  { %4604 = vmatpush3.msra.mxu0 %v6070_v34  ;;  %4641 = vmatpush3.msra.mxu1 %v2624_v35  ;;  %v2804_v35 = vld [vmem:[#allocation13 + $0x2f0] sm:$0xff] }
 0x425   :  { %4605 = vmatprep.subr.mxu0 %v5842_v38  ;;  %4642 = vmatprep.subr.mxu1 %v5842_v38 }
 0x426   :  { %4606 = vmatpush3.msra.mxu0 %v6076_v13  ;;  %4643 = vmatpush3.msra.mxu1 %v2623_v41  ;;  %v2188_v41 = vcombine.high %v2180_v31, %v2180_v31 }
 0x427   :  { %4607 = vmatprep.subr.mxu0 %v5842_v38  ;;  %4644 = vmatprep.subr.mxu1 %v5842_v38 }
 0x428   :  { %4608 = vmatpush3.msra.mxu0 %v6081_v58  ;;  %4645 = vmatpush3.msra.mxu1 %v2622_v44  ;;  %v6146_v44 = vld [vmem:[#allocation13 + $0x268] sm:$0xff] }
 0x429   :  { %4609 = vmatprep.subr.mxu0 %v5842_v38  ;;  %4646 = vmatprep.subr.mxu1 %v5842_v38 }
 0x42a   :  { %4610 = vmatpush3.msra.mxu0 %v6086_v48  ;;  %4647 = vmatpush3.msra.mxu1 %v2621_v51  ;;  %v6151_v51 = vld [vmem:[#allocation13 + $0x260] sm:$0xff] }
 0x42b   :  { %4611 = vmatprep.subr.mxu0 %v5842_v38  ;;  %4648 = vmatprep.subr.mxu1 %v5842_v38 }
 0x42c   :  { %4612 = vmatpush3.msra.mxu0 %v6091_v59  ;;  %4649 = vmatpush3.msra.mxu1 %v2620_v4  ;;  %v2275_v4 = vsel %vm1195_vm2, %v2188_v41, -inf  ;;  %v2792_v41 = vld [vmem:[#allocation13 + $0x290] sm:$0xff] }
 0x42d   :  { %4613 = vmatprep.subr.mxu0 %v5842_v38  ;;  %4650 = vmatprep.subr.mxu1 %v5842_v38  ;;  %v2276_v3 = vrot.slane %v2275_v4, 4 }
 0x42e   :  { %4614 = vmatpush3.msra.mxu0 %v6096_v56  ;;  %4651 = vmatpush3.msra.mxu1 %v2619_v23  ;;  %v2268_v23 = vsel %vm1195_vm2, %v2180_v31, -inf  ;;  %v6193_v31 = vld [vmem:[#allocation13 + $0x220] sm:$0xff] }
 0x42f   :  { %4615 = vmatprep.subr.mxu0 %v5842_v38  ;;  %4652 = vmatprep.subr.mxu1 %v5842_v38  ;;  %v2269_v5 = vrot.slane %v2268_v23, 4  ;;  %v2277_v39 = vmax.f32 %v2275_v4, %v2276_v3  ;;  %v2791_v4 = vld [vmem:[#allocation13 + $0x288] sm:$0xff]  ;;  %v2790_v3 = vld [vmem:[#allocation13 + $0x280] sm:$0xff] }
 0x430   :  { %4616 = vmatpush3.msra.mxu0 %v6101_v37  ;;  %4653 = vmatpush3.msra.mxu1 %v2618_v12  ;;  %v2799_v12 = vld [vmem:[#allocation13 + $0x2c8] sm:$0xff] }
 0x431   :  { %4617 = vmatprep.subr.mxu0 %v5842_v38  ;;  %4654 = vmatprep.subr.mxu1 %v5842_v38  ;;  %v2270_v55 = vmax.f32 %v2268_v23, %v2269_v5  ;;  %v6208_v23 = vld [vmem:[#allocation13 + $0x208] sm:$0xff] }
 0x432   :  { %4618 = vmatpush3.msra.mxu0 %v6106_v15  ;;  %4655 = vmatpush3.msra.mxu1 %v2617_v24  ;;  %v6173_v24 = vld [vmem:[#allocation13 + $0x240] sm:$0xff] }
 0x433   :  { %4619 = vmatprep.subr.mxu0 %v5842_v38  ;;  %4656 = vmatprep.subr.mxu1 %v5842_v38 }
 0x434   :  { %4620 = vmatpush3.msra.mxu0 %v6111_v16  ;;  %4657 = vmatpush3.msra.mxu1 %v2616_v20  ;;  %v2797_v20 = vld [vmem:[#allocation13 + $0x2b8] sm:$0xff] }
 0x435   :  { %4621 = vmatprep.subr.mxu0 %v5842_v38  ;;  %4658 = vmatprep.subr.mxu1 %v5842_v38 }
 0x436   :  { %4622 = vmatpush3.msra.mxu0 %v6116_v18  ;;  %4659 = vmatpush3.msra.mxu1 %v2615_v19  ;;  %v6183_v19 = vld [vmem:[#allocation13 + $0x230] sm:$0xff] }
 0x437   :  { %4623 = vmatprep.subr.mxu0 %v5842_v38  ;;  %4660 = vmatprep.subr.mxu1 %v5842_v38 }
 0x438   :  { %4624 = vmatpush3.msra.mxu0 %v6121_v60  ;;  %4661 = vmatpush3.msra.mxu1 %v2614_v22  ;;  %v2278_v22 = vrot.slane %v2277_v39, 2 }
 0x439   :  { %4625 = vmatprep.subr.mxu0 %v5842_v38  ;;  %4663 = vmatmul.mubr.f32.vlgmr.msra.gmra.mxu1 %v2267_v27  ;;  %v2794_v27 = vld [vmem:[#allocation13 + $0x2a0] sm:$0xff] }
 0x43a   :  { %4700 = vmatprep.subr.mxu1 %v5842_v38  ;;  %4626 = vmatpush3.msra.mxu0 %v6128_v29 }
 0x43b   :  { %4627 = vmatprep.mubr.msk.f32.mxu0 %vm5354_vm10, %v5842_v38  ;;  %4701 = vmatpush3.msra.mxu1 %v2805_v30  ;;  %v2271_v30 = vrot.slane %v2270_v55, 2 }
 0x43c   :  { %4628 = vmatmul.mubr.f32.vlgmr.msra.gmra.mxu0 %v2260_v32  ;;  %4665 = vmatprep.subr.mxu0 %v5842_v38  ;;  %v2793_v32 = vld [vmem:[#allocation13 + $0x298] sm:$0xff] }
 0x43d   :  { %4702 = vmatprep.subr.mxu1 %v5842_v38  ;;  %4666 = vmatpush3.msra.mxu0 %v6136_v33 }
 0x43e   :  { %4703 = vmatpush3.msra.mxu1 %v2804_v35  ;;  %4667 = vmatprep.subr.mxu0 %v5842_v38  ;;  %v2279_v35 = vmax.f32 %v2277_v39, %v2278_v22  ;;  %v6217_v39 = vld [vmem:[#allocation13 + $0x200] sm:$0xff]  ;;  %v6230_v22 = vld [vmem:[#allocation13 + $0x370] sm:$0xff] }
 0x43f   :  { %4704 = vmatprep.subr.mxu1 %v5842_v38  ;;  %4668 = vmatpush3.msra.mxu0 %v6141_v2  ;;  %6708 = vst [vmem:[#allocation23_spill] sm:$0xff] %v6230_v22 }
 0x440   :  { %4705 = vmatpush3.msra.mxu1 %v2803_v7  ;;  %4669 = vmatprep.subr.mxu0 %v5842_v38  ;;  %v6198_v7 = vld [vmem:[#allocation13 + $0x218] sm:$0xff] }
 0x441   :  { %4706 = vmatprep.subr.mxu1 %v5842_v38  ;;  %4670 = vmatpush3.msra.mxu0 %v6146_v44 }
 0x442   :  { %4707 = vmatpush3.msra.mxu1 %v2802_v46  ;;  %4671 = vmatprep.subr.mxu0 %v5842_v38  ;;  %v6203_v46 = vld [vmem:[#allocation13 + $0x210] sm:$0xff] }
 0x443   :  { %4708 = vmatprep.subr.mxu1 %v5842_v38  ;;  %4672 = vmatpush3.msra.mxu0 %v6151_v51 }
 0x444   :  { %4709 = vmatpush3.msra.mxu1 %v2801_v53  ;;  %4673 = vmatprep.subr.mxu0 %v5842_v38  ;;  %v2272_v53 = vmax.f32 %v2270_v55, %v2271_v30  ;;  %v6225_v55 = vld [vmem:[#allocation13 + $0x378] sm:$0xff] }
 0x445   :  { %4710 = vmatprep.subr.mxu1 %v5842_v38  ;;  %4674 = vmatpush3.msra.mxu0 %v6157_v8  ;;  %6707 = vst [vmem:[#allocation22_spill] sm:$0xff] %v6225_v55 }
 0x446   :  { %4711 = vmatpush3.msra.mxu1 %v2800_v9  ;;  %4675 = vmatprep.subr.mxu0 %v5842_v38  ;;  %v2280_v9 = vrot.slane %v2279_v35, 1 }
 0x447   :  { %4712 = vmatprep.subr.mxu1 %v5842_v38  ;;  %4676 = vmatpush3.msra.mxu0 %v6162_v11 }
 0x448   :  { %4713 = vmatpush3.msra.mxu1 %v2799_v12  ;;  %4677 = vmatprep.subr.mxu0 %v5842_v38  ;;  %v2173_v12 = vcombine.high %v6123_v25, %v6123_v25  ;;  %v2281_v5 = vmax.f32 %v2279_v35, %v2280_v9  ;;  %v2978_v35 = vld [vmem:[#allocation13 + $0x3e0] sm:$0xff]  ;;  %v6246_v9 = vld [vmem:[#allocation13 + $0x358] sm:$0xff] }
 0x449   :  { %4714 = vmatprep.subr.mxu1 %v5842_v38  ;;  %4678 = vmatpush3.msra.mxu0 %v6168_v14  ;;  %6711 = vst [vmem:[#allocation26_spill] sm:$0xff] %v6246_v9 }
 0x44a   :  { %4715 = vmatpush3.msra.mxu1 %v2798_v62  ;;  %4679 = vmatprep.subr.mxu0 %v5842_v38  ;;  %v2273_v62 = vrot.slane %v2272_v53, 1  ;;  %v2187_v25 = vrot.slane %v2173_v12, %v5847_v49  ;;  %v6251_v12 = vld [vmem:[#allocation13 + $0x350] sm:$0xff] }
 0x44b   :  { %4716 = vmatprep.subr.mxu1 %v5842_v38  ;;  %4680 = vmatpush3.msra.mxu0 %v6173_v24  ;;  %6712 = vst [vmem:[#allocation27_spill] sm:$0xff] %v6251_v12 }
 0x44c   :  { %4717 = vmatpush3.msra.mxu1 %v2797_v20  ;;  %4681 = vmatprep.subr.mxu0 %v5842_v38  ;;  %v2981_v20 = vld [vmem:[#allocation13 + $0x3f8] sm:$0xff]  ;;  %v2189_v30 = vcombine.high %v2187_v25, %v2187_v25 }
 0x44d   :  { %4718 = vmatprep.subr.mxu1 %v5842_v38  ;;  %4682 = vmatpush3.msra.mxu0 %v6178_v54 }
 0x44e   :  { %4719 = vmatpush3.msra.mxu1 %v2796_v57  ;;  %4683 = vmatprep.subr.mxu0 %v5842_v38  ;;  %v2274_v57 = vmax.f32 %v2272_v53, %v2273_v62  ;;  %v2977_v53 = vld [vmem:[#allocation13 + $0x3d8] sm:$0xff]  ;;  %v2282_v62 = vsel %vm1195_vm2, %v2187_v25, -inf  ;;  %v6262_v25 = vld [vmem:[#allocation13 + $0x340] sm:$0xff] }
 0x44f   :  { %4720 = vmatprep.subr.mxu1 %v5842_v38  ;;  %4684 = vmatpush3.msra.mxu0 %v6183_v19  ;;  %6714 = vst [vmem:[#allocation29_spill] sm:$0xff] %v6262_v25 }
 0x450   :  { %4721 = vmatpush3.msra.mxu1 %v2795_v21  ;;  %4685 = vmatprep.subr.mxu0 %v5842_v38  ;;  %v2980_v21 = vld [vmem:[#allocation13 + $0x3f0] sm:$0xff] }
 0x451   :  { %4722 = vmatprep.subr.mxu1 %v5842_v38  ;;  %4686 = vmatpush3.msra.mxu0 %v6188_v61 }
 0x452   :  { %4723 = vmatpush3.msra.mxu1 %v2794_v27  ;;  %4687 = vmatprep.subr.mxu0 %v5842_v38  ;;  %v2979_v27 = vld [vmem:[#allocation13 + $0x3e8] sm:$0xff] }
 0x453   :  { %4724 = vmatprep.subr.mxu1 %v5842_v38  ;;  %4688 = vmatpush3.msra.mxu0 %v6193_v31 }
 0x454   :  { %4725 = vmatpush3.msra.mxu1 %v2793_v32  ;;  %4689 = vmatprep.subr.mxu0 %v5842_v38  ;;  %v6235_v32 = vld [vmem:[#allocation13 + $0x368] sm:$0xff] }
 0x455   :  { %4726 = vmatprep.subr.mxu1 %v5842_v38  ;;  %4690 = vmatpush3.msra.mxu0 %v6198_v7  ;;  %6709 = vst [vmem:[#allocation24_spill] sm:$0xff] %v6235_v32 }
 0x456   :  { %4727 = vmatpush3.msra.mxu1 %v2792_v41  ;;  %4691 = vmatprep.subr.mxu0 %v5842_v38  ;;  %v6240_v41 = vld [vmem:[#allocation13 + $0x360] sm:$0xff] }
 0x457   :  { %4728 = vmatprep.subr.mxu1 %v5842_v38  ;;  %4692 = vmatpush3.msra.mxu0 %v6203_v46  ;;  %6710 = vst [vmem:[#allocation25_spill] sm:$0xff] %v6240_v41 }
 0x458   :  { %4729 = vmatpush3.msra.mxu1 %v2791_v4  ;;  %4693 = vmatprep.subr.mxu0 %v5842_v38  ;;  %v2289_v4 = vsel %vm1195_vm2, %v2189_v30, -inf  ;;  %v2973_v30 = vld [vmem:[#allocation13 + $0x3b8] sm:$0xff] }
 0x459   :  { %4730 = vmatprep.subr.mxu1 %v5842_v38  ;;  %4694 = vmatpush3.msra.mxu0 %v6208_v23 }
 0x45a   :  { %4731 = vmatpush3.msra.mxu1 %v2790_v3  ;;  %4732 = vmatprep.mubr.msk.f32.mxu1 %vm5354_vm10, %v5842_v38  ;;  %v2976_v3 = vld [vmem:[#allocation13 + $0x3d0] sm:$0xff] }
 0x45b   :  { %4695 = vmatprep.subr.mxu0 %v5842_v38  ;;  %4733 = vmatmul.mubr.f32.vlgmr.msra.gmra.mxu1 %v2281_v5  ;;  %v2290_v5 = vrot.slane %v2289_v4, 4 }
 0x45c   :  { %4770 = vmatprep.subr.mxu1 %v5842_v38  ;;  %4696 = vmatpush3.msra.mxu0 %v6217_v39 }
 0x45d   :  { %4697 = vmatprep.mubr.msk.f32.mxu0 %vm5354_vm10, %v5842_v38  ;;  %4771 = vmatpush3.msra.mxu1 %v2981_v20  ;;  %v2975_v20 = vld [vmem:[#allocation13 + $0x3c8] sm:$0xff] }
 0x45e   :  { %4698 = vmatmul.mubr.f32.vlgmr.msra.gmra.mxu0 %v2274_v57  ;;  %4735 = vmatprep.subr.mxu0 %v5842_v38  ;;  %v6257_v57 = vld [vmem:[#allocation13 + $0x348] sm:$0xff] }
 0x45f   :  { %4772 = vmatprep.subr.mxu1 %v5842_v38  ;;  %4736 = vmatpush3.msra.mxu0 %v6225_v55  ;;  %6713 = vst [vmem:[#allocation28_spill] sm:$0xff] %v6257_v57  ;;  %v6292_v55 = vld [vmem:[#allocation13 + $0x310] sm:$0xff] }
 0x460   :  { %4773 = vmatpush3.msra.mxu1 %v2980_v21  ;;  %4737 = vmatprep.subr.mxu0 %v5842_v38  ;;  %v2974_v21 = vld [vmem:[#allocation13 + $0x3c0] sm:$0xff] }
 0x461   :  { %4774 = vmatprep.subr.mxu1 %v5842_v38  ;;  %4738 = vmatpush3.msra.mxu0 %v6230_v22 }
 0x462   :  { %4775 = vmatpush3.msra.mxu1 %v2979_v27  ;;  %4739 = vmatprep.subr.mxu0 %v5842_v38  ;;  %v2283_v27 = vrot.slane %v2282_v62, 4 }
 0x463   :  { %4776 = vmatprep.subr.mxu1 %v5842_v38  ;;  %4740 = vmatpush3.msra.mxu0 %v6235_v32  ;;  %v6287_v32 = vld [vmem:[#allocation13 + $0x318] sm:$0xff] }
 0x464   :  { %4777 = vmatpush3.msra.mxu1 %v2978_v35  ;;  %4741 = vmatprep.subr.mxu0 %v5842_v38  ;;  %v2291_v35 = vmax.f32 %v2289_v4, %v2290_v5  ;;  %v2971_v4 = vld [vmem:[#allocation13 + $0x3a8] sm:$0xff] }
 0x465   :  { %4778 = vmatprep.subr.mxu1 %v5842_v38  ;;  %4742 = vmatpush3.msra.mxu0 %v6240_v41  ;;  %v6272_v41 = vld [vmem:[#allocation13 + $0x330] sm:$0xff] }
 0x466   :  { %4779 = vmatpush3.msra.mxu1 %v2977_v53  ;;  %4743 = vmatprep.subr.mxu0 %v5842_v38  ;;  %v6267_v53 = vld [vmem:[#allocation13 + $0x338] sm:$0xff]  ;;  %6716 = vst [vmem:[#allocation31_spill] sm:$0xff] %v6272_v41  ;;  %v2292_v5 = vrot.slane %v2291_v35, 2 }
 0x467   :  { %4780 = vmatprep.subr.mxu1 %v5842_v38  ;;  %4744 = vmatpush3.msra.mxu0 %v6246_v9  ;;  %6715 = vst [vmem:[#allocation30_spill] sm:$0xff] %v6267_v53  ;;  %v4213_v9 = vpop.f32.mrf.mxu1 }
 0x468   :  { %4781 = vmatpush3.msra.mxu1 %v2976_v3  ;;  %4745 = vmatprep.subr.mxu0 %v5842_v38  ;;  %v2972_v3 = vld [vmem:[#allocation13 + $0x3b0] sm:$0xff] }
 0x469   :  { %4782 = vmatprep.subr.mxu1 %v5842_v38  ;;  %4746 = vmatpush3.msra.mxu0 %v6251_v12  ;;  %v4169_v12 = vpop.f32.mrf.mxu0 }
 0x46a   :  { %4783 = vmatpush3.msra.mxu1 %v2975_v20  ;;  %4747 = vmatprep.subr.mxu0 %v5842_v38  ;;  %v2284_v20 = vmax.f32 %v2282_v62, %v2283_v27  ;;  %v2970_v62 = vld [vmem:[#allocation13 + $0x3a0] sm:$0xff] }
 0x46b   :  { %4784 = vmatprep.subr.mxu1 %v5842_v38  ;;  %4748 = vmatpush3.msra.mxu0 %v6257_v57  ;;  %v4170_v27 = vpop.f32.mrf.mxu0  ;;  %v2293_v57 = vmax.f32 %v2291_v35, %v2292_v5  ;;  %v2967_v35 = vld [vmem:[#allocation13 + $0x388] sm:$0xff] }
 0x46c   :  { %4785 = vmatpush3.msra.mxu1 %v2974_v21  ;;  %4749 = vmatprep.subr.mxu0 %v5842_v38  ;;  %v6277_v21 = vld [vmem:[#allocation13 + $0x328] sm:$0xff] }
 0x46d   :  { %4786 = vmatprep.subr.mxu1 %v5842_v38  ;;  %4750 = vmatpush3.msra.mxu0 %v6262_v25  ;;  %6717 = vst [vmem:[#allocation32_spill] sm:$0xff] %v6277_v21  ;;  %v6282_v25 = vld [vmem:[#allocation13 + $0x320] sm:$0xff]  ;;  %v2294_v5 = vrot.slane %v2293_v57, 1 }
 0x46e   :  { %4787 = vmatpush3.msra.mxu1 %v2973_v30  ;;  %4751 = vmatprep.subr.mxu0 %v5842_v38  ;;  %v4214_v30 = vpop.f32.mrf.mxu1 }
 0x46f   :  { %4788 = vmatprep.subr.mxu1 %v5842_v38  ;;  %4752 = vmatpush3.msra.mxu0 %v6267_v53  ;;  %v2285_v53 = vrot.slane %v2284_v20, 2  ;;  %v4215_v22 = vadd.f32 %v4214_v30, %v4213_v9  ;;  %v6297_v9 = vld [vmem:[#allocation13 + $0x308] sm:$0xff] }
 0x470   :  { %4789 = vmatpush3.msra.mxu1 %v2972_v3  ;;  %4753 = vmatprep.subr.mxu0 %v5842_v38  ;;  %v2969_v3 = vld [vmem:[#allocation13 + $0x398] sm:$0xff] }
 0x471   :  { %4790 = vmatprep.subr.mxu1 %v5842_v38  ;;  %4754 = vmatpush3.msra.mxu0 %v6272_v41  ;;  %v4171_v41 = vadd.f32 %v4170_v27, %v4169_v12  ;;  %v6306_v27 = vld [vmem:[#allocation13 + $0x300] sm:$0xff] }
 0x472   :  { %4791 = vmatpush3.msra.mxu1 %v2971_v4  ;;  %4755 = vmatprep.subr.mxu0 %v5842_v38  ;;  %v2968_v4 = vld [vmem:[#allocation13 + $0x390] sm:$0xff] }
 0x473   :  { %4792 = vmatprep.subr.mxu1 %v5842_v38  ;;  %4756 = vmatpush3.msra.mxu0 %v6277_v21  ;;  %v2286_v21 = vmax.f32 %v2284_v20, %v2285_v53  ;;  %v6299_v12 = vmax.f32 %v4171_v41, %v4215_v22  ;;  %v2295_v20 = vmax.f32 %v2293_v57, %v2294_v5  ;;  %v3175_v22 = vld [vmem:[#allocation13 + $0xf8] sm:$0xff]  ;;  %v3174_v57 = vld [vmem:[#allocation13 + $0xf0] sm:$0xff] }
 0x474   :  { %4793 = vmatpush3.msra.mxu1 %v2970_v62  ;;  %4757 = vmatprep.subr.mxu0 %v5842_v38  ;;  %v2966_v62 = vld [vmem:[#allocation13 + $0x380] sm:$0xff] }
 0x475   :  { %4794 = vmatprep.subr.mxu1 %v5842_v38  ;;  %4758 = vmatpush3.msra.mxu0 %v6282_v25  ;;  %v2287_v53 = vrot.slane %v2286_v21, 1  ;;  %v6312_v41 = vrot.slane %v6299_v12, %v5847_v49 }
 0x476   :  { %4795 = vmatpush3.msra.mxu1 %v2969_v3  ;;  %4759 = vmatprep.subr.mxu0 %v5842_v38  ;;  %v3173_v3 = vld [vmem:[#allocation13 + $0xe8] sm:$0xff] }
 0x477   :  { %4796 = vmatprep.subr.mxu1 %v5842_v38  ;;  %4760 = vmatpush3.msra.mxu0 %v6287_v32  ;;  %v2288_v30 = vmax.f32 %v2286_v21, %v2287_v53  ;;  %v4216_v53 = vpop.f32.mrf.mxu1 }
 0x478   :  { %4797 = vmatpush3.msra.mxu1 %v2968_v4  ;;  %4761 = vmatprep.subr.mxu0 %v5842_v38  ;;  %v2205_v4 = vcombine.high %v6312_v41, %v6312_v41 }
 0x479   :  { %4798 = vmatprep.subr.mxu1 %v5842_v38  ;;  %4762 = vmatpush3.msra.mxu0 %v6292_v55 }
 0x47a   :  { %4799 = vmatpush3.msra.mxu1 %v2967_v35  ;;  %4763 = vmatprep.subr.mxu0 %v5842_v38  ;;  %v3172_v35 = vld [vmem:[#allocation13 + $0xe0] sm:$0xff]  ;;  %v2303_v21 = vsel %vm1195_vm2, %v2205_v4, -inf }
 0x47b   :  { %4800 = vmatprep.subr.mxu1 %v5842_v38  ;;  %4764 = vmatpush3.msra.mxu0 %v6297_v9  ;;  %v2304_v5 = vrot.slane %v2303_v21, 4  ;;  %v6441_v4 = vld [vmem:[#allocation15 + $0x20] sm:$0xff] }
 0x47c   :  { %4801 = vmatpush3.msra.mxu1 %v2966_v62  ;;  %4802 = vmatprep.mubr.msk.f32.mxu1 %vm5354_vm10, %v5842_v38 }
 0x47d   :  { %4765 = vmatprep.subr.mxu0 %v5842_v38  ;;  %4803 = vmatmul.mubr.f32.vlgmr.msra.gmra.mxu1 %v2295_v20  ;;  %v2305_v62 = vmax.f32 %v2303_v21, %v2304_v5  ;;  %v6719_v21 = vld [vmem:[#allocation23_spill] sm:$0xff]  ;;  %v6720_v5 = vld [vmem:[#allocation24_spill] sm:$0xff] }
 0x47e   :  { %4840 = vmatprep.subr.mxu1 %v5842_v38  ;;  %4766 = vmatpush3.msra.mxu0 %v6306_v27 }
 0x47f   :  { %4767 = vmatprep.mubr.msk.f32.mxu0 %vm5354_vm10, %v5842_v38  ;;  %4841 = vmatpush3.msra.mxu1 %v3175_v22  ;;  %v4217_v22 = vpop.f32.mrf.mxu1 }
 0x480   :  { %4768 = vmatmul.mubr.f32.vlgmr.msra.gmra.mxu0 %v2288_v30  ;;  %4842 = vmatprep.subr.mxu1 %v5842_v38 }
 0x481   :  { %4843 = vmatpush3.msra.mxu1 %v3174_v57  ;;  %4872 = vmatprep.mubr.msk.f32.mxu1 %vm5354_vm10, %v5842_v38  ;;  %v4218_v57 = vadd.f32 %v4217_v22, %v4216_v53 }
 0x482   :  { %4844 = vmatprep.subr.mxu1 %v5842_v38  ;;  %4805 = vmatprep.subr.mxu0 %v5842_v38 }
 0x483   :  { %4845 = vmatpush3.msra.mxu1 %v3173_v3  ;;  %4837 = vmatprep.mubr.msk.f32.mxu0 %vm5354_vm10, %v5842_v38 }
 0x484   :  { %4846 = vmatprep.subr.mxu1 %v5842_v38 }
 0x485   :  { %4847 = vmatpush3.msra.mxu1 %v3172_v35 }
 0x486   :  { %4848 = vmatprep.subr.mxu1 %v5842_v38 }
 0x487   :  { %4849 = vmatpush3.msra.mxu1 %v5982_v36  ;;  %v2306_v36 = vrot.slane %v2305_v62, 2 }
 0x488   :  { %4850 = vmatprep.subr.mxu1 %v5842_v38 }
 0x489   :  { %4851 = vmatpush3.msra.mxu1 %v5987_v10  ;;  %v2307_v10 = vmax.f32 %v2305_v62, %v2306_v36  ;;  %v6721_v62 = vld [vmem:[#allocation25_spill] sm:$0xff]  ;;  %v6722_v36 = vld [vmem:[#allocation26_spill] sm:$0xff] }
 0x48a   :  { %4852 = vmatprep.subr.mxu1 %v5842_v38 }
 0x48b   :  { %4853 = vmatpush3.msra.mxu1 %v5992_v40  ;;  %v2308_v40 = vrot.slane %v2307_v10, 1 }
 0x48c   :  { %4854 = vmatprep.subr.mxu1 %v5842_v38 }
 0x48d   :  { %4855 = vmatpush3.msra.mxu1 %v5997_v43  ;;  %v2309_v43 = vmax.f32 %v2307_v10, %v2308_v40  ;;  %v6724_v40 = vld [vmem:[#allocation28_spill] sm:$0xff] }
 0x48e   :  { %4856 = vmatprep.subr.mxu1 %v5842_v38 }
 0x48f   :  { %4857 = vmatpush3.msra.mxu1 %v6002_v42  ;;  %v2190_v42 = vcombine.high %v6299_v12, %v6299_v12  ;;  %v6416_v12 = vld [vmem:[#allocation15 + $0x30] sm:$0xff] }
 0x490   :  { %4858 = vmatprep.subr.mxu1 %v5842_v38 }
 0x491   :  { %4859 = vmatpush3.msra.mxu1 %v6007_v45  ;;  %v6361_v45 = vld [vmem:[#allocation15 + $0x78] sm:$0xff] }
 0x492   :  { %4860 = vmatprep.subr.mxu1 %v5842_v38  ;;  %4806 = vmatpush3.msra.mxu0 %v6361_v45 }
 0x493   :  { %4861 = vmatpush3.msra.mxu1 %v6012_v47  ;;  %v6363_v47 = vld [vmem:[#allocation15 + $0x70] sm:$0xff]  ;;  %4807 = vmatprep.subr.mxu0 %v5842_v38 }
 0x494   :  { %4862 = vmatprep.subr.mxu1 %v5842_v38  ;;  %4808 = vmatpush3.msra.mxu0 %v6363_v47 }
 0x495   :  { %4863 = vmatpush3.msra.mxu1 %v6017_v0  ;;  %v6366_v0 = vrot.slane %v2190_v42, %v5847_v49  ;;  %4809 = vmatprep.subr.mxu0 %v5842_v38  ;;  %v6725_v42 = vld [vmem:[#allocation29_spill] sm:$0xff] }
 0x496   :  { %4864 = vmatprep.subr.mxu1 %v5842_v38 }
 0x497   :  { %4865 = vmatpush3.msra.mxu1 %v6022_v52  ;;  %v6372_v52 = vld [vmem:[#allocation15 + $0x68] sm:$0xff] }
 0x498   :  { %4866 = vmatprep.subr.mxu1 %v5842_v38  ;;  %4810 = vmatpush3.msra.mxu0 %v6372_v52 }
 0x499   :  { %4867 = vmatpush3.msra.mxu1 %v6027_v50  ;;  %v6378_v50 = vld [vmem:[#allocation15 + $0x60] sm:$0xff]  ;;  %4811 = vmatprep.subr.mxu0 %v5842_v38 }
 0x49a   :  { %4868 = vmatprep.subr.mxu1 %v5842_v38  ;;  %4812 = vmatpush3.msra.mxu0 %v6378_v50 }
 0x49b   :  { %4869 = vmatpush3.msra.mxu1 %v6032_v63  ;;  %v2310_v63 = vsel %vm1195_vm2, %v6366_v0, -inf  ;;  %4813 = vmatprep.subr.mxu0 %v5842_v38 }
 0x49c   :  { %4870 = vmatprep.subr.mxu1 %v5842_v38 }
 0x49d   :  { %4871 = vmatpush3.msra.mxu1 %v6038_v6  ;;  %v6386_v6 = vld [vmem:[#allocation15 + $0x58] sm:$0xff] }
 0x49e   :  { %4873 = vmatmul.mubr.f32.vlgmr.msra.gmra.mxu1 %v2309_v43  ;;  %4910 = vmatprep.subr.mxu1 %v5842_v38 }
 0x49f   :  { %4911 = vmatpush3.msra.mxu1 %v6049_v26  ;;  %4942 = vmatprep.mubr.msk.f32.mxu1 %vm5354_vm10, %v5842_v38  ;;  %v2311_v26 = vrot.slane %v2310_v63, 4 }
 0x4a0   :  { %4912 = vmatprep.subr.mxu1 %v5842_v38  ;;  %4814 = vmatpush3.msra.mxu0 %v6386_v6 }
 0x4a1   :  { %4913 = vmatpush3.msra.mxu1 %v6054_v28  ;;  %v6392_v28 = vld [vmem:[#allocation15 + $0x50] sm:$0xff]  ;;  %4815 = vmatprep.subr.mxu0 %v5842_v38 }
 0x4a2   :  { %4914 = vmatprep.subr.mxu1 %v5842_v38  ;;  %4816 = vmatpush3.msra.mxu0 %v6392_v28 }
 0x4a3   :  { %4915 = vmatpush3.msra.mxu1 %v6059_v1  ;;  %v6398_v1 = vld [vmem:[#allocation15 + $0x48] sm:$0xff]  ;;  %4817 = vmatprep.subr.mxu0 %v5842_v38 }
 0x4a4   :  { %4916 = vmatprep.subr.mxu1 %v5842_v38  ;;  %4818 = vmatpush3.msra.mxu0 %v6398_v1 }
 0x4a5   :  { %4917 = vmatpush3.msra.mxu1 %v6064_v17  ;;  %v2312_v17 = vmax.f32 %v2310_v63, %v2311_v26  ;;  %4819 = vmatprep.subr.mxu0 %v5842_v38  ;;  %v6726_v63 = vld [vmem:[#allocation30_spill] sm:$0xff] }
 0x4a6   :  { %4918 = vmatprep.subr.mxu1 %v5842_v38 }
 0x4a7   :  { %4919 = vmatpush3.msra.mxu1 %v6070_v34  ;;  %v6404_v34 = vld [vmem:[#allocation15 + $0x40] sm:$0xff] }
 0x4a8   :  { %4920 = vmatprep.subr.mxu1 %v5842_v38  ;;  %4820 = vmatpush3.msra.mxu0 %v6404_v34 }
 0x4a9   :  { %4921 = vmatpush3.msra.mxu1 %v6076_v13  ;;  %v6410_v13 = vld [vmem:[#allocation15 + $0x38] sm:$0xff]  ;;  %4821 = vmatprep.subr.mxu0 %v5842_v38 }
 0x4aa   :  { %4922 = vmatprep.subr.mxu1 %v5842_v38  ;;  %4822 = vmatpush3.msra.mxu0 %v6410_v13 }
 0x4ab   :  { %4923 = vmatpush3.msra.mxu1 %v6081_v58  ;;  %v2313_v58 = vrot.slane %v2312_v17, 2  ;;  %4823 = vmatprep.subr.mxu0 %v5842_v38 }
 0x4ac   :  { %4924 = vmatprep.subr.mxu1 %v5842_v38  ;;  %4824 = vmatpush3.msra.mxu0 %v6416_v12 }
 0x4ad   :  { %4925 = vmatpush3.msra.mxu1 %v6086_v48  ;;  %v4172_v48 = vpop.f32.mrf.mxu0  ;;  %v2314_v20 = vmax.f32 %v2312_v17, %v2313_v58  ;;  %4825 = vmatprep.subr.mxu0 %v5842_v38  ;;  %v6727_v17 = vld [vmem:[#allocation31_spill] sm:$0xff]  ;;  %v6728_v58 = vld [vmem:[#allocation32_spill] sm:$0xff] }
 0x4ae   :  { %4926 = vmatprep.subr.mxu1 %v5842_v38 }
 0x4af   :  { %4927 = vmatpush3.msra.mxu1 %v6091_v59  ;;  %v6422_v59 = vld [vmem:[#allocation15 + $0x28] sm:$0xff] }
 0x4b0   :  { %4928 = vmatprep.subr.mxu1 %v5842_v38  ;;  %4826 = vmatpush3.msra.mxu0 %v6422_v59 }
 0x4b1   :  { %4929 = vmatpush3.msra.mxu1 %v6096_v56  ;;  %v4173_v56 = vpop.f32.mrf.mxu0  ;;  %4827 = vmatprep.subr.mxu0 %v5842_v38 }
 0x4b2   :  { %4930 = vmatprep.subr.mxu1 %v5842_v38  ;;  %v4174_v30 = vadd.f32 %v4173_v56, %v4172_v48  ;;  %4828 = vmatpush3.msra.mxu0 %v6441_v4 }
 0x4b3   :  { %4931 = vmatpush3.msra.mxu1 %v6101_v37  ;;  %v2315_v37 = vrot.slane %v2314_v20, 1  ;;  %4829 = vmatprep.subr.mxu0 %v5842_v38 }
 0x4b4   :  { %4932 = vmatprep.subr.mxu1 %v5842_v38  ;;  %v6438_v3 = vmax.f32 %v4174_v30, %v4218_v57 }
 0x4b5   :  { %4933 = vmatpush3.msra.mxu1 %v6106_v15  ;;  %v2316_v15 = vmax.f32 %v2314_v20, %v2315_v37 }
 0x4b6   :  { %4934 = vmatprep.subr.mxu1 %v5842_v38  ;;  %v2207_v35 = vcombine.high %v6438_v3, %v6438_v3 }
 0x4b7   :  { %4935 = vmatpush3.msra.mxu1 %v6111_v16  ;;  %v6451_v16 = vrot.slane %v6438_v3, %v5847_v49  ;;  %v3158_v3 = vld [vmem:[#allocation13 + $0x70] sm:$0xff] }
 0x4b8   :  { %4936 = vmatprep.subr.mxu1 %v5842_v38 }
 0x4b9   :  { %4937 = vmatpush3.msra.mxu1 %v6116_v18  ;;  %v2324_v18 = vsel %vm1195_vm2, %v6451_v16, -inf }
 0x4ba   :  { %4938 = vmatprep.subr.mxu1 %v5842_v38 }
 0x4bb   :  { %4939 = vmatpush3.msra.mxu1 %v6121_v60  ;;  %v6463_v60 = vld [vmem:[#allocation15 + $0x18] sm:$0xff] }
 0x4bc   :  { %4940 = vmatprep.subr.mxu1 %v5842_v38  ;;  %4830 = vmatpush3.msra.mxu0 %v6463_v60 }
 0x4bd   :  { %4941 = vmatpush3.msra.mxu1 %v6128_v29  ;;  %v6465_v29 = vld [vmem:[#allocation15 + $0x10] sm:$0xff]  ;;  %4831 = vmatprep.subr.mxu0 %v5842_v38 }
 0x4be   :  { %4943 = vmatmul.mubr.f32.vlgmr.msra.gmra.mxu1 %v2316_v15  ;;  %4980 = vmatprep.subr.mxu1 %v5842_v38  ;;  %v3159_v15 = vld [vmem:[#allocation13 + $0x78] sm:$0xff] }
 0x4bf   :  { %4981 = vmatpush3.msra.mxu1 %v6136_v33  ;;  %5012 = vmatprep.mubr.msk.f32.mxu1 %vm5354_vm10, %v5842_v38  ;;  %v2325_v33 = vrot.slane %v2324_v18, 4 }
 0x4c0   :  { %4982 = vmatprep.subr.mxu1 %v5842_v38  ;;  %4832 = vmatpush3.msra.mxu0 %v6465_v29 }
 0x4c1   :  { %4983 = vmatpush3.msra.mxu1 %v6141_v2  ;;  %v6471_v2 = vld [vmem:[#allocation15 + $0x8] sm:$0xff]  ;;  %4833 = vmatprep.subr.mxu0 %v5842_v38 }
 0x4c2   :  { %4984 = vmatprep.subr.mxu1 %v5842_v38  ;;  %4834 = vmatpush3.msra.mxu0 %v6471_v2 }
 0x4c3   :  { %4985 = vmatpush3.msra.mxu1 %v6146_v44  ;;  %v6477_v44 = vld [vmem:[#allocation15] sm:$0xff]  ;;  %4835 = vmatprep.subr.mxu0 %v5842_v38 }
 0x4c4   :  { %4986 = vmatprep.subr.mxu1 %v5842_v38  ;;  %4836 = vmatpush3.msra.mxu0 %v6477_v44 }
 0x4c5   :  { %4987 = vmatpush3.msra.mxu1 %v6151_v51  ;;  %v2326_v51 = vmax.f32 %v2324_v18, %v2325_v33  ;;  %4875 = vmatprep.subr.mxu0 %v5842_v38  ;;  %v3156_v18 = vld [vmem:[#allocation13 + $0x60] sm:$0xff]  ;;  %v3154_v33 = vld [vmem:[#allocation13 + $0x50] sm:$0xff] }
 0x4c6   :  { %4988 = vmatprep.subr.mxu1 %v5842_v38 }
 0x4c7   :  { %4989 = vmatpush3.msra.mxu1 %v6157_v8  ;;  %v2327_v8 = vrot.slane %v2326_v51, 2 }
 0x4c8   :  { %4990 = vmatprep.subr.mxu1 %v5842_v38 }
 0x4c9   :  { %4991 = vmatpush3.msra.mxu1 %v6162_v11  ;;  %v2328_v11 = vmax.f32 %v2326_v51, %v2327_v8  ;;  %v3152_v51 = vld [vmem:[#allocation13 + $0x40] sm:$0xff] }
 0x4ca   :  { %4992 = vmatprep.subr.mxu1 %v5842_v38 }
 0x4cb   :  { %4993 = vmatpush3.msra.mxu1 %v6168_v14  ;;  %v2329_v14 = vrot.slane %v2328_v11, 1 }
 0x4cc   :  { %4994 = vmatprep.subr.mxu1 %v5842_v38 }
 0x4cd   :  { %4995 = vmatpush3.msra.mxu1 %v6173_v24 }
 0x4ce   :  { %4996 = vmatprep.subr.mxu1 %v5842_v38 }
 0x4cf   :  { %4997 = vmatpush3.msra.mxu1 %v6178_v54 }
 0x4d0   :  { %4998 = vmatprep.subr.mxu1 %v5842_v38 }
 0x4d1   :  { %4999 = vmatpush3.msra.mxu1 %v6183_v19 }
 0x4d2   :  { %5000 = vmatprep.subr.mxu1 %v5842_v38 }
 0x4d3   :  { %5001 = vmatpush3.msra.mxu1 %v6188_v61  ;;  %v2330_v61 = vmax.f32 %v2328_v11, %v2329_v14  ;;  %v3151_v11 = vld [vmem:[#allocation13 + $0x38] sm:$0xff] }
 0x4d4   :  { %5002 = vmatprep.subr.mxu1 %v5842_v38 }
 0x4d5   :  { %5003 = vmatpush3.msra.mxu1 %v6193_v31 }
 0x4d6   :  { %5004 = vmatprep.subr.mxu1 %v5842_v38 }
 0x4d7   :  { %5005 = vmatpush3.msra.mxu1 %v6198_v7 }
 0x4d8   :  { %5006 = vmatprep.subr.mxu1 %v5842_v38 }
 0x4d9   :  { %5007 = vmatpush3.msra.mxu1 %v6203_v46  ;;  %v2521_v24 = vpop.f32.mrf.mxu1  ;;  %v6718_v46 = vld [vmem:[#allocation22_spill] sm:$0xff] }
 0x4da   :  { %5008 = vmatprep.subr.mxu1 %v5842_v38 }
 0x4db   :  { %5009 = vmatpush3.msra.mxu1 %v6208_v23  ;;  %v2451_v54 = vpop.f32.mrf.mxu0  ;;  %v4594_v19 = vpop.f32.mrf.mxu1  ;;  %v6509_v23 = vrot.slane %v2207_v35, %v5847_v49  ;;  %v6723_v49 = vld [vmem:[#allocation27_spill] sm:$0xff] }
 0x4dc   :  { %5010 = vmatprep.subr.mxu1 %v5842_v38  ;;  %v2522_v31 = vadd.f32 %v2521_v24, %v2451_v54  ;;  %v3149_v24 = vld [vmem:[#allocation13 + $0x28] sm:$0xff]  ;;  %v3148_v54 = vld [vmem:[#allocation13 + $0x20] sm:$0xff] }
 0x4dd   :  { %5011 = vmatpush3.msra.mxu1 %v6217_v39  ;;  %v4559_v7 = vpop.f32.mrf.mxu0  ;;  %v2338_v39 = vsel %vm1195_vm2, %v6509_v23, -inf }
 0x4de   :  { %5013 = vmatmul.mubr.f32.vlgmr.msra.gmra.mxu1 %v2330_v61  ;;  %5050 = vmatprep.subr.mxu1 %v5842_v38  ;;  %v2339_v10 = vrot.slane %v2338_v39, 4  ;;  %v3147_v61 = vld [vmem:[#allocation13 + $0x18] sm:$0xff]  ;;  %v3146_v7 = vld [vmem:[#allocation13 + $0x10] sm:$0xff] }
 0x4df   :  { %5051 = vmatpush3.msra.mxu1 %v6718_v46  ;;  %5082 = vmatprep.mubr.msk.f32.mxu1 %vm5354_vm10, %v5842_v38  ;;  %v3145_v46 = vld [vmem:[#allocation13 + $0x8] sm:$0xff] }
 0x4e0   :  { %5052 = vmatprep.subr.mxu1 %v5842_v38  ;;  %v2340_v43 = vmax.f32 %v2338_v39, %v2339_v10  ;;  %v3416_v10 = vld [vmem:[#allocation13 + $0x1e8] sm:$0xff] }
 0x4e1   :  { %5053 = vmatpush3.msra.mxu1 %v6719_v21 }
 0x4e2   :  { %5054 = vmatprep.subr.mxu1 %v5842_v38  ;;  %v2341_v26 = vrot.slane %v2340_v43, 2 }
 0x4e3   :  { %5055 = vmatpush3.msra.mxu1 %v6720_v5  ;;  %v3144_v5 = vld [vmem:[#allocation13] sm:$0xff] }
 0x4e4   :  { %5056 = vmatprep.subr.mxu1 %v5842_v38  ;;  %v2342_v48 = vmax.f32 %v2340_v43, %v2341_v26  ;;  %v3414_v43 = vld [vmem:[#allocation13 + $0x1d8] sm:$0xff] }
 0x4e5   :  { %5057 = vmatpush3.msra.mxu1 %v6721_v62  ;;  %v3418_v62 = vld [vmem:[#allocation13 + $0x1f8] sm:$0xff] }
 0x4e6   :  { %5058 = vmatprep.subr.mxu1 %v5842_v38  ;;  %v2343_v53 = vrot.slane %v2342_v48, 1 }
 0x4e7   :  { %5059 = vmatpush3.msra.mxu1 %v6722_v36  ;;  %v3417_v36 = vld [vmem:[#allocation13 + $0x1f0] sm:$0xff] }
 0x4e8   :  { %5060 = vmatprep.subr.mxu1 %v5842_v38  ;;  %v2344_v22 = vmax.f32 %v2342_v48, %v2343_v53  ;;  %v3409_v53 = vld [vmem:[#allocation13 + $0x1b0] sm:$0xff] }
 0x4e9   :  { %5061 = vmatpush3.msra.mxu1 %v6723_v49  ;;  %v2206_v49 = vcombine.high %v6366_v0, %v6366_v0  ;;  %v3411_v0 = vld [vmem:[#allocation13 + $0x1c0] sm:$0xff] }
 0x4ea   :  { %5062 = vmatprep.subr.mxu1 %v5842_v38 }
 0x4eb   :  { %5063 = vmatpush3.msra.mxu1 %v6724_v40  ;;  %v3415_v40 = vld [vmem:[#allocation13 + $0x1e0] sm:$0xff] }
 0x4ec   :  { %5064 = vmatprep.subr.mxu1 %v5842_v38 }
 0x4ed   :  { %5065 = vmatpush3.msra.mxu1 %v6725_v42  ;;  %v2317_v42 = vsel %vm1195_vm2, %v2206_v49, -inf  ;;  %v3757_v49 = vld [vmem:[#allocation13 + $0x3b0] sm:$0xff] }
 0x4ee   :  { %5066 = vmatprep.subr.mxu1 %v5842_v38  ;;  %v2318_v26 = vrot.slane %v2317_v42, 4 }
 0x4ef   :  { %5067 = vmatpush3.msra.mxu1 %v6726_v63  ;;  %v3413_v63 = vld [vmem:[#allocation13 + $0x1d0] sm:$0xff] }
 0x4f0   :  { %5068 = vmatprep.subr.mxu1 %v5842_v38  ;;  %v2319_v48 = vmax.f32 %v2317_v42, %v2318_v26  ;;  %v3755_v42 = vld [vmem:[#allocation13 + $0x3a0] sm:$0xff]  ;;  %v3754_v26 = vld [vmem:[#allocation13 + $0x398] sm:$0xff] }
 0x4f1   :  { %5069 = vmatpush3.msra.mxu1 %v6727_v17  ;;  %v3412_v17 = vld [vmem:[#allocation13 + $0x1c8] sm:$0xff] }
 0x4f2   :  { %5070 = vmatprep.subr.mxu1 %v5842_v38 }
 0x4f3   :  { %5071 = vmatpush3.msra.mxu1 %v6728_v58  ;;  %v3410_v58 = vld [vmem:[#allocation13 + $0x1b8] sm:$0xff] }
 0x4f4   :  { %5072 = vmatprep.subr.mxu1 %v5842_v38 }
 0x4f5   :  { %5073 = vmatpush3.msra.mxu1 %v6282_v25 }
 0x4f6   :  { %5074 = vmatprep.subr.mxu1 %v5842_v38 }
 0x4f7   :  { %5075 = vmatpush3.msra.mxu1 %v6287_v32 }
 0x4f8   :  { %5076 = vmatprep.subr.mxu1 %v5842_v38 }
 0x4f9   :  { %5077 = vmatpush3.msra.mxu1 %v6292_v55  ;;  %v2696_v20 = vpop.f32.mrf.mxu1 }
 0x4fa   :  { %5078 = vmatprep.subr.mxu1 %v5842_v38 }
 0x4fb   :  { %5079 = vmatpush3.msra.mxu1 %v6297_v9  ;;  %v4664_v56 = vpop.f32.mrf.mxu1 }
 0x4fc   :  { %5080 = vmatprep.subr.mxu1 %v5842_v38  ;;  %v2608_v37 = vpop.f32.mrf.mxu0  ;;  %v2320_v56 = vrot.slane %v2319_v48, 2 }
 0x4fd   :  { %5081 = vmatpush3.msra.mxu1 %v6306_v27  ;;  %v2612_v25 = vadd.f32 %v2608_v37, %v2522_v31 }
 0x4fe   :  { %5083 = vmatmul.mubr.f32.vlgmr.msra.gmra.mxu1 %v2344_v22  ;;  %v4629_v32 = vpop.f32.mrf.mxu0  ;;  %5120 = vmatprep.subr.mxu1 %v5842_v38  ;;  %v3407_v22 = vld [vmem:[#allocation13 + $0x1a0] sm:$0xff] }
 0x4ff   :  { %v2700_v30 = vadd.f32 %v2696_v20, %v2612_v25  ;;  %5121 = vmatpush3.msra.mxu1 %v6361_v45  ;;  %5152 = vmatprep.mubr.msk.f32.mxu1 %vm5354_vm10, %v5842_v38  ;;  %v3408_v20 = vld [vmem:[#allocation13 + $0x1a8] sm:$0xff]  ;;  %v3406_v25 = vld [vmem:[#allocation13 + $0x198] sm:$0xff]  ;;  %v2321_v32 = vmax.f32 %v2319_v48, %v2320_v56 }
 0x500   :  { %5122 = vmatprep.subr.mxu1 %v5842_v38  ;;  %v3752_v48 = vld [vmem:[#allocation13 + $0x388] sm:$0xff] }
 0x501   :  { %5123 = vmatpush3.msra.mxu1 %v6363_v47 }
 0x502   :  { %5124 = vmatprep.subr.mxu1 %v5842_v38 }
 0x503   :  { %5125 = vmatpush3.msra.mxu1 %v6372_v52 }
 0x504   :  { %5126 = vmatprep.subr.mxu1 %v5842_v38 }
 0x505   :  { %5127 = vmatpush3.msra.mxu1 %v6378_v50 }
 0x506   :  { %5128 = vmatprep.subr.mxu1 %v5842_v38 }
 0x507   :  { %5129 = vmatpush3.msra.mxu1 %v6386_v6 }
 0x508   :  { %5130 = vmatprep.subr.mxu1 %v5842_v38 }
 0x509   :  { %5131 = vmatpush3.msra.mxu1 %v6392_v28 }
 0x50a   :  { %5132 = vmatprep.subr.mxu1 %v5842_v38 }
 0x50b   :  { %5133 = vmatpush3.msra.mxu1 %v6398_v1 }
 0x50c   :  { %5134 = vmatprep.subr.mxu1 %v5842_v38 }
 0x50d   :  { %5135 = vmatpush3.msra.mxu1 %v6404_v34  ;;  %v3053_v34 = vld [vmem:[%s6692_s10] sm:$0x1] }
 0x50e   :  { %5136 = vmatprep.subr.mxu1 %v5842_v38 }
 0x50f   :  { %5137 = vmatpush3.msra.mxu1 %v6410_v13 }
 0x510   :  { %5138 = vmatprep.subr.mxu1 %v5842_v38 }
 0x511   :  { %5139 = vmatpush3.msra.mxu1 %v6416_v12 }
 0x512   :  { %5140 = vmatprep.subr.mxu1 %v5842_v38 }
 0x513   :  { %5141 = vmatpush3.msra.mxu1 %v6422_v59 }
 0x514   :  { %5142 = vmatprep.subr.mxu1 %v5842_v38 }
 0x515   :  { %5143 = vmatpush3.msra.mxu1 %v6441_v4  ;;  %v3157_v4 = vld [vmem:[#allocation13 + $0x68] sm:$0xff] }
 0x516   :  { %5144 = vmatprep.subr.mxu1 %v5842_v38 }
 0x517   :  { %5145 = vmatpush3.msra.mxu1 %v6463_v60  ;;  %v3155_v60 = vld [vmem:[#allocation13 + $0x58] sm:$0xff] }
 0x518   :  { %5146 = vmatprep.subr.mxu1 %v5842_v38 }
 0x519   :  { %5147 = vmatpush3.msra.mxu1 %v6465_v29  ;;  %v2296_v29 = vsel %vm1195_vm2, %v6312_v41, -inf  ;;  %v3150_v41 = vld [vmem:[#allocation13 + $0x30] sm:$0xff] }
 0x51a   :  { %5148 = vmatprep.subr.mxu1 %v5842_v38 }
 0x51b   :  { %v2872_v55 = vpop.f32.mrf.mxu1  ;;  %5149 = vmatpush3.msra.mxu1 %v6471_v2  ;;  %v2297_v2 = vrot.slane %v2296_v29, 4 }
 0x51c   :  { %5150 = vmatprep.subr.mxu1 %v5842_v38 }
 0x51d   :  { %v4734_v9 = vpop.f32.mrf.mxu1  ;;  %5151 = vmatpush3.msra.mxu1 %v6477_v44  ;;  %v3153_v44 = vld [vmem:[#allocation13 + $0x48] sm:$0xff]  ;;  %v2298_v8 = vmax.f32 %v2296_v29, %v2297_v2  ;;  %v3581_v29 = vld [vmem:[#allocation13 + $0x2a0] sm:$0xff]  ;;  %v3580_v2 = vld [vmem:[#allocation13 + $0x298] sm:$0xff] }
 0x51e   :  { %v2784_v27 = vpop.f32.mrf.mxu0  ;;  %v3404_v9 = vld [vmem:[#allocation13 + $0x188] sm:$0xff] }
 0x51f   :  { %v2788_v47 = vadd.f32 %v2784_v27, %v2700_v30  ;;  %v2299_v14 = vrot.slane %v2298_v8, 2  ;;  %v2322_v27 = vrot.slane %v2321_v32, 1 }
 0x520   :  { %v4699_v45 = vpop.f32.mrf.mxu0 }
 0x521   :  { %v2876_v50 = vadd.f32 %v2872_v55, %v2788_v47  ;;  %v2300_v31 = vmax.f32 %v2298_v8, %v2299_v14  ;;  %v3405_v55 = vld [vmem:[#allocation13 + $0x190] sm:$0xff]  ;;  %v3403_v45 = vld [vmem:[#allocation13 + $0x180] sm:$0xff]  ;;  %v2323_v47 = vmax.f32 %v2321_v32, %v2322_v27 }
 0x522   :  { %v3579_v8 = vld [vmem:[#allocation13 + $0x290] sm:$0xff]  ;;  %v3577_v14 = vld [vmem:[#allocation13 + $0x280] sm:$0xff] }
 0x523   :  { %v2301_v21 = vrot.slane %v2300_v31, 1 }
 0x525   :  { %v2302_v39 = vmax.f32 %v2300_v31, %v2301_v21  ;;  %v3764_v31 = vld [vmem:[#allocation13 + $0x3e8] sm:$0xff] }
 0x53d   :  { %v3048_v52 = vpop.f32.mrf.mxu1 }
 0x53f   :  { %v4804_v6 = vpop.f32.mrf.mxu1 }
 0x540   :  { %v2960_v28 = vpop.f32.mrf.mxu0  ;;  %v3590_v6 = vld [vmem:[#allocation13 + $0x2e8] sm:$0xff] }
 0x541   :  { %v2964_v1 = vadd.f32 %v2960_v28, %v2876_v50  ;;  %v3591_v50 = vld [vmem:[#allocation13 + $0x2f0] sm:$0xff]  ;;  %v2222_v28 = vcombine.high %v6451_v16, %v6451_v16  ;;  %v3585_v16 = vld [vmem:[#allocation13 + $0x2c0] sm:$0xff] }
 0x542   :  { %v4769_v13 = vpop.f32.mrf.mxu0 }
 0x543   :  { %v3052_v12 = vadd.f32 %v3048_v52, %v2964_v1  ;;  %v3592_v52 = vld [vmem:[#allocation13 + $0x2f8] sm:$0xff]  ;;  %v3589_v1 = vld [vmem:[#allocation13 + $0x2e0] sm:$0xff]  ;;  %v2331_v13 = vsel %vm1195_vm2, %v2222_v28, -inf }
 0x545   :  { %v3054_v59 = vadd.f32 %v3053_v34, %v3052_v12  ;;  %v3588_v34 = vld [vmem:[#allocation13 + $0x2d8] sm:$0xff]  ;;  %v3587_v12 = vld [vmem:[#allocation13 + $0x2d0] sm:$0xff] }
 0x547   :  { %v3055_v57 = vmax.f32 %v3054_v59, 0.0  ;;  %v2332_v59 = vrot.slane %v2331_v13, 4 }
 0x549   :  { %4838 = vmatmul.mubr.f32.vlgmr.msra.gmra.mxu0 %v3055_v57  ;;  %v3586_v57 = vld [vmem:[#allocation13 + $0x2c8] sm:$0xff] }
 0x54a   :  { %4876 = vmatpush3.msra.mxu0 %v3159_v15  ;;  %4907 = vmatprep.mubr.msk.f32.mxu0 %vm5354_vm10, %v5842_v38  ;;  %v2333_v15 = vmax.f32 %v2331_v13, %v2332_v59 }
 0x54b   :  { %4877 = vmatprep.subr.mxu0 %v5842_v38 }
 0x54c   :  { %4878 = vmatpush3.msra.mxu0 %v3158_v3  ;;  %v3584_v3 = vld [vmem:[#allocation13 + $0x2b8] sm:$0xff] }
 0x54d   :  { %4879 = vmatprep.subr.mxu0 %v5842_v38 }
 0x54e   :  { %4880 = vmatpush3.msra.mxu0 %v3157_v4  ;;  %v3583_v4 = vld [vmem:[#allocation13 + $0x2b0] sm:$0xff] }
 0x54f   :  { %4881 = vmatprep.subr.mxu0 %v5842_v38 }
 0x550   :  { %4882 = vmatpush3.msra.mxu0 %v3156_v18  ;;  %v3582_v18 = vld [vmem:[#allocation13 + $0x2a8] sm:$0xff] }
 0x551   :  { %4883 = vmatprep.subr.mxu0 %v5842_v38 }
 0x552   :  { %4884 = vmatpush3.msra.mxu0 %v3155_v60  ;;  %v2334_v60 = vrot.slane %v2333_v15, 2 }
 0x553   :  { %4885 = vmatprep.subr.mxu0 %v5842_v38 }
 0x554   :  { %4886 = vmatpush3.msra.mxu0 %v3154_v33 }
 0x555   :  { %4887 = vmatprep.subr.mxu0 %v5842_v38 }
 0x556   :  { %4888 = vmatpush3.msra.mxu0 %v3153_v44  ;;  %v2335_v44 = vmax.f32 %v2333_v15, %v2334_v60 }
 0x557   :  { %4889 = vmatprep.subr.mxu0 %v5842_v38 }
 0x558   :  { %4890 = vmatpush3.msra.mxu0 %v3152_v51 }
 0x559   :  { %4891 = vmatprep.subr.mxu0 %v5842_v38 }
 0x55a   :  { %4892 = vmatpush3.msra.mxu0 %v3151_v11  ;;  %v3578_v11 = vld [vmem:[#allocation13 + $0x288] sm:$0xff] }
 0x55b   :  { %4893 = vmatprep.subr.mxu0 %v5842_v38 }
 0x55c   :  { %4894 = vmatpush3.msra.mxu0 %v3150_v41  ;;  %v2336_v41 = vrot.slane %v2335_v44, 1 }
 0x55d   :  { %4895 = vmatprep.subr.mxu0 %v5842_v38 }
 0x55e   :  { %4896 = vmatpush3.msra.mxu0 %v3149_v24  ;;  %v6593_v19 = vpop.f32.mrf.mxu1  ;;  %v2337_v24 = vmax.f32 %v2335_v44, %v2336_v41 }
 0x55f   :  { %4897 = vmatprep.subr.mxu0 %v5842_v38 }
 0x560   :  { %4898 = vmatpush3.msra.mxu0 %v3148_v54  ;;  %v4874_v35 = vpop.f32.mrf.mxu1  ;;  %v3766_v54 = vld [vmem:[#allocation13 + $0x3f8] sm:$0xff] }
 0x561   :  { %4899 = vmatprep.subr.mxu0 %v5842_v38  ;;  %v2223_v35 = vcombine.high %v6509_v23, %v6509_v23  ;;  %v3759_v23 = vld [vmem:[#allocation13 + $0x3c0] sm:$0xff] }
 0x562   :  { %4900 = vmatpush3.msra.mxu0 %v3147_v61  ;;  %v3765_v61 = vld [vmem:[#allocation13 + $0x3f0] sm:$0xff] }
 0x563   :  { %4901 = vmatprep.subr.mxu0 %v5842_v38  ;;  %v2345_v21 = vsel %vm1195_vm2, %v2223_v35, -inf }
 0x564   :  { %4902 = vmatpush3.msra.mxu0 %v3146_v7  ;;  %v3763_v7 = vld [vmem:[#allocation13 + $0x3e0] sm:$0xff] }
 0x565   :  { %4903 = vmatprep.subr.mxu0 %v5842_v38 }
 0x566   :  { %4904 = vmatpush3.msra.mxu0 %v3145_v46  ;;  %v3762_v46 = vld [vmem:[#allocation13 + $0x3d8] sm:$0xff] }
 0x567   :  { %4905 = vmatprep.subr.mxu0 %v5842_v38 }
 0x568   :  { %4906 = vmatpush3.msra.mxu0 %v3144_v5  ;;  %v3761_v5 = vld [vmem:[#allocation13 + $0x3d0] sm:$0xff] }
 0x569   :  { %4908 = vmatmul.mubr.f32.vlgmr.msra.gmra.mxu0 %v2302_v39  ;;  %4945 = vmatprep.subr.mxu0 %v5842_v38  ;;  %v2346_v39 = vrot.slane %v2345_v21, 4 }
 0x56a   :  { %4946 = vmatpush3.msra.mxu0 %v3418_v62  ;;  %4977 = vmatprep.mubr.msk.f32.mxu0 %vm5354_vm10, %v5842_v38  ;;  %v3760_v62 = vld [vmem:[#allocation13 + $0x3c8] sm:$0xff] }
 0x56b   :  { %4947 = vmatprep.subr.mxu0 %v5842_v38 }
 0x56c   :  { %4948 = vmatpush3.msra.mxu0 %v3417_v36  ;;  %v3758_v36 = vld [vmem:[#allocation13 + $0x3b8] sm:$0xff] }
 0x56d   :  { %4949 = vmatprep.subr.mxu0 %v5842_v38 }
 0x56e   :  { %4950 = vmatpush3.msra.mxu0 %v3416_v10  ;;  %v2347_v10 = vmax.f32 %v2345_v21, %v2346_v39 }
 0x56f   :  { %4951 = vmatprep.subr.mxu0 %v5842_v38 }
 0x570   :  { %4952 = vmatpush3.msra.mxu0 %v3415_v40  ;;  %v3756_v40 = vld [vmem:[#allocation13 + $0x3a8] sm:$0xff] }
 0x571   :  { %4953 = vmatprep.subr.mxu0 %v5842_v38 }
 0x572   :  { %4954 = vmatpush3.msra.mxu0 %v3414_v43  ;;  %v2348_v43 = vrot.slane %v2347_v10, 2 }
 0x573   :  { %4955 = vmatprep.subr.mxu0 %v5842_v38 }
 0x574   :  { %4956 = vmatpush3.msra.mxu0 %v3413_v63 }
 0x575   :  { %4957 = vmatprep.subr.mxu0 %v5842_v38 }
 0x576   :  { %4958 = vmatpush3.msra.mxu0 %v3412_v17  ;;  %v2349_v17 = vmax.f32 %v2347_v10, %v2348_v43 }
 0x577   :  { %4959 = vmatprep.subr.mxu0 %v5842_v38 }
 0x578   :  { %4960 = vmatpush3.msra.mxu0 %v3411_v0 }
 0x579   :  { %4961 = vmatprep.subr.mxu0 %v5842_v38 }
 0x57a   :  { %4962 = vmatpush3.msra.mxu0 %v3410_v58  ;;  %v3753_v58 = vld [vmem:[#allocation13 + $0x390] sm:$0xff] }
 0x57b   :  { %4963 = vmatprep.subr.mxu0 %v5842_v38 }
 0x57c   :  { %4964 = vmatpush3.msra.mxu0 %v3409_v53  ;;  %v2350_v53 = vrot.slane %v2349_v17, 1 }
 0x57d   :  { %4965 = vmatprep.subr.mxu0 %v5842_v38 }
 0x57e   :  { %4966 = vmatpush3.msra.mxu0 %v3408_v20  ;;  %v6616_v37 = vpop.f32.mrf.mxu1  ;;  %v3751_v20 = vld [vmem:[#allocation13 + $0x380] sm:$0xff]  ;;  %v2351_v56 = vmax.f32 %v2349_v17, %v2350_v53 }
 0x57f   :  { %4967 = vmatprep.subr.mxu0 %v5842_v38 }
 0x580   :  { %4968 = vmatpush3.msra.mxu0 %v3407_v22  ;;  %v4944_v30 = vpop.f32.mrf.mxu1  ;;  %v3072_v22 = vld [vmem:[%s6694_s12] sm:$0x1] }
 0x581   :  { %4969 = vmatprep.subr.mxu0 %v5842_v38 }
 0x582   :  { %4970 = vmatpush3.msra.mxu0 %v3406_v25 }
 0x583   :  { %4971 = vmatprep.subr.mxu0 %v5842_v38 }
 0x584   :  { %4972 = vmatpush3.msra.mxu0 %v3405_v55 }
 0x585   :  { %4973 = vmatprep.subr.mxu0 %v5842_v38 }
 0x586   :  { %4974 = vmatpush3.msra.mxu0 %v3404_v9 }
 0x587   :  { %4975 = vmatprep.subr.mxu0 %v5842_v38 }
 0x588   :  { %4976 = vmatpush3.msra.mxu0 %v3403_v45 }
 0x589   :  { %4978 = vmatmul.mubr.f32.vlgmr.msra.gmra.mxu0 %v2323_v47  ;;  %5015 = vmatprep.subr.mxu0 %v5842_v38 }
 0x58a   :  { %5016 = vmatpush3.msra.mxu0 %v3592_v52  ;;  %5047 = vmatprep.mubr.msk.f32.mxu0 %vm5354_vm10, %v5842_v38 }
 0x58b   :  { %5017 = vmatprep.subr.mxu0 %v5842_v38 }
 0x58c   :  { %5018 = vmatpush3.msra.mxu0 %v3591_v50 }
 0x58d   :  { %5019 = vmatprep.subr.mxu0 %v5842_v38 }
 0x58e   :  { %5020 = vmatpush3.msra.mxu0 %v3590_v6 }
 0x58f   :  { %5021 = vmatprep.subr.mxu0 %v5842_v38 }
 0x590   :  { %5022 = vmatpush3.msra.mxu0 %v3589_v1 }
 0x591   :  { %5023 = vmatprep.subr.mxu0 %v5842_v38 }
 0x592   :  { %5024 = vmatpush3.msra.mxu0 %v3588_v34 }
 0x593   :  { %5025 = vmatprep.subr.mxu0 %v5842_v38 }
 0x594   :  { %5026 = vmatpush3.msra.mxu0 %v3587_v12  ;;  %v3838_v12 = vld [vmem:[%s6692_s10] sm:$0x1] }
 0x595   :  { %5027 = vmatprep.subr.mxu0 %v5842_v38 }
 0x596   :  { %5028 = vmatpush3.msra.mxu0 %v3586_v57 }
 0x597   :  { %5029 = vmatprep.subr.mxu0 %v5842_v38 }
 0x598   :  { %5030 = vmatpush3.msra.mxu0 %v3585_v16 }
 0x599   :  { %5031 = vmatprep.subr.mxu0 %v5842_v38 }
 0x59a   :  { %5032 = vmatpush3.msra.mxu0 %v3584_v3 }
 0x59b   :  { %5033 = vmatprep.subr.mxu0 %v5842_v38 }
 0x59c   :  { %5034 = vmatpush3.msra.mxu0 %v3583_v4 }
 0x59d   :  { %5035 = vmatprep.subr.mxu0 %v5842_v38 }
 0x59e   :  { %5036 = vmatpush3.msra.mxu0 %v3582_v18  ;;  %v6639_v33 = vpop.f32.mrf.mxu1 }
 0x59f   :  { %5037 = vmatprep.subr.mxu0 %v5842_v38 }
 0x5a0   :  { %5038 = vmatpush3.msra.mxu0 %v3581_v29  ;;  %v5014_v51 = vpop.f32.mrf.mxu1 }
 0x5a1   :  { %5039 = vmatprep.subr.mxu0 %v5842_v38 }
 0x5a2   :  { %5040 = vmatpush3.msra.mxu0 %v3580_v2 }
 0x5a3   :  { %5041 = vmatprep.subr.mxu0 %v5842_v38 }
 0x5a4   :  { %5042 = vmatpush3.msra.mxu0 %v3579_v8 }
 0x5a5   :  { %5043 = vmatprep.subr.mxu0 %v5842_v38 }
 0x5a6   :  { %5044 = vmatpush3.msra.mxu0 %v3578_v11 }
 0x5a7   :  { %5045 = vmatprep.subr.mxu0 %v5842_v38 }
 0x5a8   :  { %5046 = vmatpush3.msra.mxu0 %v3577_v14 }
 0x5a9   :  { %5048 = vmatmul.mubr.f32.vlgmr.msra.gmra.mxu0 %v2337_v24  ;;  %5085 = vmatprep.subr.mxu0 %v5842_v38 }
 0x5aa   :  { %5086 = vmatpush3.msra.mxu0 %v3766_v54  ;;  %5117 = vmatprep.mubr.msk.f32.mxu0 %vm5354_vm10, %v5842_v38 }
 0x5ab   :  { %5087 = vmatprep.subr.mxu0 %v5842_v38 }
 0x5ac   :  { %5088 = vmatpush3.msra.mxu0 %v3765_v61 }
 0x5ad   :  { %5089 = vmatprep.subr.mxu0 %v5842_v38 }
 0x5ae   :  { %5090 = vmatpush3.msra.mxu0 %v3764_v31 }
 0x5af   :  { %5091 = vmatprep.subr.mxu0 %v5842_v38 }
 0x5b0   :  { %5092 = vmatpush3.msra.mxu0 %v3763_v7 }
 0x5b1   :  { %5093 = vmatprep.subr.mxu0 %v5842_v38 }
 0x5b2   :  { %5094 = vmatpush3.msra.mxu0 %v3762_v46 }
 0x5b3   :  { %5095 = vmatprep.subr.mxu0 %v5842_v38 }
 0x5b4   :  { %5096 = vmatpush3.msra.mxu0 %v3761_v5 }
 0x5b5   :  { %5097 = vmatprep.subr.mxu0 %v5842_v38 }
 0x5b6   :  { %5098 = vmatpush3.msra.mxu0 %v3760_v62 }
 0x5b7   :  { %5099 = vmatprep.subr.mxu0 %v5842_v38 }
 0x5b8   :  { %5100 = vmatpush3.msra.mxu0 %v3759_v23 }
 0x5b9   :  { %5101 = vmatprep.subr.mxu0 %v5842_v38 }
 0x5ba   :  { %5102 = vmatpush3.msra.mxu0 %v3758_v36 }
 0x5bb   :  { %5103 = vmatprep.subr.mxu0 %v5842_v38 }
 0x5bc   :  { %5104 = vmatpush3.msra.mxu0 %v3757_v49 }
 0x5bd   :  { %5105 = vmatprep.subr.mxu0 %v5842_v38 }
 0x5be   :  { %5106 = vmatpush3.msra.mxu0 %v3756_v40  ;;  %v3746_v63 = vpop.f32.mrf.mxu1 }
 0x5bf   :  { %5107 = vmatprep.subr.mxu0 %v5842_v38 }
 0x5c0   :  { %5108 = vmatpush3.msra.mxu0 %v3755_v42  ;;  %v5084_v0 = vpop.f32.mrf.mxu1 }
 0x5c1   :  { %5109 = vmatprep.subr.mxu0 %v5842_v38 }
 0x5c2   :  { %5110 = vmatpush3.msra.mxu0 %v3754_v26 }
 0x5c3   :  { %5111 = vmatprep.subr.mxu0 %v5842_v38 }
 0x5c4   :  { %5112 = vmatpush3.msra.mxu0 %v3753_v58 }
 0x5c5   :  { %5113 = vmatprep.subr.mxu0 %v5842_v38 }
 0x5c6   :  { %5114 = vmatpush3.msra.mxu0 %v3752_v48 }
 0x5c7   :  { %5115 = vmatprep.subr.mxu0 %v5842_v38 }
 0x5c8   :  { %5116 = vmatpush3.msra.mxu0 %v3751_v20 }
 0x5c9   :  { %5118 = vmatmul.mubr.f32.vlgmr.msra.gmra.mxu0 %v2351_v56 }
 0x609   :  { %v3139_v25 = vpop.f32.mrf.mxu0 }
 0x60a   :  { %v3140_v32 = vadd.f32 %v3139_v25, %v3072_v22 }
 0x60b   :  { %v4839_v30 = vpop.f32.mrf.mxu0 }
 0x60c   :  { %3143 = vst [vmem:[#allocation16] sm:$0x1] %v3140_v32 }
 0x629   :  { %v3312_v55 = vpop.f32.mrf.mxu0 }
 0x62a   :  { %v3313_v50 = vadd.f32 %v3312_v55, %v6593_v19  ;;  %v3857_v19 = vld [vmem:[%s6694_s12] sm:$0x1] }
 0x62b   :  { %v4909_v9 = vpop.f32.mrf.mxu0 }
 0x62c   :  { %v3402_v38 = vadd.f32 %v6616_v37, %v3313_v50 }
 0x649   :  { %v3485_v27 = vpop.f32.mrf.mxu0 }
 0x64a   :  { %v3489_v6 = vadd.f32 %v3485_v27, %v3402_v38 }
 0x64b   :  { %v4979_v45 = vpop.f32.mrf.mxu0 }
 0x64c   :  { %v3576_v28 = vadd.f32 %v6639_v33, %v3489_v6 }
 0x669   :  { %v3659_v47 = vpop.f32.mrf.mxu0 }
 0x66a   :  { %v3663_v1 = vadd.f32 %v3659_v47, %v3576_v28 }
 0x66b   :  { %v5049_v52 = vpop.f32.mrf.mxu0 }
 0x66c   :  { %v3750_v34 = vadd.f32 %v3746_v63, %v3663_v1 }
 0x689   :  { %v3833_v13 = vpop.f32.mrf.mxu0 }
 0x68a   :  { %v3837_v59 = vadd.f32 %v3833_v13, %v3750_v34 }
 0x68b   :  { %v5119_v57 = vpop.f32.mrf.mxu0 }
 0x68c   :  { %v3839_v16 = vadd.f32 %v3838_v12, %v3837_v59 }
 0x68e   :  { %v3840_v15 = vmax.f32 %v3839_v16, 0.0 }
 0x690   :  { %5153 = vmatmul.mubr.f32.vlgmr.msra.gmra.mxu1 %v3840_v15 }
 0x750   :  { %v3924_v37 = vpop.f32.mrf.mxu1 }
 0x751   :  { %v3925_v3 = vadd.f32 %v3924_v37, %v3857_v19 }
 0x752   :  { %v5154_v4 = vpop.f32.mrf.mxu1 }
 0x753   :  { %3928 = vst [vmem:[#allocation16 + $0x1] sm:$0x1] %v3925_v3 }
 0x754   :  { %5322 = shalt.err (!%p5319_p11)
}
 0x755   :  { %3938 = dma.vmem_to_hbm [thread:$0]  %s3936_s8, 32, %s6695_s13, [#allocation6]  }
 0x756   :  { %5339 = dma.done.wait [#allocation6], 32  }
 0x757   :  { %5340 = vsyncadd [#allocation6], 4294967264 }
 0x758   :  { %3942 = vsyncpa [#allocation5], 1 }
 0x759   :  { %3943 = vsyncpa [#allocation8], 1 }
 0x75a   :  { %3944 = vsyncpa [#allocation11], 1 }
 0x75b   :  { %3945 = vsyncpa [#allocation14], 1 }
 0x75c   :  { %3946 = vsyncpa [#allocation6], 1 }

</bundles_post_ra>
